<compile_context>
chip_gen: v5e
topology: v5e:2x2
jax: 0.10.0
libtpu: 0.0.40
codegen_flags: <defaults>
</compile_context>

<pallas_src>
import functools

import jax
import jax.numpy as jnp
import numpy as np
from jax.experimental import pallas as pl
from jax.experimental.pallas import tpu as pltpu

_SQRT_HALF = 0.7071067811865476


def _erf_f32(x):
    # Abramowitz & Stegun 7.1.26 (|abs err| <= 1.5e-7).  Uses only exp + VPU ops,
    # which lower on every Mosaic version (lax.erf support varies).
    a1, a2, a3, a4, a5 = (0.254829592, -0.284496736, 1.421413741,
                          -1.453152027, 1.061405429)
    p = 0.3275911
    sgn = jnp.where(x >= 0.0, 1.0, -1.0)
    ax = jnp.abs(x)
    t = 1.0 / (1.0 + p * ax)
    poly = ((((a5 * t + a4) * t + a3) * t + a2) * t + a1) * t
    return sgn * (1.0 - poly * jnp.exp(-ax * ax))


def _gelu_exact(z):
    # torch nn.GELU() default is the exact erf form.
    return 0.5 * z * (1.0 + _erf_f32(z * _SQRT_HALF))


def _encoder_block_kernel(x_ref, ln1g_ref, ln1b_ref, wqkv_ref, bqkv_ref,
                          wo_ref, bo_ref, ln2g_ref, ln2b_ref,
                          w1_ref, b1_ref, w2_ref, b2_ref,
                          out_ref, scores_ref=None, *, num_heads):
    bt, seq, d = x_ref.shape
    dk = d // num_heads
    cdt = wqkv_ref.dtype          # MXU input dtype; accumulation stays f32
    eps = 1e-5                    # torch nn.LayerNorm default

    # ---- LayerNorm 1 on full-precision x (rows = tokens: (bt*seq, d)) -----------
    x2 = x_ref[...].reshape(bt * seq, d).astype(jnp.float32)
    mu = jnp.mean(x2, axis=-1, keepdims=True)
    xc = x2 - mu
    var = jnp.mean(xc * xc, axis=-1, keepdims=True)
    h1 = xc * jax.lax.rsqrt(var + eps) * ln1g_ref[0] + ln1b_ref[0]

    # ---- fused Q/K/V projection: one (bt*seq, d) @ (d, 3d) MXU matmul -----------
    qkv = (jnp.dot(h1.astype(cdt), wqkv_ref[...],
                   preferred_element_type=jnp.float32) + bqkv_ref[0])
    qkv3 = qkv.reshape(bt, seq, 3 * d).astype(cdt)

    # ---- multi-head self-attention ------------------------------------------------
    scale = 1.0 / float(np.sqrt(dk))
    av_heads = []
    for hh in range(num_heads):                       # static unroll, H small
        lo = hh * dk
        qh = qkv3[:, :, lo:lo + dk]                   # (bt, seq, dk)
        kh = qkv3[:, :, d + lo:d + lo + dk]
        vh = qkv3[:, :, 2 * d + lo:2 * d + lo + dk]

        # 'bqd,bkd->bqk': leading-batch dot_general, no explicit transpose of K.
        s = jax.lax.dot_general(qh, kh, (((2,), (2,)), ((0,), (0,))),
                                preferred_element_type=jnp.float32) * scale
        s = s - jnp.max(s, axis=-1, keepdims=True)
        e = jnp.exp(s)
        denom = jnp.sum(e, axis=-1, keepdims=True)

        # Exact probabilities feed the returned scores (rows sum to 1); the
        # approximate (EUP) reciprocal is only used to rescale the AV matmul.
        if scores_ref is not None:
            scores_ref[:, hh, :, :] = (e / denom).astype(scores_ref.dtype)
        # attention dropout -> identity (inference / rate as configured)
        # TODO(synk): optional attention-mask path not wired (block calls mask=None).

        # 'bqk,bkd->bqd' on unnormalized e, normalized afterwards (fewer VPU muls).
        ev = jax.lax.dot_general(e.astype(cdt), vh, (((2,), (1,)), ((0,), (0,))),
                                 preferred_element_type=jnp.float32)
        av_heads.append(ev * pl.reciprocal(denom, approx=True))

    # One K=D output projection instead of H narrow K=dk matmuls.
    av = jnp.concatenate(av_heads, axis=-1).reshape(bt * seq, d)
    attn = jnp.dot(av.astype(cdt), wo_ref[...],
                   preferred_element_type=jnp.float32) + bo_ref[0]

    # ---- residual 1 (full-precision x) ---------------------------------------------
    res = x2 + attn

    # ---- LayerNorm 2 -----------------------------------------------------------------
    mu2 = jnp.mean(res, axis=-1, keepdims=True)
    rc = res - mu2
    var2 = jnp.mean(rc * rc, axis=-1, keepdims=True)
    h2 = rc * jax.lax.rsqrt(var2 + eps) * ln2g_ref[0] + ln2b_ref[0]

    # ---- MLP: (bt*seq, d) @ (d, 4d) -> GELU(erf) -> @ (4d, d) -------------------------
    z = (jnp.dot(h2.astype(cdt), w1_ref[...],
                 preferred_element_type=jnp.float32) + b1_ref[0])
    z = _gelu_exact(z)
    m = (jnp.dot(z.astype(cdt), w2_ref[...],
                 preferred_element_type=jnp.float32) + b2_ref[0])
    # MLP dropouts -> identity (inference)

    out = res + m
    out_ref[...] = out.reshape(bt, seq, d).astype(out_ref.dtype)


def _tpu_block_heuristics():
    """Returns (row_target, tensorcores_per_device) for the attached TPU."""
    try:
        kind = (getattr(jax.devices()[0], "device_kind", "") or "").lower()
    except Exception:
        kind = ""
    # v5e MXU is 4x128x128 -> 128 rows fill a push; v6e/v7x are 2x256x256 -> 256.
    row_target = 128 if ("v5e" in kind or "v5 lite" in kind or "v5lite" in kind) else 256
    # v4/v5p megacore and v7x expose 2 TensorCores per device: the single
    # 'parallel' grid axis must have >= 2 steps or one core sits idle.
    tc = 2 if any(t in kind for t in ("v4", "v5p", "v7", "7x")) else 1
    return row_target, tc


def transformer_encoder_block(x, params, *, num_heads, block_b=None,
                              compute_dtype=None, return_scores=True):
    """x: (B, S, D) float32. Returns (out (B,S,D), attn_scores (B,H,S,S) or None)."""
    B, S, D = x.shape
    dff = params["w1"].shape[0]
    f32 = jnp.float32

    row_target, tc_per_dev = _tpu_block_heuristics()
    if block_b is None:
        # Fill an MXU push: block_b * S >= row_target rows per grid step ...
        block_b = max(1, min(B, pl.cdiv(row_target, S)))
        # ... but keep at least one grid step per TensorCore (v7x / megacore).
        if tc_per_dev > 1 and B >= tc_per_dev:
            block_b = min(block_b, max(1, B // tc_per_dev))
    grid_b = pl.cdiv(B, block_b)          # non-divisible B -> masked tail block

    # One-time host-side layout plumbing: torch (out,in) -> (in,out); fuse Q/K/V.
    wqkv = jnp.concatenate([params["wq"].T, params["wk"].T, params["wv"].T], axis=1)
    wo_t, w1_t, w2_t = params["wo"].T, params["w1"].T, params["w2"].T
    wdt = compute_dtype if compute_dtype is not None else f32
    if compute_dtype is not None:
        # NOTE: x is intentionally NOT cast -- LayerNorm stats and residual adds
        # stay f32; only the MXU operands are cast inside the kernel.
        wqkv = wqkv.astype(compute_dtype)
        wo_t = wo_t.astype(compute_dtype)
        w1_t = w1_t.astype(compute_dtype)
        w2_t = w2_t.astype(compute_dtype)

    ln1_g = params["ln1_g"].reshape(1, D).astype(f32)
    ln1_b = params["ln1_b"].reshape(1, D).astype(f32)
    ln2_g = params["ln2_g"].reshape(1, D).astype(f32)
    ln2_b = params["ln2_b"].reshape(1, D).astype(f32)
    bqkv = jnp.concatenate([params["bq"], params["bk"], params["bv"]]
                           ).reshape(1, 3 * D).astype(f32)
    bo = params["bo"].reshape(1, D).astype(f32)
    b1 = params["b1"].reshape(1, dff).astype(f32)
    b2 = params["b2"].reshape(1, D).astype(f32)

    # Cost estimate (helps XLA schedule around the fused block).
    m_rows = B * S
    dk = D // num_heads
    flops = int(2 * m_rows * D * 3 * D            # QKV proj
                + 4 * B * num_heads * S * S * dk  # q@k^T + p@v
                + 2 * m_rows * D * D              # Wo
                + 4 * m_rows * D * dff)           # MLP
    transcendentals = int(B * num_heads * S * S + m_rows * dff)
    isz = jnp.dtype(wdt).itemsize
    bytes_accessed = int(4 * m_rows * D                                # x
                         + isz * (3 * D * D + D * D + 2 * D * dff)     # weights
                         + 4 * (7 * D + dff)                           # biases/LN
                         + 4 * m_rows * D                              # out
                         + (4 * B * num_heads * S * S if return_scores else 0))
    cost = pl.CostEstimate(flops=flops, transcendentals=transcendentals,
                           bytes_accessed=bytes_accessed)

    # Explicit VMEM budget (keep headroom; capped well below v7x's 64 MiB per TC).
    weight_bytes = isz * (3 * D * D + D * D + 2 * D * dff)
    act_bytes = 4 * block_b * S * (8 * D + 3 * D + 2 * dff + num_heads * S)
    vmem_limit = int(min(60 * 2**20, max(24 * 2**20, 2 * weight_bytes + 4 * act_bytes)))

    out_shape = [jax.ShapeDtypeStruct((B, S, D), f32)]
    out_specs = [pl.BlockSpec((block_b, S, D), lambda b: (b, 0, 0))]
    if return_scores:
        out_shape.append(jax.ShapeDtypeStruct((B, num_heads, S, S), f32))
        out_specs.append(pl.BlockSpec((block_b, num_heads, S, S),
                                      lambda b: (b, 0, 0, 0)))

    kernel = functools.partial(_encoder_block_kernel, num_heads=num_heads)

    def build(single_buffer_weights):
        def cspec(shape):
            if single_buffer_weights:
                # Constant blocks (index_map always (0,0)): no need to double-buffer.
                return pl.BlockSpec(shape, lambda b: (0, 0),
                                    pipeline_mode=pl.Buffered(1))
            return pl.BlockSpec(shape, lambda b: (0, 0))
        return pl.pallas_call(
            kernel,
            out_shape=tuple(out_shape),
            grid_spec=pltpu.PrefetchScalarGridSpec(
                num_scalar_prefetch=0,
                grid=(grid_b,),
                in_specs=[
                    pl.BlockSpec((block_b, S, D), lambda b: (b, 0, 0)),  # x
                    cspec((1, D)), cspec((1, D)),                        # ln1 g/b
                    cspec((D, 3 * D)), cspec((1, 3 * D)),                # Wqkv, bqkv
                    cspec((D, D)), cspec((1, D)),                        # Wo, bo
                    cspec((1, D)), cspec((1, D)),                        # ln2 g/b
                    cspec((D, dff)), cspec((1, dff)),                    # W1, b1
                    cspec((dff, D)), cspec((1, D)),                      # W2, b2
                ],
                out_specs=tuple(out_specs),
            ),
            compiler_params=pltpu.CompilerParams(
                dimension_semantics=("parallel",),
                vmem_limit_bytes=vmem_limit,
            ),
            cost_estimate=cost,
        )

    args = (x, ln1_g, ln1_b, wqkv, bqkv, wo_t, bo, ln2_g, ln2_b, w1_t, b1, w2_t, b2)
    try:
        results = build(True)(*args)
    except Exception:
        # pipeline_mode=pl.Buffered(1) rejected on this jax/libtpu -> default buffering.
        results = build(False)(*args)

    if return_scores:
        out, scores = results
        return out, scores
    (out,) = results
    return out, None


def _reference(x, params, num_heads):
    """Pure-JAX reference mirroring the PyTorch Transformer_Encoder_Block."""
    B, S, D = x.shape
    dk = D // num_heads
    eps = 1e-5

    def ln(v, g, b):
        mu = v.mean(-1, keepdims=True)
        var = ((v - mu) ** 2).mean(-1, keepdims=True)
        return (v - mu) / jnp.sqrt(var + eps) * g + b

    h = ln(x, params["ln1_g"], params["ln1_b"])
    q = h @ params["wq"].T + params["bq"]
    k = h @ params["wk"].T + params["bk"]
    v = h @ params["wv"].T + params["bv"]
    q = q.reshape(B, S, num_heads, dk).transpose(0, 2, 1, 3)
    k = k.reshape(B, S, num_heads, dk).transpose(0, 2, 1, 3)
    v = v.reshape(B, S, num_heads, dk).transpose(0, 2, 1, 3)
    scores = jax.nn.softmax(q @ jnp.swapaxes(k, -1, -2) / np.sqrt(dk), axis=-1)
    av = (scores @ v).transpose(0, 2, 1, 3).reshape(B, S, D)
    attn_out = av @ params["wo"].T + params["bo"]
    res = x + attn_out
    h2 = ln(res, params["ln2_g"], params["ln2_b"])
    z = h2 @ params["w1"].T + params["b1"]
    z = 0.5 * z * (1.0 + jax.scipy.special.erf(z * _SQRT_HALF))   # exact (torch) GELU
    m = z @ params["w2"].T + params["b2"]
    return res + m, scores


if __name__ == "__main__":
    B, S, D, H = 2, 8, 32, 4
    DFF = 4 * D

    key = jax.random.PRNGKey(0)
    ks = jax.random.split(key, 16)
    params = {
        "ln1_g": 1.0 + 0.1 * jax.random.normal(ks[0], (D,), jnp.float32),
        "ln1_b": 0.01 * jax.random.normal(ks[1], (D,), jnp.float32),
        "wq": 0.05 * jax.random.normal(ks[2], (D, D), jnp.float32),
        "bq": 0.01 * jax.random.normal(ks[3], (D,), jnp.float32),
        "wk": 0.05 * jax.random.normal(ks[4], (D, D), jnp.float32),
        "bk": 0.01 * jax.random.normal(ks[5], (D,), jnp.float32),
        "wv": 0.05 * jax.random.normal(ks[6], (D, D), jnp.float32),
        "bv": 0.01 * jax.random.normal(ks[7], (D,), jnp.float32),
        "wo": 0.05 * jax.random.normal(ks[8], (D, D), jnp.float32),
        "bo": 0.01 * jax.random.normal(ks[9], (D,), jnp.float32),
        "ln2_g": 1.0 + 0.1 * jax.random.normal(ks[10], (D,), jnp.float32),
        "ln2_b": 0.01 * jax.random.normal(ks[11], (D,), jnp.float32),
        "w1": 0.05 * jax.random.normal(ks[12], (DFF, D), jnp.float32),
        "b1": 0.01 * jax.random.normal(ks[13], (DFF,), jnp.float32),
        "w2": 0.05 * jax.random.normal(ks[14], (D, DFF), jnp.float32),
        "b2": 0.01 * jax.random.normal(ks[15], (D,), jnp.float32),
    }
    x = jax.random.normal(jax.random.PRNGKey(1), (B, S, D), jnp.float32)

    out, scores = transformer_encoder_block(x, params, num_heads=H)
    jax.block_until_ready((out, scores))

    ref_out, ref_scores = _reference(x, params, H)
    assert out.shape == (B, S, D) and scores.shape == (B, H, S, S)
    np.testing.assert_allclose(np.asarray(scores), np.asarray(ref_scores),
                               rtol=1e-2, atol=1e-2)
    np.testing.assert_allclose(np.asarray(out), np.asarray(ref_out),
                               rtol=1e-2, atol=1e-2)

    # Exercise the scores-free fast path as well.
    out2, none_scores = transformer_encoder_block(x, params, num_heads=H,
                                                  return_scores=False)
    jax.block_until_ready(out2)
    assert none_scores is None
    np.testing.assert_allclose(np.asarray(out2), np.asarray(out),
                               rtol=1e-5, atol=1e-5)

    print("KERNEL_OK")
</pallas_src>

<mosaic_0001>
module attributes {stable_mosaic.version = 11 : i64} {
  func.func @_encoder_block_kernel(%arg0: i32, %arg1: memref<2x8x32xf32, #tpu.memory_space<vmem>>, %arg2: memref<1x32xf32, #tpu.memory_space<vmem>>, %arg3: memref<1x32xf32, #tpu.memory_space<vmem>>, %arg4: memref<32x96xf32, #tpu.memory_space<vmem>>, %arg5: memref<1x96xf32, #tpu.memory_space<vmem>>, %arg6: memref<32x32xf32, #tpu.memory_space<vmem>>, %arg7: memref<1x32xf32, #tpu.memory_space<vmem>>, %arg8: memref<1x32xf32, #tpu.memory_space<vmem>>, %arg9: memref<1x32xf32, #tpu.memory_space<vmem>>, %arg10: memref<32x128xf32, #tpu.memory_space<vmem>>, %arg11: memref<1x128xf32, #tpu.memory_space<vmem>>, %arg12: memref<128x32xf32, #tpu.memory_space<vmem>>, %arg13: memref<1x32xf32, #tpu.memory_space<vmem>>, %arg14: memref<2x8x32xf32, #tpu.memory_space<vmem>>, %arg15: memref<2x4x8x8xf32, #tpu.memory_space<vmem>>) attributes {dimension_semantics = [#tpu.dimension_semantics<parallel>], iteration_bounds = array<i64: 1>, scalar_prefetch = 0 : i64, scratch_operands = 0 : i64, tpu.core_type = #tpu.core_type<tc>, window_params = [{transform_indices = @transform_0, window_bounds = array<i64: 2, 8, 32>}, {pipeline_mode = #tpu.pipeline_mode<synchronous>, transform_indices = @transform_1, window_bounds = array<i64: 1, 32>}, {pipeline_mode = #tpu.pipeline_mode<synchronous>, transform_indices = @transform_2, window_bounds = array<i64: 1, 32>}, {pipeline_mode = #tpu.pipeline_mode<synchronous>, transform_indices = @transform_3, window_bounds = array<i64: 32, 96>}, {pipeline_mode = #tpu.pipeline_mode<synchronous>, transform_indices = @transform_4, window_bounds = array<i64: 1, 96>}, {pipeline_mode = #tpu.pipeline_mode<synchronous>, transform_indices = @transform_5, window_bounds = array<i64: 32, 32>}, {pipeline_mode = #tpu.pipeline_mode<synchronous>, transform_indices = @transform_6, window_bounds = array<i64: 1, 32>}, {pipeline_mode = #tpu.pipeline_mode<synchronous>, transform_indices = @transform_7, window_bounds = array<i64: 1, 32>}, {pipeline_mode = #tpu.pipeline_mode<synchronous>, transform_indices = @transform_8, window_bounds = array<i64: 1, 32>}, {pipeline_mode = #tpu.pipeline_mode<synchronous>, transform_indices = @transform_9, window_bounds = array<i64: 32, 128>}, {pipeline_mode = #tpu.pipeline_mode<synchronous>, transform_indices = @transform_10, window_bounds = array<i64: 1, 128>}, {pipeline_mode = #tpu.pipeline_mode<synchronous>, transform_indices = @transform_11, window_bounds = array<i64: 128, 32>}, {pipeline_mode = #tpu.pipeline_mode<synchronous>, transform_indices = @transform_12, window_bounds = array<i64: 1, 32>}, {transform_indices = @transform_13, window_bounds = array<i64: 2, 8, 32>}, {transform_indices = @transform_14, window_bounds = array<i64: 2, 4, 8, 8>}]} {
    %c0 = arith.constant 0 : index
    %c0_0 = arith.constant 0 : index
    %c0_1 = arith.constant 0 : index
    %0 = vector.load %arg1[%c0, %c0_0, %c0_1] : memref<2x8x32xf32, #tpu.memory_space<vmem>>, vector<2x8x32xf32>
    %1 = vector.shape_cast %0 : vector<2x8x32xf32> to vector<16x32xf32>
    %cst = arith.constant dense<0.000000e+00> : vector<16xf32>
    %2 = vector.multi_reduction <add>, %1, %cst [1] : vector<16x32xf32> to vector<16xf32>
    %3 = vector.shape_cast %2 : vector<16xf32> to vector<16x1xf32>
    %cst_2 = arith.constant 3.200000e+01 : f32
    %4 = vector.broadcast %cst_2 : f32 to vector<16x1xf32>
    %5 = arith.divf %3, %4 : vector<16x1xf32>
    %6 = vector.broadcast %5 : vector<16x1xf32> to vector<16x32xf32>
    %7 = arith.subf %1, %6 : vector<16x32xf32>
    %8 = arith.mulf %7, %7 : vector<16x32xf32>
    %cst_3 = arith.constant dense<0.000000e+00> : vector<16xf32>
    %9 = vector.multi_reduction <add>, %8, %cst_3 [1] : vector<16x32xf32> to vector<16xf32>
    %10 = vector.shape_cast %9 : vector<16xf32> to vector<16x1xf32>
    %cst_4 = arith.constant 3.200000e+01 : f32
    %11 = vector.broadcast %cst_4 : f32 to vector<16x1xf32>
    %12 = arith.divf %10, %11 : vector<16x1xf32>
    %cst_5 = arith.constant 9.99999974E-6 : f32
    %13 = vector.broadcast %cst_5 : f32 to vector<16x1xf32>
    %14 = arith.addf %12, %13 : vector<16x1xf32>
    %15 = math.rsqrt %14 : vector<16x1xf32>
    %16 = vector.broadcast %15 : vector<16x1xf32> to vector<16x32xf32>
    %17 = arith.mulf %7, %16 : vector<16x32xf32>
    %c0_6 = arith.constant 0 : index
    %c0_7 = arith.constant 0 : index
    %18 = vector.load %arg2[%c0_6, %c0_7] : memref<1x32xf32, #tpu.memory_space<vmem>>, vector<1x32xf32>
    %19 = vector.shape_cast %18 : vector<1x32xf32> to vector<32xf32>
    %20 = vector.shape_cast %19 : vector<32xf32> to vector<1x32xf32>
    %21 = vector.broadcast %20 : vector<1x32xf32> to vector<16x32xf32>
    %22 = arith.mulf %17, %21 : vector<16x32xf32>
    %c0_8 = arith.constant 0 : index
    %c0_9 = arith.constant 0 : index
    %23 = vector.load %arg3[%c0_8, %c0_9] : memref<1x32xf32, #tpu.memory_space<vmem>>, vector<1x32xf32>
    %24 = vector.shape_cast %23 : vector<1x32xf32> to vector<32xf32>
    %25 = vector.shape_cast %24 : vector<32xf32> to vector<1x32xf32>
    %26 = vector.broadcast %25 : vector<1x32xf32> to vector<16x32xf32>
    %27 = arith.addf %22, %26 : vector<16x32xf32>
    %c0_10 = arith.constant 0 : index
    %c0_11 = arith.constant 0 : index
    %28 = vector.load %arg4[%c0_10, %c0_11] : memref<32x96xf32, #tpu.memory_space<vmem>>, vector<32x96xf32>
    %cst_12 = arith.constant dense<0.000000e+00> : vector<16x96xf32>
    %29 = tpu.matmul %27, %28, %cst_12 {dimension_numbers = #tpu.dot_dimension_numbers<[1], [0], [0], [1], [0, 0, 1, 1], [], []>} : vector<16x32xf32>, vector<32x96xf32>, vector<16x96xf32> -> vector<16x96xf32>
    %c0_13 = arith.constant 0 : index
    %c0_14 = arith.constant 0 : index
    %30 = vector.load %arg5[%c0_13, %c0_14] : memref<1x96xf32, #tpu.memory_space<vmem>>, vector<1x96xf32>
    %31 = vector.shape_cast %30 : vector<1x96xf32> to vector<96xf32>
    %32 = vector.shape_cast %31 : vector<96xf32> to vector<1x96xf32>
    %33 = vector.broadcast %32 : vector<1x96xf32> to vector<16x96xf32>
    %34 = arith.addf %29, %33 : vector<16x96xf32>
    %35 = vector.shape_cast %34 : vector<16x96xf32> to vector<2x8x96xf32>
    %36 = vector.extract_strided_slice %35 {offsets = [0, 0, 0], sizes = [2, 8, 8], strides = [1, 1, 1]} : vector<2x8x96xf32> to vector<2x8x8xf32>
    %37 = vector.extract_strided_slice %35 {offsets = [0, 0, 32], sizes = [2, 8, 8], strides = [1, 1, 1]} : vector<2x8x96xf32> to vector<2x8x8xf32>
    %38 = vector.extract_strided_slice %35 {offsets = [0, 0, 64], sizes = [2, 8, 8], strides = [1, 1, 1]} : vector<2x8x96xf32> to vector<2x8x8xf32>
    %cst_15 = arith.constant dense<0.000000e+00> : vector<2x8x8xf32>
    %39 = tpu.matmul %36, %37, %cst_15 {dimension_numbers = #tpu.dot_dimension_numbers<[2], [2], [1], [1], [0, 0, 0, 1, 1, 1], [0], [0]>} : vector<2x8x8xf32>, vector<2x8x8xf32>, vector<2x8x8xf32> -> vector<2x8x8xf32>
    %cst_16 = arith.constant 0.353553385 : f32
    %40 = vector.broadcast %cst_16 : f32 to vector<2x8x8xf32>
    %41 = arith.mulf %39, %40 : vector<2x8x8xf32>
    %cst_17 = arith.constant dense<0xFF800000> : vector<2x8xf32>
    %42 = vector.multi_reduction <maximumf>, %41, %cst_17 [2] : vector<2x8x8xf32> to vector<2x8xf32>
    %43 = vector.shape_cast %42 : vector<2x8xf32> to vector<2x8x1xf32>
    %44 = vector.broadcast %43 : vector<2x8x1xf32> to vector<2x8x8xf32>
    %45 = arith.subf %41, %44 : vector<2x8x8xf32>
    %46 = math.exp %45 : vector<2x8x8xf32>
    %cst_18 = arith.constant dense<0.000000e+00> : vector<2x8xf32>
    %47 = vector.multi_reduction <add>, %46, %cst_18 [2] : vector<2x8x8xf32> to vector<2x8xf32>
    %48 = vector.shape_cast %47 : vector<2x8xf32> to vector<2x8x1xf32>
    %49 = vector.broadcast %48 : vector<2x8x1xf32> to vector<2x8x8xf32>
    %50 = arith.divf %46, %49 : vector<2x8x8xf32>
    %c0_19 = arith.constant 0 : index
    %c0_20 = arith.constant 0 : index
    %c0_21 = arith.constant 0 : index
    %c0_22 = arith.constant 0 : index
    %51 = vector.load %arg15[%c0_19, %c0_20, %c0_21, %c0_22] : memref<2x4x8x8xf32, #tpu.memory_space<vmem>>, vector<2x1x8x8xf32>
    %52 = vector.shape_cast %51 : vector<2x1x8x8xf32> to vector<2x8x8xf32>
    %53 = vector.shape_cast %50 : vector<2x8x8xf32> to vector<2x1x8x8xf32>
    tpu.vector_store %arg15[%c0_19, %c0_20, %c0_21, %c0_22], %53 {strides = array<i32>} : memref<2x4x8x8xf32, #tpu.memory_space<vmem>>, vector<2x1x8x8xf32>,
    %cst_23 = arith.constant dense<0.000000e+00> : vector<2x8x8xf32>
    %54 = tpu.matmul %46, %38, %cst_23 {dimension_numbers = #tpu.dot_dimension_numbers<[2], [1], [1], [2], [0, 0, 0, 1, 1, 2], [0], [0]>} : vector<2x8x8xf32>, vector<2x8x8xf32>, vector<2x8x8xf32> -> vector<2x8x8xf32>
    %55 = tpu.reciprocal %48 {approx = true} : vector<2x8x1xf32> -> vector<2x8x1xf32>
    %56 = vector.broadcast %55 : vector<2x8x1xf32> to vector<2x8x8xf32>
    %57 = arith.mulf %54, %56 : vector<2x8x8xf32>
    %58 = vector.extract_strided_slice %35 {offsets = [0, 0, 8], sizes = [2, 8, 8], strides = [1, 1, 1]} : vector<2x8x96xf32> to vector<2x8x8xf32>
    %59 = vector.extract_strided_slice %35 {offsets = [0, 0, 40], sizes = [2, 8, 8], strides = [1, 1, 1]} : vector<2x8x96xf32> to vector<2x8x8xf32>
    %60 = vector.extract_strided_slice %35 {offsets = [0, 0, 72], sizes = [2, 8, 8], strides = [1, 1, 1]} : vector<2x8x96xf32> to vector<2x8x8xf32>
    %cst_24 = arith.constant dense<0.000000e+00> : vector<2x8x8xf32>
    %61 = tpu.matmul %58, %59, %cst_24 {dimension_numbers = #tpu.dot_dimension_numbers<[2], [2], [1], [1], [0, 0, 0, 1, 1, 1], [0], [0]>} : vector<2x8x8xf32>, vector<2x8x8xf32>, vector<2x8x8xf32> -> vector<2x8x8xf32>
    %cst_25 = arith.constant 0.353553385 : f32
    %62 = vector.broadcast %cst_25 : f32 to vector<2x8x8xf32>
    %63 = arith.mulf %61, %62 : vector<2x8x8xf32>
    %cst_26 = arith.constant dense<0xFF800000> : vector<2x8xf32>
    %64 = vector.multi_reduction <maximumf>, %63, %cst_26 [2] : vector<2x8x8xf32> to vector<2x8xf32>
    %65 = vector.shape_cast %64 : vector<2x8xf32> to vector<2x8x1xf32>
    %66 = vector.broadcast %65 : vector<2x8x1xf32> to vector<2x8x8xf32>
    %67 = arith.subf %63, %66 : vector<2x8x8xf32>
    %68 = math.exp %67 : vector<2x8x8xf32>
    %cst_27 = arith.constant dense<0.000000e+00> : vector<2x8xf32>
    %69 = vector.multi_reduction <add>, %68, %cst_27 [2] : vector<2x8x8xf32> to vector<2x8xf32>
    %70 = vector.shape_cast %69 : vector<2x8xf32> to vector<2x8x1xf32>
    %71 = vector.broadcast %70 : vector<2x8x1xf32> to vector<2x8x8xf32>
    %72 = arith.divf %68, %71 : vector<2x8x8xf32>
    %c0_28 = arith.constant 0 : index
    %c1 = arith.constant 1 : index
    %c0_29 = arith.constant 0 : index
    %c0_30 = arith.constant 0 : index
    %73 = vector.load %arg15[%c0_28, %c1, %c0_29, %c0_30] : memref<2x4x8x8xf32, #tpu.memory_space<vmem>>, vector<2x1x8x8xf32>
    %74 = vector.shape_cast %73 : vector<2x1x8x8xf32> to vector<2x8x8xf32>
    %75 = vector.shape_cast %72 : vector<2x8x8xf32> to vector<2x1x8x8xf32>
    tpu.vector_store %arg15[%c0_28, %c1, %c0_29, %c0_30], %75 {strides = array<i32>} : memref<2x4x8x8xf32, #tpu.memory_space<vmem>>, vector<2x1x8x8xf32>,
    %cst_31 = arith.constant dense<0.000000e+00> : vector<2x8x8xf32>
    %76 = tpu.matmul %68, %60, %cst_31 {dimension_numbers = #tpu.dot_dimension_numbers<[2], [1], [1], [2], [0, 0, 0, 1, 1, 2], [0], [0]>} : vector<2x8x8xf32>, vector<2x8x8xf32>, vector<2x8x8xf32> -> vector<2x8x8xf32>
    %77 = tpu.reciprocal %70 {approx = true} : vector<2x8x1xf32> -> vector<2x8x1xf32>
    %78 = vector.broadcast %77 : vector<2x8x1xf32> to vector<2x8x8xf32>
    %79 = arith.mulf %76, %78 : vector<2x8x8xf32>
    %80 = vector.extract_strided_slice %35 {offsets = [0, 0, 16], sizes = [2, 8, 8], strides = [1, 1, 1]} : vector<2x8x96xf32> to vector<2x8x8xf32>
    %81 = vector.extract_strided_slice %35 {offsets = [0, 0, 48], sizes = [2, 8, 8], strides = [1, 1, 1]} : vector<2x8x96xf32> to vector<2x8x8xf32>
    %82 = vector.extract_strided_slice %35 {offsets = [0, 0, 80], sizes = [2, 8, 8], strides = [1, 1, 1]} : vector<2x8x96xf32> to vector<2x8x8xf32>
    %cst_32 = arith.constant dense<0.000000e+00> : vector<2x8x8xf32>
    %83 = tpu.matmul %80, %81, %cst_32 {dimension_numbers = #tpu.dot_dimension_numbers<[2], [2], [1], [1], [0, 0, 0, 1, 1, 1], [0], [0]>} : vector<2x8x8xf32>, vector<2x8x8xf32>, vector<2x8x8xf32> -> vector<2x8x8xf32>
    %cst_33 = arith.constant 0.353553385 : f32
    %84 = vector.broadcast %cst_33 : f32 to vector<2x8x8xf32>
    %85 = arith.mulf %83, %84 : vector<2x8x8xf32>
    %cst_34 = arith.constant dense<0xFF800000> : vector<2x8xf32>
    %86 = vector.multi_reduction <maximumf>, %85, %cst_34 [2] : vector<2x8x8xf32> to vector<2x8xf32>
    %87 = vector.shape_cast %86 : vector<2x8xf32> to vector<2x8x1xf32>
    %88 = vector.broadcast %87 : vector<2x8x1xf32> to vector<2x8x8xf32>
    %89 = arith.subf %85, %88 : vector<2x8x8xf32>
    %90 = math.exp %89 : vector<2x8x8xf32>
    %cst_35 = arith.constant dense<0.000000e+00> : vector<2x8xf32>
    %91 = vector.multi_reduction <add>, %90, %cst_35 [2] : vector<2x8x8xf32> to vector<2x8xf32>
    %92 = vector.shape_cast %91 : vector<2x8xf32> to vector<2x8x1xf32>
    %93 = vector.broadcast %92 : vector<2x8x1xf32> to vector<2x8x8xf32>
    %94 = arith.divf %90, %93 : vector<2x8x8xf32>
    %c0_36 = arith.constant 0 : index
    %c2 = arith.constant 2 : index
    %c0_37 = arith.constant 0 : index
    %c0_38 = arith.constant 0 : index
    %95 = vector.load %arg15[%c0_36, %c2, %c0_37, %c0_38] : memref<2x4x8x8xf32, #tpu.memory_space<vmem>>, vector<2x1x8x8xf32>
    %96 = vector.shape_cast %95 : vector<2x1x8x8xf32> to vector<2x8x8xf32>
    %97 = vector.shape_cast %94 : vector<2x8x8xf32> to vector<2x1x8x8xf32>
    tpu.vector_store %arg15[%c0_36, %c2, %c0_37, %c0_38], %97 {strides = array<i32>} : memref<2x4x8x8xf32, #tpu.memory_space<vmem>>, vector<2x1x8x8xf32>,
    %cst_39 = arith.constant dense<0.000000e+00> : vector<2x8x8xf32>
    %98 = tpu.matmul %90, %82, %cst_39 {dimension_numbers = #tpu.dot_dimension_numbers<[2], [1], [1], [2], [0, 0, 0, 1, 1, 2], [0], [0]>} : vector<2x8x8xf32>, vector<2x8x8xf32>, vector<2x8x8xf32> -> vector<2x8x8xf32>
    %99 = tpu.reciprocal %92 {approx = true} : vector<2x8x1xf32> -> vector<2x8x1xf32>
    %100 = vector.broadcast %99 : vector<2x8x1xf32> to vector<2x8x8xf32>
    %101 = arith.mulf %98, %100 : vector<2x8x8xf32>
    %102 = vector.extract_strided_slice %35 {offsets = [0, 0, 24], sizes = [2, 8, 8], strides = [1, 1, 1]} : vector<2x8x96xf32> to vector<2x8x8xf32>
    %103 = vector.extract_strided_slice %35 {offsets = [0, 0, 56], sizes = [2, 8, 8], strides = [1, 1, 1]} : vector<2x8x96xf32> to vector<2x8x8xf32>
    %104 = vector.extract_strided_slice %35 {offsets = [0, 0, 88], sizes = [2, 8, 8], strides = [1, 1, 1]} : vector<2x8x96xf32> to vector<2x8x8xf32>
    %cst_40 = arith.constant dense<0.000000e+00> : vector<2x8x8xf32>
    %105 = tpu.matmul %102, %103, %cst_40 {dimension_numbers = #tpu.dot_dimension_numbers<[2], [2], [1], [1], [0, 0, 0, 1, 1, 1], [0], [0]>} : vector<2x8x8xf32>, vector<2x8x8xf32>, vector<2x8x8xf32> -> vector<2x8x8xf32>
    %cst_41 = arith.constant 0.353553385 : f32
    %106 = vector.broadcast %cst_41 : f32 to vector<2x8x8xf32>
    %107 = arith.mulf %105, %106 : vector<2x8x8xf32>
    %cst_42 = arith.constant dense<0xFF800000> : vector<2x8xf32>
    %108 = vector.multi_reduction <maximumf>, %107, %cst_42 [2] : vector<2x8x8xf32> to vector<2x8xf32>
    %109 = vector.shape_cast %108 : vector<2x8xf32> to vector<2x8x1xf32>
    %110 = vector.broadcast %109 : vector<2x8x1xf32> to vector<2x8x8xf32>
    %111 = arith.subf %107, %110 : vector<2x8x8xf32>
    %112 = math.exp %111 : vector<2x8x8xf32>
    %cst_43 = arith.constant dense<0.000000e+00> : vector<2x8xf32>
    %113 = vector.multi_reduction <add>, %112, %cst_43 [2] : vector<2x8x8xf32> to vector<2x8xf32>
    %114 = vector.shape_cast %113 : vector<2x8xf32> to vector<2x8x1xf32>
    %115 = vector.broadcast %114 : vector<2x8x1xf32> to vector<2x8x8xf32>
    %116 = arith.divf %112, %115 : vector<2x8x8xf32>
    %c0_44 = arith.constant 0 : index
    %c3 = arith.constant 3 : index
    %c0_45 = arith.constant 0 : index
    %c0_46 = arith.constant 0 : index
    %117 = vector.load %arg15[%c0_44, %c3, %c0_45, %c0_46] : memref<2x4x8x8xf32, #tpu.memory_space<vmem>>, vector<2x1x8x8xf32>
    %118 = vector.shape_cast %117 : vector<2x1x8x8xf32> to vector<2x8x8xf32>
    %119 = vector.shape_cast %116 : vector<2x8x8xf32> to vector<2x1x8x8xf32>
    tpu.vector_store %arg15[%c0_44, %c3, %c0_45, %c0_46], %119 {strides = array<i32>} : memref<2x4x8x8xf32, #tpu.memory_space<vmem>>, vector<2x1x8x8xf32>,
    %cst_47 = arith.constant dense<0.000000e+00> : vector<2x8x8xf32>
    %120 = tpu.matmul %112, %104, %cst_47 {dimension_numbers = #tpu.dot_dimension_numbers<[2], [1], [1], [2], [0, 0, 0, 1, 1, 2], [0], [0]>} : vector<2x8x8xf32>, vector<2x8x8xf32>, vector<2x8x8xf32> -> vector<2x8x8xf32>
    %121 = tpu.reciprocal %114 {approx = true} : vector<2x8x1xf32> -> vector<2x8x1xf32>
    %122 = vector.broadcast %121 : vector<2x8x1xf32> to vector<2x8x8xf32>
    %123 = arith.mulf %120, %122 : vector<2x8x8xf32>
    %124 = tpu.concatenate %57, %79, %101, %123 in 2 : vector<2x8x8xf32>, vector<2x8x8xf32>, vector<2x8x8xf32>, vector<2x8x8xf32> -> vector<2x8x32xf32>
    %125 = vector.shape_cast %124 : vector<2x8x32xf32> to vector<16x32xf32>
    %c0_48 = arith.constant 0 : index
    %c0_49 = arith.constant 0 : index
    %126 = vector.load %arg6[%c0_48, %c0_49] : memref<32x32xf32, #tpu.memory_space<vmem>>, vector<32x32xf32>
    %cst_50 = arith.constant dense<0.000000e+00> : vector<16x32xf32>
    %127 = tpu.matmul %125, %126, %cst_50 {dimension_numbers = #tpu.dot_dimension_numbers<[1], [0], [0], [1], [0, 0, 1, 1], [], []>} : vector<16x32xf32>, vector<32x32xf32>, vector<16x32xf32> -> vector<16x32xf32>
    %c0_51 = arith.constant 0 : index
    %c0_52 = arith.constant 0 : index
    %128 = vector.load %arg7[%c0_51, %c0_52] : memref<1x32xf32, #tpu.memory_space<vmem>>, vector<1x32xf32>
    %129 = vector.shape_cast %128 : vector<1x32xf32> to vector<32xf32>
    %130 = vector.shape_cast %129 : vector<32xf32> to vector<1x32xf32>
    %131 = vector.broadcast %130 : vector<1x32xf32> to vector<16x32xf32>
    %132 = arith.addf %127, %131 : vector<16x32xf32>
    %133 = arith.addf %1, %132 : vector<16x32xf32>
    %cst_53 = arith.constant dense<0.000000e+00> : vector<16xf32>
    %134 = vector.multi_reduction <add>, %133, %cst_53 [1] : vector<16x32xf32> to vector<16xf32>
    %135 = vector.shape_cast %134 : vector<16xf32> to vector<16x1xf32>
    %cst_54 = arith.constant 3.200000e+01 : f32
    %136 = vector.broadcast %cst_54 : f32 to vector<16x1xf32>
    %137 = arith.divf %135, %136 : vector<16x1xf32>
    %138 = vector.broadcast %137 : vector<16x1xf32> to vector<16x32xf32>
    %139 = arith.subf %133, %138 : vector<16x32xf32>
    %140 = arith.mulf %139, %139 : vector<16x32xf32>
    %cst_55 = arith.constant dense<0.000000e+00> : vector<16xf32>
    %141 = vector.multi_reduction <add>, %140, %cst_55 [1] : vector<16x32xf32> to vector<16xf32>
    %142 = vector.shape_cast %141 : vector<16xf32> to vector<16x1xf32>
    %cst_56 = arith.constant 3.200000e+01 : f32
    %143 = vector.broadcast %cst_56 : f32 to vector<16x1xf32>
    %144 = arith.divf %142, %143 : vector<16x1xf32>
    %cst_57 = arith.constant 9.99999974E-6 : f32
    %145 = vector.broadcast %cst_57 : f32 to vector<16x1xf32>
    %146 = arith.addf %144, %145 : vector<16x1xf32>
    %147 = math.rsqrt %146 : vector<16x1xf32>
    %148 = vector.broadcast %147 : vector<16x1xf32> to vector<16x32xf32>
    %149 = arith.mulf %139, %148 : vector<16x32xf32>
    %c0_58 = arith.constant 0 : index
    %c0_59 = arith.constant 0 : index
    %150 = vector.load %arg8[%c0_58, %c0_59] : memref<1x32xf32, #tpu.memory_space<vmem>>, vector<1x32xf32>
    %151 = vector.shape_cast %150 : vector<1x32xf32> to vector<32xf32>
    %152 = vector.shape_cast %151 : vector<32xf32> to vector<1x32xf32>
    %153 = vector.broadcast %152 : vector<1x32xf32> to vector<16x32xf32>
    %154 = arith.mulf %149, %153 : vector<16x32xf32>
    %c0_60 = arith.constant 0 : index
    %c0_61 = arith.constant 0 : index
    %155 = vector.load %arg9[%c0_60, %c0_61] : memref<1x32xf32, #tpu.memory_space<vmem>>, vector<1x32xf32>
    %156 = vector.shape_cast %155 : vector<1x32xf32> to vector<32xf32>
    %157 = vector.shape_cast %156 : vector<32xf32> to vector<1x32xf32>
    %158 = vector.broadcast %157 : vector<1x32xf32> to vector<16x32xf32>
    %159 = arith.addf %154, %158 : vector<16x32xf32>
    %c0_62 = arith.constant 0 : index
    %c0_63 = arith.constant 0 : index
    %160 = vector.load %arg10[%c0_62, %c0_63] : memref<32x128xf32, #tpu.memory_space<vmem>>, vector<32x128xf32>
    %cst_64 = arith.constant dense<0.000000e+00> : vector<16x128xf32>
    %161 = tpu.matmul %159, %160, %cst_64 {dimension_numbers = #tpu.dot_dimension_numbers<[1], [0], [0], [1], [0, 0, 1, 1], [], []>} : vector<16x32xf32>, vector<32x128xf32>, vector<16x128xf32> -> vector<16x128xf32>
    %c0_65 = arith.constant 0 : index
    %c0_66 = arith.constant 0 : index
    %162 = vector.load %arg11[%c0_65, %c0_66] : memref<1x128xf32, #tpu.memory_space<vmem>>, vector<1x128xf32>
    %163 = vector.shape_cast %162 : vector<1x128xf32> to vector<128xf32>
    %164 = vector.shape_cast %163 : vector<128xf32> to vector<1x128xf32>
    %165 = vector.broadcast %164 : vector<1x128xf32> to vector<16x128xf32>
    %166 = arith.addf %161, %165 : vector<16x128xf32>
    %cst_67 = arith.constant 5.000000e-01 : f32
    %167 = vector.broadcast %cst_67 : f32 to vector<16x128xf32>
    %168 = arith.mulf %167, %166 : vector<16x128xf32>
    %cst_68 = arith.constant 0.707106769 : f32
    %169 = vector.broadcast %cst_68 : f32 to vector<16x128xf32>
    %170 = arith.mulf %166, %169 : vector<16x128xf32>
    %cst_69 = arith.constant 0.000000e+00 : f32
    %171 = vector.broadcast %cst_69 : f32 to vector<16x128xf32>
    %172 = arith.cmpf oge, %170, %171 : vector<16x128xf32>
    %cst_70 = arith.constant 1.000000e+00 : f32
    %cst_71 = arith.constant -1.000000e+00 : f32
    %173 = vector.broadcast %cst_70 : f32 to vector<16x128xf32>
    %174 = vector.broadcast %cst_71 : f32 to vector<16x128xf32>
    %175 = arith.select %172, %173, %174 : vector<16x128xi1>, vector<16x128xf32>
    %176 = math.absf %170 : vector<16x128xf32>
    %cst_72 = arith.constant 0.327591091 : f32
    %177 = vector.broadcast %cst_72 : f32 to vector<16x128xf32>
    %178 = arith.mulf %177, %176 : vector<16x128xf32>
    %cst_73 = arith.constant 1.000000e+00 : f32
    %179 = vector.broadcast %cst_73 : f32 to vector<16x128xf32>
    %180 = arith.addf %179, %178 : vector<16x128xf32>
    %cst_74 = arith.constant 1.000000e+00 : f32
    %181 = vector.broadcast %cst_74 : f32 to vector<16x128xf32>
    %182 = arith.divf %181, %180 : vector<16x128xf32>
    %cst_75 = arith.constant 1.06140542 : f32
    %183 = vector.broadcast %cst_75 : f32 to vector<16x128xf32>
    %184 = arith.mulf %183, %182 : vector<16x128xf32>
    %cst_76 = arith.constant -1.45315206 : f32
    %185 = vector.broadcast %cst_76 : f32 to vector<16x128xf32>
    %186 = arith.addf %184, %185 : vector<16x128xf32>
    %187 = arith.mulf %186, %182 : vector<16x128xf32>
    %cst_77 = arith.constant 1.42141378 : f32
    %188 = vector.broadcast %cst_77 : f32 to vector<16x128xf32>
    %189 = arith.addf %187, %188 : vector<16x128xf32>
    %190 = arith.mulf %189, %182 : vector<16x128xf32>
    %cst_78 = arith.constant -0.284496725 : f32
    %191 = vector.broadcast %cst_78 : f32 to vector<16x128xf32>
    %192 = arith.addf %190, %191 : vector<16x128xf32>
    %193 = arith.mulf %192, %182 : vector<16x128xf32>
    %cst_79 = arith.constant 0.254829586 : f32
    %194 = vector.broadcast %cst_79 : f32 to vector<16x128xf32>
    %195 = arith.addf %193, %194 : vector<16x128xf32>
    %196 = arith.mulf %195, %182 : vector<16x128xf32>
    %cst_80 = arith.constant 0.000000e+00 : f32
    %197 = vector.broadcast %cst_80 : f32 to vector<16x128xf32>
    %198 = arith.subf %197, %176 : vector<16x128xf32>
    %199 = arith.mulf %198, %176 : vector<16x128xf32>
    %200 = math.exp %199 : vector<16x128xf32>
    %201 = arith.mulf %196, %200 : vector<16x128xf32>
    %cst_81 = arith.constant 1.000000e+00 : f32
    %202 = vector.broadcast %cst_81 : f32 to vector<16x128xf32>
    %203 = arith.subf %202, %201 : vector<16x128xf32>
    %204 = arith.mulf %175, %203 : vector<16x128xf32>
    %cst_82 = arith.constant 1.000000e+00 : f32
    %205 = vector.broadcast %cst_82 : f32 to vector<16x128xf32>
    %206 = arith.addf %205, %204 : vector<16x128xf32>
    %207 = arith.mulf %168, %206 : vector<16x128xf32>
    %c0_83 = arith.constant 0 : index
    %c0_84 = arith.constant 0 : index
    %208 = vector.load %arg12[%c0_83, %c0_84] : memref<128x32xf32, #tpu.memory_space<vmem>>, vector<128x32xf32>
    %cst_85 = arith.constant dense<0.000000e+00> : vector<16x32xf32>
    %209 = tpu.matmul %207, %208, %cst_85 {dimension_numbers = #tpu.dot_dimension_numbers<[1], [0], [0], [1], [0, 0, 1, 1], [], []>} : vector<16x128xf32>, vector<128x32xf32>, vector<16x32xf32> -> vector<16x32xf32>
    %c0_86 = arith.constant 0 : index
    %c0_87 = arith.constant 0 : index
    %210 = vector.load %arg13[%c0_86, %c0_87] : memref<1x32xf32, #tpu.memory_space<vmem>>, vector<1x32xf32>
    %211 = vector.shape_cast %210 : vector<1x32xf32> to vector<32xf32>
    %212 = vector.shape_cast %211 : vector<32xf32> to vector<1x32xf32>
    %213 = vector.broadcast %212 : vector<1x32xf32> to vector<16x32xf32>
    %214 = arith.addf %209, %213 : vector<16x32xf32>
    %215 = arith.addf %133, %214 : vector<16x32xf32>
    %216 = vector.shape_cast %215 : vector<16x32xf32> to vector<2x8x32xf32>
    %c0_88 = arith.constant 0 : index
    %c0_89 = arith.constant 0 : index
    %c0_90 = arith.constant 0 : index
    %217 = vector.load %arg14[%c0_88, %c0_89, %c0_90] : memref<2x8x32xf32, #tpu.memory_space<vmem>>, vector<2x8x32xf32>
    tpu.vector_store %arg14[%c0_88, %c0_89, %c0_90], %216 {strides = array<i32>} : memref<2x8x32xf32, #tpu.memory_space<vmem>>, vector<2x8x32xf32>,
    return
  }
  func.func @transform_0(%arg0: i32) -> (i32, i32, i32) {
    %c0_i32 = arith.constant 0 : i32
    %c0_i32_0 = arith.constant 0 : i32
    %c0_i32_1 = arith.constant 0 : i32
    return %arg0, %c0_i32, %c0_i32_0 : i32, i32, i32
  }
  func.func @transform_1(%arg0: i32) -> (i32, i32) {
    %c0_i32 = arith.constant 0 : i32
    %c0_i32_0 = arith.constant 0 : i32
    %c0_i32_1 = arith.constant 0 : i32
    return %c0_i32, %c0_i32_0 : i32, i32
  }
  func.func @transform_2(%arg0: i32) -> (i32, i32) {
    %c0_i32 = arith.constant 0 : i32
    %c0_i32_0 = arith.constant 0 : i32
    %c0_i32_1 = arith.constant 0 : i32
    return %c0_i32, %c0_i32_0 : i32, i32
  }
  func.func @transform_3(%arg0: i32) -> (i32, i32) {
    %c0_i32 = arith.constant 0 : i32
    %c0_i32_0 = arith.constant 0 : i32
    %c0_i32_1 = arith.constant 0 : i32
    return %c0_i32, %c0_i32_0 : i32, i32
  }
  func.func @transform_4(%arg0: i32) -> (i32, i32) {
    %c0_i32 = arith.constant 0 : i32
    %c0_i32_0 = arith.constant 0 : i32
    %c0_i32_1 = arith.constant 0 : i32
    return %c0_i32, %c0_i32_0 : i32, i32
  }
  func.func @transform_5(%arg0: i32) -> (i32, i32) {
    %c0_i32 = arith.constant 0 : i32
    %c0_i32_0 = arith.constant 0 : i32
    %c0_i32_1 = arith.constant 0 : i32
    return %c0_i32, %c0_i32_0 : i32, i32
  }
  func.func @transform_6(%arg0: i32) -> (i32, i32) {
    %c0_i32 = arith.constant 0 : i32
    %c0_i32_0 = arith.constant 0 : i32
    %c0_i32_1 = arith.constant 0 : i32
    return %c0_i32, %c0_i32_0 : i32, i32
  }
  func.func @transform_7(%arg0: i32) -> (i32, i32) {
    %c0_i32 = arith.constant 0 : i32
    %c0_i32_0 = arith.constant 0 : i32
    %c0_i32_1 = arith.constant 0 : i32
    return %c0_i32, %c0_i32_0 : i32, i32
  }
  func.func @transform_8(%arg0: i32) -> (i32, i32) {
    %c0_i32 = arith.constant 0 : i32
    %c0_i32_0 = arith.constant 0 : i32
    %c0_i32_1 = arith.constant 0 : i32
    return %c0_i32, %c0_i32_0 : i32, i32
  }
  func.func @transform_9(%arg0: i32) -> (i32, i32) {
    %c0_i32 = arith.constant 0 : i32
    %c0_i32_0 = arith.constant 0 : i32
    %c0_i32_1 = arith.constant 0 : i32
    return %c0_i32, %c0_i32_0 : i32, i32
  }
  func.func @transform_10(%arg0: i32) -> (i32, i32) {
    %c0_i32 = arith.constant 0 : i32
    %c0_i32_0 = arith.constant 0 : i32
    %c0_i32_1 = arith.constant 0 : i32
    return %c0_i32, %c0_i32_0 : i32, i32
  }
  func.func @transform_11(%arg0: i32) -> (i32, i32) {
    %c0_i32 = arith.constant 0 : i32
    %c0_i32_0 = arith.constant 0 : i32
    %c0_i32_1 = arith.constant 0 : i32
    return %c0_i32, %c0_i32_0 : i32, i32
  }
  func.func @transform_12(%arg0: i32) -> (i32, i32) {
    %c0_i32 = arith.constant 0 : i32
    %c0_i32_0 = arith.constant 0 : i32
    %c0_i32_1 = arith.constant 0 : i32
    return %c0_i32, %c0_i32_0 : i32, i32
  }
  func.func @transform_13(%arg0: i32) -> (i32, i32, i32) {
    %c0_i32 = arith.constant 0 : i32
    %c0_i32_0 = arith.constant 0 : i32
    %c0_i32_1 = arith.constant 0 : i32
    return %arg0, %c0_i32, %c0_i32_0 : i32, i32, i32
  }
  func.func @transform_14(%arg0: i32) -> (i32, i32, i32, i32) {
    %c0_i32 = arith.constant 0 : i32
    %c0_i32_0 = arith.constant 0 : i32
    %c0_i32_1 = arith.constant 0 : i32
    %c0_i32_2 = arith.constant 0 : i32
    return %arg0, %c0_i32, %c0_i32_0, %c0_i32_1 : i32, i32, i32, i32
  }
}

module attributes {stable_mosaic.version = 11 : i64} {
  func.func @_encoder_block_kernel(%arg0: i32, %arg1: memref<2x8x32xf32, #tpu.memory_space<vmem>>, %arg2: memref<1x32xf32, #tpu.memory_space<vmem>>, %arg3: memref<1x32xf32, #tpu.memory_space<vmem>>, %arg4: memref<32x96xf32, #tpu.memory_space<vmem>>, %arg5: memref<1x96xf32, #tpu.memory_space<vmem>>, %arg6: memref<32x32xf32, #tpu.memory_space<vmem>>, %arg7: memref<1x32xf32, #tpu.memory_space<vmem>>, %arg8: memref<1x32xf32, #tpu.memory_space<vmem>>, %arg9: memref<1x32xf32, #tpu.memory_space<vmem>>, %arg10: memref<32x128xf32, #tpu.memory_space<vmem>>, %arg11: memref<1x128xf32, #tpu.memory_space<vmem>>, %arg12: memref<128x32xf32, #tpu.memory_space<vmem>>, %arg13: memref<1x32xf32, #tpu.memory_space<vmem>>, %arg14: memref<2x8x32xf32, #tpu.memory_space<vmem>>, %arg15: memref<2x4x8x8xf32, #tpu.memory_space<vmem>>) attributes {dimension_semantics = [#tpu.dimension_semantics<parallel>], iteration_bounds = array<i64: 1>, scalar_prefetch = 0 : i64, scratch_operands = 0 : i64, tpu.core_type = #tpu.core_type<tc>, window_params = [{transform_indices = @transform_0, window_bounds = array<i64: 2, 8, 32>}, {pipeline_mode = #tpu.pipeline_mode<synchronous>, transform_indices = @transform_1, window_bounds = array<i64: 1, 32>}, {pipeline_mode = #tpu.pipeline_mode<synchronous>, transform_indices = @transform_2, window_bounds = array<i64: 1, 32>}, {pipeline_mode = #tpu.pipeline_mode<synchronous>, transform_indices = @transform_3, window_bounds = array<i64: 32, 96>}, {pipeline_mode = #tpu.pipeline_mode<synchronous>, transform_indices = @transform_4, window_bounds = array<i64: 1, 96>}, {pipeline_mode = #tpu.pipeline_mode<synchronous>, transform_indices = @transform_5, window_bounds = array<i64: 32, 32>}, {pipeline_mode = #tpu.pipeline_mode<synchronous>, transform_indices = @transform_6, window_bounds = array<i64: 1, 32>}, {pipeline_mode = #tpu.pipeline_mode<synchronous>, transform_indices = @transform_7, window_bounds = array<i64: 1, 32>}, {pipeline_mode = #tpu.pipeline_mode<synchronous>, transform_indices = @transform_8, window_bounds = array<i64: 1, 32>}, {pipeline_mode = #tpu.pipeline_mode<synchronous>, transform_indices = @transform_9, window_bounds = array<i64: 32, 128>}, {pipeline_mode = #tpu.pipeline_mode<synchronous>, transform_indices = @transform_10, window_bounds = array<i64: 1, 128>}, {pipeline_mode = #tpu.pipeline_mode<synchronous>, transform_indices = @transform_11, window_bounds = array<i64: 128, 32>}, {pipeline_mode = #tpu.pipeline_mode<synchronous>, transform_indices = @transform_12, window_bounds = array<i64: 1, 32>}, {transform_indices = @transform_13, window_bounds = array<i64: 2, 8, 32>}, {transform_indices = @transform_14, window_bounds = array<i64: 2, 4, 8, 8>}]} {
    %c0 = arith.constant 0 : index
    %c0_0 = arith.constant 0 : index
    %c0_1 = arith.constant 0 : index
    %0 = vector.load %arg1[%c0, %c0_0, %c0_1] : memref<2x8x32xf32, #tpu.memory_space<vmem>>, vector<2x8x32xf32>
    %1 = vector.shape_cast %0 : vector<2x8x32xf32> to vector<16x32xf32>
    %cst = arith.constant dense<0.000000e+00> : vector<16xf32>
    %2 = vector.multi_reduction <add>, %1, %cst [1] : vector<16x32xf32> to vector<16xf32>
    %3 = vector.shape_cast %2 : vector<16xf32> to vector<16x1xf32>
    %cst_2 = arith.constant 3.200000e+01 : f32
    %4 = vector.broadcast %cst_2 : f32 to vector<16x1xf32>
    %5 = arith.divf %3, %4 : vector<16x1xf32>
    %6 = vector.broadcast %5 : vector<16x1xf32> to vector<16x32xf32>
    %7 = arith.subf %1, %6 : vector<16x32xf32>
    %8 = arith.mulf %7, %7 : vector<16x32xf32>
    %cst_3 = arith.constant dense<0.000000e+00> : vector<16xf32>
    %9 = vector.multi_reduction <add>, %8, %cst_3 [1] : vector<16x32xf32> to vector<16xf32>
    %10 = vector.shape_cast %9 : vector<16xf32> to vector<16x1xf32>
    %cst_4 = arith.constant 3.200000e+01 : f32
    %11 = vector.broadcast %cst_4 : f32 to vector<16x1xf32>
    %12 = arith.divf %10, %11 : vector<16x1xf32>
    %cst_5 = arith.constant 9.99999974E-6 : f32
    %13 = vector.broadcast %cst_5 : f32 to vector<16x1xf32>
    %14 = arith.addf %12, %13 : vector<16x1xf32>
    %15 = math.rsqrt %14 : vector<16x1xf32>
    %16 = vector.broadcast %15 : vector<16x1xf32> to vector<16x32xf32>
    %17 = arith.mulf %7, %16 : vector<16x32xf32>
    %c0_6 = arith.constant 0 : index
    %c0_7 = arith.constant 0 : index
    %18 = vector.load %arg2[%c0_6, %c0_7] : memref<1x32xf32, #tpu.memory_space<vmem>>, vector<1x32xf32>
    %19 = vector.shape_cast %18 : vector<1x32xf32> to vector<32xf32>
    %20 = vector.shape_cast %19 : vector<32xf32> to vector<1x32xf32>
    %21 = vector.broadcast %20 : vector<1x32xf32> to vector<16x32xf32>
    %22 = arith.mulf %17, %21 : vector<16x32xf32>
    %c0_8 = arith.constant 0 : index
    %c0_9 = arith.constant 0 : index
    %23 = vector.load %arg3[%c0_8, %c0_9] : memref<1x32xf32, #tpu.memory_space<vmem>>, vector<1x32xf32>
    %24 = vector.shape_cast %23 : vector<1x32xf32> to vector<32xf32>
    %25 = vector.shape_cast %24 : vector<32xf32> to vector<1x32xf32>
    %26 = vector.broadcast %25 : vector<1x32xf32> to vector<16x32xf32>
    %27 = arith.addf %22, %26 : vector<16x32xf32>
    %c0_10 = arith.constant 0 : index
    %c0_11 = arith.constant 0 : index
    %28 = vector.load %arg4[%c0_10, %c0_11] : memref<32x96xf32, #tpu.memory_space<vmem>>, vector<32x96xf32>
    %cst_12 = arith.constant dense<0.000000e+00> : vector<16x96xf32>
    %29 = tpu.matmul %27, %28, %cst_12 {dimension_numbers = #tpu.dot_dimension_numbers<[1], [0], [0], [1], [0, 0, 1, 1], [], []>} : vector<16x32xf32>, vector<32x96xf32>, vector<16x96xf32> -> vector<16x96xf32>
    %c0_13 = arith.constant 0 : index
    %c0_14 = arith.constant 0 : index
    %30 = vector.load %arg5[%c0_13, %c0_14] : memref<1x96xf32, #tpu.memory_space<vmem>>, vector<1x96xf32>
    %31 = vector.shape_cast %30 : vector<1x96xf32> to vector<96xf32>
    %32 = vector.shape_cast %31 : vector<96xf32> to vector<1x96xf32>
    %33 = vector.broadcast %32 : vector<1x96xf32> to vector<16x96xf32>
    %34 = arith.addf %29, %33 : vector<16x96xf32>
    %35 = vector.shape_cast %34 : vector<16x96xf32> to vector<2x8x96xf32>
    %36 = vector.extract_strided_slice %35 {offsets = [0, 0, 0], sizes = [2, 8, 8], strides = [1, 1, 1]} : vector<2x8x96xf32> to vector<2x8x8xf32>
    %37 = vector.extract_strided_slice %35 {offsets = [0, 0, 32], sizes = [2, 8, 8], strides = [1, 1, 1]} : vector<2x8x96xf32> to vector<2x8x8xf32>
    %38 = vector.extract_strided_slice %35 {offsets = [0, 0, 64], sizes = [2, 8, 8], strides = [1, 1, 1]} : vector<2x8x96xf32> to vector<2x8x8xf32>
    %cst_15 = arith.constant dense<0.000000e+00> : vector<2x8x8xf32>
    %39 = tpu.matmul %36, %37, %cst_15 {dimension_numbers = #tpu.dot_dimension_numbers<[2], [2], [1], [1], [0, 0, 0, 1, 1, 1], [0], [0]>} : vector<2x8x8xf32>, vector<2x8x8xf32>, vector<2x8x8xf32> -> vector<2x8x8xf32>
    %cst_16 = arith.constant 0.353553385 : f32
    %40 = vector.broadcast %cst_16 : f32 to vector<2x8x8xf32>
    %41 = arith.mulf %39, %40 : vector<2x8x8xf32>
    %cst_17 = arith.constant dense<0xFF800000> : vector<2x8xf32>
    %42 = vector.multi_reduction <maximumf>, %41, %cst_17 [2] : vector<2x8x8xf32> to vector<2x8xf32>
    %43 = vector.shape_cast %42 : vector<2x8xf32> to vector<2x8x1xf32>
    %44 = vector.broadcast %43 : vector<2x8x1xf32> to vector<2x8x8xf32>
    %45 = arith.subf %41, %44 : vector<2x8x8xf32>
    %46 = math.exp %45 : vector<2x8x8xf32>
    %cst_18 = arith.constant dense<0.000000e+00> : vector<2x8xf32>
    %47 = vector.multi_reduction <add>, %46, %cst_18 [2] : vector<2x8x8xf32> to vector<2x8xf32>
    %48 = vector.shape_cast %47 : vector<2x8xf32> to vector<2x8x1xf32>
    %49 = vector.broadcast %48 : vector<2x8x1xf32> to vector<2x8x8xf32>
    %50 = arith.divf %46, %49 : vector<2x8x8xf32>
    %c0_19 = arith.constant 0 : index
    %c0_20 = arith.constant 0 : index
    %c0_21 = arith.constant 0 : index
    %c0_22 = arith.constant 0 : index
    %51 = vector.load %arg15[%c0_19, %c0_20, %c0_21, %c0_22] : memref<2x4x8x8xf32, #tpu.memory_space<vmem>>, vector<2x1x8x8xf32>
    %52 = vector.shape_cast %51 : vector<2x1x8x8xf32> to vector<2x8x8xf32>
    %53 = vector.shape_cast %50 : vector<2x8x8xf32> to vector<2x1x8x8xf32>
    tpu.vector_store %arg15[%c0_19, %c0_20, %c0_21, %c0_22], %53 {strides = array<i32>} : memref<2x4x8x8xf32, #tpu.memory_space<vmem>>, vector<2x1x8x8xf32>,
    %cst_23 = arith.constant dense<0.000000e+00> : vector<2x8x8xf32>
    %54 = tpu.matmul %46, %38, %cst_23 {dimension_numbers = #tpu.dot_dimension_numbers<[2], [1], [1], [2], [0, 0, 0, 1, 1, 2], [0], [0]>} : vector<2x8x8xf32>, vector<2x8x8xf32>, vector<2x8x8xf32> -> vector<2x8x8xf32>
    %55 = tpu.reciprocal %48 {approx = true} : vector<2x8x1xf32> -> vector<2x8x1xf32>
    %56 = vector.broadcast %55 : vector<2x8x1xf32> to vector<2x8x8xf32>
    %57 = arith.mulf %54, %56 : vector<2x8x8xf32>
    %58 = vector.extract_strided_slice %35 {offsets = [0, 0, 8], sizes = [2, 8, 8], strides = [1, 1, 1]} : vector<2x8x96xf32> to vector<2x8x8xf32>
    %59 = vector.extract_strided_slice %35 {offsets = [0, 0, 40], sizes = [2, 8, 8], strides = [1, 1, 1]} : vector<2x8x96xf32> to vector<2x8x8xf32>
    %60 = vector.extract_strided_slice %35 {offsets = [0, 0, 72], sizes = [2, 8, 8], strides = [1, 1, 1]} : vector<2x8x96xf32> to vector<2x8x8xf32>
    %cst_24 = arith.constant dense<0.000000e+00> : vector<2x8x8xf32>
    %61 = tpu.matmul %58, %59, %cst_24 {dimension_numbers = #tpu.dot_dimension_numbers<[2], [2], [1], [1], [0, 0, 0, 1, 1, 1], [0], [0]>} : vector<2x8x8xf32>, vector<2x8x8xf32>, vector<2x8x8xf32> -> vector<2x8x8xf32>
    %cst_25 = arith.constant 0.353553385 : f32
    %62 = vector.broadcast %cst_25 : f32 to vector<2x8x8xf32>
    %63 = arith.mulf %61, %62 : vector<2x8x8xf32>
    %cst_26 = arith.constant dense<0xFF800000> : vector<2x8xf32>
    %64 = vector.multi_reduction <maximumf>, %63, %cst_26 [2] : vector<2x8x8xf32> to vector<2x8xf32>
    %65 = vector.shape_cast %64 : vector<2x8xf32> to vector<2x8x1xf32>
    %66 = vector.broadcast %65 : vector<2x8x1xf32> to vector<2x8x8xf32>
    %67 = arith.subf %63, %66 : vector<2x8x8xf32>
    %68 = math.exp %67 : vector<2x8x8xf32>
    %cst_27 = arith.constant dense<0.000000e+00> : vector<2x8xf32>
    %69 = vector.multi_reduction <add>, %68, %cst_27 [2] : vector<2x8x8xf32> to vector<2x8xf32>
    %70 = vector.shape_cast %69 : vector<2x8xf32> to vector<2x8x1xf32>
    %71 = vector.broadcast %70 : vector<2x8x1xf32> to vector<2x8x8xf32>
    %72 = arith.divf %68, %71 : vector<2x8x8xf32>
    %c0_28 = arith.constant 0 : index
    %c1 = arith.constant 1 : index
    %c0_29 = arith.constant 0 : index
    %c0_30 = arith.constant 0 : index
    %73 = vector.load %arg15[%c0_28, %c1, %c0_29, %c0_30] : memref<2x4x8x8xf32, #tpu.memory_space<vmem>>, vector<2x1x8x8xf32>
    %74 = vector.shape_cast %73 : vector<2x1x8x8xf32> to vector<2x8x8xf32>
    %75 = vector.shape_cast %72 : vector<2x8x8xf32> to vector<2x1x8x8xf32>
    tpu.vector_store %arg15[%c0_28, %c1, %c0_29, %c0_30], %75 {strides = array<i32>} : memref<2x4x8x8xf32, #tpu.memory_space<vmem>>, vector<2x1x8x8xf32>,
    %cst_31 = arith.constant dense<0.000000e+00> : vector<2x8x8xf32>
    %76 = tpu.matmul %68, %60, %cst_31 {dimension_numbers = #tpu.dot_dimension_numbers<[2], [1], [1], [2], [0, 0, 0, 1, 1, 2], [0], [0]>} : vector<2x8x8xf32>, vector<2x8x8xf32>, vector<2x8x8xf32> -> vector<2x8x8xf32>
    %77 = tpu.reciprocal %70 {approx = true} : vector<2x8x1xf32> -> vector<2x8x1xf32>
    %78 = vector.broadcast %77 : vector<2x8x1xf32> to vector<2x8x8xf32>
    %79 = arith.mulf %76, %78 : vector<2x8x8xf32>
    %80 = vector.extract_strided_slice %35 {offsets = [0, 0, 16], sizes = [2, 8, 8], strides = [1, 1, 1]} : vector<2x8x96xf32> to vector<2x8x8xf32>
    %81 = vector.extract_strided_slice %35 {offsets = [0, 0, 48], sizes = [2, 8, 8], strides = [1, 1, 1]} : vector<2x8x96xf32> to vector<2x8x8xf32>
    %82 = vector.extract_strided_slice %35 {offsets = [0, 0, 80], sizes = [2, 8, 8], strides = [1, 1, 1]} : vector<2x8x96xf32> to vector<2x8x8xf32>
    %cst_32 = arith.constant dense<0.000000e+00> : vector<2x8x8xf32>
    %83 = tpu.matmul %80, %81, %cst_32 {dimension_numbers = #tpu.dot_dimension_numbers<[2], [2], [1], [1], [0, 0, 0, 1, 1, 1], [0], [0]>} : vector<2x8x8xf32>, vector<2x8x8xf32>, vector<2x8x8xf32> -> vector<2x8x8xf32>
    %cst_33 = arith.constant 0.353553385 : f32
    %84 = vector.broadcast %cst_33 : f32 to vector<2x8x8xf32>
    %85 = arith.mulf %83, %84 : vector<2x8x8xf32>
    %cst_34 = arith.constant dense<0xFF800000> : vector<2x8xf32>
    %86 = vector.multi_reduction <maximumf>, %85, %cst_34 [2] : vector<2x8x8xf32> to vector<2x8xf32>
    %87 = vector.shape_cast %86 : vector<2x8xf32> to vector<2x8x1xf32>
    %88 = vector.broadcast %87 : vector<2x8x1xf32> to vector<2x8x8xf32>
    %89 = arith.subf %85, %88 : vector<2x8x8xf32>
    %90 = math.exp %89 : vector<2x8x8xf32>
    %cst_35 = arith.constant dense<0.000000e+00> : vector<2x8xf32>
    %91 = vector.multi_reduction <add>, %90, %cst_35 [2] : vector<2x8x8xf32> to vector<2x8xf32>
    %92 = vector.shape_cast %91 : vector<2x8xf32> to vector<2x8x1xf32>
    %93 = vector.broadcast %92 : vector<2x8x1xf32> to vector<2x8x8xf32>
    %94 = arith.divf %90, %93 : vector<2x8x8xf32>
    %c0_36 = arith.constant 0 : index
    %c2 = arith.constant 2 : index
    %c0_37 = arith.constant 0 : index
    %c0_38 = arith.constant 0 : index
    %95 = vector.load %arg15[%c0_36, %c2, %c0_37, %c0_38] : memref<2x4x8x8xf32, #tpu.memory_space<vmem>>, vector<2x1x8x8xf32>
    %96 = vector.shape_cast %95 : vector<2x1x8x8xf32> to vector<2x8x8xf32>
    %97 = vector.shape_cast %94 : vector<2x8x8xf32> to vector<2x1x8x8xf32>
    tpu.vector_store %arg15[%c0_36, %c2, %c0_37, %c0_38], %97 {strides = array<i32>} : memref<2x4x8x8xf32, #tpu.memory_space<vmem>>, vector<2x1x8x8xf32>,
    %cst_39 = arith.constant dense<0.000000e+00> : vector<2x8x8xf32>
    %98 = tpu.matmul %90, %82, %cst_39 {dimension_numbers = #tpu.dot_dimension_numbers<[2], [1], [1], [2], [0, 0, 0, 1, 1, 2], [0], [0]>} : vector<2x8x8xf32>, vector<2x8x8xf32>, vector<2x8x8xf32> -> vector<2x8x8xf32>
    %99 = tpu.reciprocal %92 {approx = true} : vector<2x8x1xf32> -> vector<2x8x1xf32>
    %100 = vector.broadcast %99 : vector<2x8x1xf32> to vector<2x8x8xf32>
    %101 = arith.mulf %98, %100 : vector<2x8x8xf32>
    %102 = vector.extract_strided_slice %35 {offsets = [0, 0, 24], sizes = [2, 8, 8], strides = [1, 1, 1]} : vector<2x8x96xf32> to vector<2x8x8xf32>
    %103 = vector.extract_strided_slice %35 {offsets = [0, 0, 56], sizes = [2, 8, 8], strides = [1, 1, 1]} : vector<2x8x96xf32> to vector<2x8x8xf32>
    %104 = vector.extract_strided_slice %35 {offsets = [0, 0, 88], sizes = [2, 8, 8], strides = [1, 1, 1]} : vector<2x8x96xf32> to vector<2x8x8xf32>
    %cst_40 = arith.constant dense<0.000000e+00> : vector<2x8x8xf32>
    %105 = tpu.matmul %102, %103, %cst_40 {dimension_numbers = #tpu.dot_dimension_numbers<[2], [2], [1], [1], [0, 0, 0, 1, 1, 1], [0], [0]>} : vector<2x8x8xf32>, vector<2x8x8xf32>, vector<2x8x8xf32> -> vector<2x8x8xf32>
    %cst_41 = arith.constant 0.353553385 : f32
    %106 = vector.broadcast %cst_41 : f32 to vector<2x8x8xf32>
    %107 = arith.mulf %105, %106 : vector<2x8x8xf32>
    %cst_42 = arith.constant dense<0xFF800000> : vector<2x8xf32>
    %108 = vector.multi_reduction <maximumf>, %107, %cst_42 [2] : vector<2x8x8xf32> to vector<2x8xf32>
    %109 = vector.shape_cast %108 : vector<2x8xf32> to vector<2x8x1xf32>
    %110 = vector.broadcast %109 : vector<2x8x1xf32> to vector<2x8x8xf32>
    %111 = arith.subf %107, %110 : vector<2x8x8xf32>
    %112 = math.exp %111 : vector<2x8x8xf32>
    %cst_43 = arith.constant dense<0.000000e+00> : vector<2x8xf32>
    %113 = vector.multi_reduction <add>, %112, %cst_43 [2] : vector<2x8x8xf32> to vector<2x8xf32>
    %114 = vector.shape_cast %113 : vector<2x8xf32> to vector<2x8x1xf32>
    %115 = vector.broadcast %114 : vector<2x8x1xf32> to vector<2x8x8xf32>
    %116 = arith.divf %112, %115 : vector<2x8x8xf32>
    %c0_44 = arith.constant 0 : index
    %c3 = arith.constant 3 : index
    %c0_45 = arith.constant 0 : index
    %c0_46 = arith.constant 0 : index
    %117 = vector.load %arg15[%c0_44, %c3, %c0_45, %c0_46] : memref<2x4x8x8xf32, #tpu.memory_space<vmem>>, vector<2x1x8x8xf32>
    %118 = vector.shape_cast %117 : vector<2x1x8x8xf32> to vector<2x8x8xf32>
    %119 = vector.shape_cast %116 : vector<2x8x8xf32> to vector<2x1x8x8xf32>
    tpu.vector_store %arg15[%c0_44, %c3, %c0_45, %c0_46], %119 {strides = array<i32>} : memref<2x4x8x8xf32, #tpu.memory_space<vmem>>, vector<2x1x8x8xf32>,
    %cst_47 = arith.constant dense<0.000000e+00> : vector<2x8x8xf32>
    %120 = tpu.matmul %112, %104, %cst_47 {dimension_numbers = #tpu.dot_dimension_numbers<[2], [1], [1], [2], [0, 0, 0, 1, 1, 2], [0], [0]>} : vector<2x8x8xf32>, vector<2x8x8xf32>, vector<2x8x8xf32> -> vector<2x8x8xf32>
    %121 = tpu.reciprocal %114 {approx = true} : vector<2x8x1xf32> -> vector<2x8x1xf32>
    %122 = vector.broadcast %121 : vector<2x8x1xf32> to vector<2x8x8xf32>
    %123 = arith.mulf %120, %122 : vector<2x8x8xf32>
    %124 = tpu.concatenate %57, %79, %101, %123 in 2 : vector<2x8x8xf32>, vector<2x8x8xf32>, vector<2x8x8xf32>, vector<2x8x8xf32> -> vector<2x8x32xf32>
    %125 = vector.shape_cast %124 : vector<2x8x32xf32> to vector<16x32xf32>
    %c0_48 = arith.constant 0 : index
    %c0_49 = arith.constant 0 : index
    %126 = vector.load %arg6[%c0_48, %c0_49] : memref<32x32xf32, #tpu.memory_space<vmem>>, vector<32x32xf32>
    %cst_50 = arith.constant dense<0.000000e+00> : vector<16x32xf32>
    %127 = tpu.matmul %125, %126, %cst_50 {dimension_numbers = #tpu.dot_dimension_numbers<[1], [0], [0], [1], [0, 0, 1, 1], [], []>} : vector<16x32xf32>, vector<32x32xf32>, vector<16x32xf32> -> vector<16x32xf32>
    %c0_51 = arith.constant 0 : index
    %c0_52 = arith.constant 0 : index
    %128 = vector.load %arg7[%c0_51, %c0_52] : memref<1x32xf32, #tpu.memory_space<vmem>>, vector<1x32xf32>
    %129 = vector.shape_cast %128 : vector<1x32xf32> to vector<32xf32>
    %130 = vector.shape_cast %129 : vector<32xf32> to vector<1x32xf32>
    %131 = vector.broadcast %130 : vector<1x32xf32> to vector<16x32xf32>
    %132 = arith.addf %127, %131 : vector<16x32xf32>
    %133 = arith.addf %1, %132 : vector<16x32xf32>
    %cst_53 = arith.constant dense<0.000000e+00> : vector<16xf32>
    %134 = vector.multi_reduction <add>, %133, %cst_53 [1] : vector<16x32xf32> to vector<16xf32>
    %135 = vector.shape_cast %134 : vector<16xf32> to vector<16x1xf32>
    %cst_54 = arith.constant 3.200000e+01 : f32
    %136 = vector.broadcast %cst_54 : f32 to vector<16x1xf32>
    %137 = arith.divf %135, %136 : vector<16x1xf32>
    %138 = vector.broadcast %137 : vector<16x1xf32> to vector<16x32xf32>
    %139 = arith.subf %133, %138 : vector<16x32xf32>
    %140 = arith.mulf %139, %139 : vector<16x32xf32>
    %cst_55 = arith.constant dense<0.000000e+00> : vector<16xf32>
    %141 = vector.multi_reduction <add>, %140, %cst_55 [1] : vector<16x32xf32> to vector<16xf32>
    %142 = vector.shape_cast %141 : vector<16xf32> to vector<16x1xf32>
    %cst_56 = arith.constant 3.200000e+01 : f32
    %143 = vector.broadcast %cst_56 : f32 to vector<16x1xf32>
    %144 = arith.divf %142, %143 : vector<16x1xf32>
    %cst_57 = arith.constant 9.99999974E-6 : f32
    %145 = vector.broadcast %cst_57 : f32 to vector<16x1xf32>
    %146 = arith.addf %144, %145 : vector<16x1xf32>
    %147 = math.rsqrt %146 : vector<16x1xf32>
    %148 = vector.broadcast %147 : vector<16x1xf32> to vector<16x32xf32>
    %149 = arith.mulf %139, %148 : vector<16x32xf32>
    %c0_58 = arith.constant 0 : index
    %c0_59 = arith.constant 0 : index
    %150 = vector.load %arg8[%c0_58, %c0_59] : memref<1x32xf32, #tpu.memory_space<vmem>>, vector<1x32xf32>
    %151 = vector.shape_cast %150 : vector<1x32xf32> to vector<32xf32>
    %152 = vector.shape_cast %151 : vector<32xf32> to vector<1x32xf32>
    %153 = vector.broadcast %152 : vector<1x32xf32> to vector<16x32xf32>
    %154 = arith.mulf %149, %153 : vector<16x32xf32>
    %c0_60 = arith.constant 0 : index
    %c0_61 = arith.constant 0 : index
    %155 = vector.load %arg9[%c0_60, %c0_61] : memref<1x32xf32, #tpu.memory_space<vmem>>, vector<1x32xf32>
    %156 = vector.shape_cast %155 : vector<1x32xf32> to vector<32xf32>
    %157 = vector.shape_cast %156 : vector<32xf32> to vector<1x32xf32>
    %158 = vector.broadcast %157 : vector<1x32xf32> to vector<16x32xf32>
    %159 = arith.addf %154, %158 : vector<16x32xf32>
    %c0_62 = arith.constant 0 : index
    %c0_63 = arith.constant 0 : index
    %160 = vector.load %arg10[%c0_62, %c0_63] : memref<32x128xf32, #tpu.memory_space<vmem>>, vector<32x128xf32>
    %cst_64 = arith.constant dense<0.000000e+00> : vector<16x128xf32>
    %161 = tpu.matmul %159, %160, %cst_64 {dimension_numbers = #tpu.dot_dimension_numbers<[1], [0], [0], [1], [0, 0, 1, 1], [], []>} : vector<16x32xf32>, vector<32x128xf32>, vector<16x128xf32> -> vector<16x128xf32>
    %c0_65 = arith.constant 0 : index
    %c0_66 = arith.constant 0 : index
    %162 = vector.load %arg11[%c0_65, %c0_66] : memref<1x128xf32, #tpu.memory_space<vmem>>, vector<1x128xf32>
    %163 = vector.shape_cast %162 : vector<1x128xf32> to vector<128xf32>
    %164 = vector.shape_cast %163 : vector<128xf32> to vector<1x128xf32>
    %165 = vector.broadcast %164 : vector<1x128xf32> to vector<16x128xf32>
    %166 = arith.addf %161, %165 : vector<16x128xf32>
    %cst_67 = arith.constant 5.000000e-01 : f32
    %167 = vector.broadcast %cst_67 : f32 to vector<16x128xf32>
    %168 = arith.mulf %167, %166 : vector<16x128xf32>
    %cst_68 = arith.constant 0.707106769 : f32
    %169 = vector.broadcast %cst_68 : f32 to vector<16x128xf32>
    %170 = arith.mulf %166, %169 : vector<16x128xf32>
    %cst_69 = arith.constant 0.000000e+00 : f32
    %171 = vector.broadcast %cst_69 : f32 to vector<16x128xf32>
    %172 = arith.cmpf oge, %170, %171 : vector<16x128xf32>
    %cst_70 = arith.constant 1.000000e+00 : f32
    %cst_71 = arith.constant -1.000000e+00 : f32
    %173 = vector.broadcast %cst_70 : f32 to vector<16x128xf32>
    %174 = vector.broadcast %cst_71 : f32 to vector<16x128xf32>
    %175 = arith.select %172, %173, %174 : vector<16x128xi1>, vector<16x128xf32>
    %176 = math.absf %170 : vector<16x128xf32>
    %cst_72 = arith.constant 0.327591091 : f32
    %177 = vector.broadcast %cst_72 : f32 to vector<16x128xf32>
    %178 = arith.mulf %177, %176 : vector<16x128xf32>
    %cst_73 = arith.constant 1.000000e+00 : f32
    %179 = vector.broadcast %cst_73 : f32 to vector<16x128xf32>
    %180 = arith.addf %179, %178 : vector<16x128xf32>
    %cst_74 = arith.constant 1.000000e+00 : f32
    %181 = vector.broadcast %cst_74 : f32 to vector<16x128xf32>
    %182 = arith.divf %181, %180 : vector<16x128xf32>
    %cst_75 = arith.constant 1.06140542 : f32
    %183 = vector.broadcast %cst_75 : f32 to vector<16x128xf32>
    %184 = arith.mulf %183, %182 : vector<16x128xf32>
    %cst_76 = arith.constant -1.45315206 : f32
    %185 = vector.broadcast %cst_76 : f32 to vector<16x128xf32>
    %186 = arith.addf %184, %185 : vector<16x128xf32>
    %187 = arith.mulf %186, %182 : vector<16x128xf32>
    %cst_77 = arith.constant 1.42141378 : f32
    %188 = vector.broadcast %cst_77 : f32 to vector<16x128xf32>
    %189 = arith.addf %187, %188 : vector<16x128xf32>
    %190 = arith.mulf %189, %182 : vector<16x128xf32>
    %cst_78 = arith.constant -0.284496725 : f32
    %191 = vector.broadcast %cst_78 : f32 to vector<16x128xf32>
    %192 = arith.addf %190, %191 : vector<16x128xf32>
    %193 = arith.mulf %192, %182 : vector<16x128xf32>
    %cst_79 = arith.constant 0.254829586 : f32
    %194 = vector.broadcast %cst_79 : f32 to vector<16x128xf32>
    %195 = arith.addf %193, %194 : vector<16x128xf32>
    %196 = arith.mulf %195, %182 : vector<16x128xf32>
    %cst_80 = arith.constant 0.000000e+00 : f32
    %197 = vector.broadcast %cst_80 : f32 to vector<16x128xf32>
    %198 = arith.subf %197, %176 : vector<16x128xf32>
    %199 = arith.mulf %198, %176 : vector<16x128xf32>
    %200 = math.exp %199 : vector<16x128xf32>
    %201 = arith.mulf %196, %200 : vector<16x128xf32>
    %cst_81 = arith.constant 1.000000e+00 : f32
    %202 = vector.broadcast %cst_81 : f32 to vector<16x128xf32>
    %203 = arith.subf %202, %201 : vector<16x128xf32>
    %204 = arith.mulf %175, %203 : vector<16x128xf32>
    %cst_82 = arith.constant 1.000000e+00 : f32
    %205 = vector.broadcast %cst_82 : f32 to vector<16x128xf32>
    %206 = arith.addf %205, %204 : vector<16x128xf32>
    %207 = arith.mulf %168, %206 : vector<16x128xf32>
    %c0_83 = arith.constant 0 : index
    %c0_84 = arith.constant 0 : index
    %208 = vector.load %arg12[%c0_83, %c0_84] : memref<128x32xf32, #tpu.memory_space<vmem>>, vector<128x32xf32>
    %cst_85 = arith.constant dense<0.000000e+00> : vector<16x32xf32>
    %209 = tpu.matmul %207, %208, %cst_85 {dimension_numbers = #tpu.dot_dimension_numbers<[1], [0], [0], [1], [0, 0, 1, 1], [], []>} : vector<16x128xf32>, vector<128x32xf32>, vector<16x32xf32> -> vector<16x32xf32>
    %c0_86 = arith.constant 0 : index
    %c0_87 = arith.constant 0 : index
    %210 = vector.load %arg13[%c0_86, %c0_87] : memref<1x32xf32, #tpu.memory_space<vmem>>, vector<1x32xf32>
    %211 = vector.shape_cast %210 : vector<1x32xf32> to vector<32xf32>
    %212 = vector.shape_cast %211 : vector<32xf32> to vector<1x32xf32>
    %213 = vector.broadcast %212 : vector<1x32xf32> to vector<16x32xf32>
    %214 = arith.addf %209, %213 : vector<16x32xf32>
    %215 = arith.addf %133, %214 : vector<16x32xf32>
    %216 = vector.shape_cast %215 : vector<16x32xf32> to vector<2x8x32xf32>
    %c0_88 = arith.constant 0 : index
    %c0_89 = arith.constant 0 : index
    %c0_90 = arith.constant 0 : index
    %217 = vector.load %arg14[%c0_88, %c0_89, %c0_90] : memref<2x8x32xf32, #tpu.memory_space<vmem>>, vector<2x8x32xf32>
    tpu.vector_store %arg14[%c0_88, %c0_89, %c0_90], %216 {strides = array<i32>} : memref<2x8x32xf32, #tpu.memory_space<vmem>>, vector<2x8x32xf32>,
    return
  }
  func.func @transform_0(%arg0: i32) -> (i32, i32, i32) {
    %c0_i32 = arith.constant 0 : i32
    %c0_i32_0 = arith.constant 0 : i32
    %c0_i32_1 = arith.constant 0 : i32
    return %arg0, %c0_i32, %c0_i32_0 : i32, i32, i32
  }
  func.func @transform_1(%arg0: i32) -> (i32, i32) {
    %c0_i32 = arith.constant 0 : i32
    %c0_i32_0 = arith.constant 0 : i32
    %c0_i32_1 = arith.constant 0 : i32
    return %c0_i32, %c0_i32_0 : i32, i32
  }
  func.func @transform_2(%arg0: i32) -> (i32, i32) {
    %c0_i32 = arith.constant 0 : i32
    %c0_i32_0 = arith.constant 0 : i32
    %c0_i32_1 = arith.constant 0 : i32
    return %c0_i32, %c0_i32_0 : i32, i32
  }
  func.func @transform_3(%arg0: i32) -> (i32, i32) {
    %c0_i32 = arith.constant 0 : i32
    %c0_i32_0 = arith.constant 0 : i32
    %c0_i32_1 = arith.constant 0 : i32
    return %c0_i32, %c0_i32_0 : i32, i32
  }
  func.func @transform_4(%arg0: i32) -> (i32, i32) {
    %c0_i32 = arith.constant 0 : i32
    %c0_i32_0 = arith.constant 0 : i32
    %c0_i32_1 = arith.constant 0 : i32
    return %c0_i32, %c0_i32_0 : i32, i32
  }
  func.func @transform_5(%arg0: i32) -> (i32, i32) {
    %c0_i32 = arith.constant 0 : i32
    %c0_i32_0 = arith.constant 0 : i32
    %c0_i32_1 = arith.constant 0 : i32
    return %c0_i32, %c0_i32_0 : i32, i32
  }
  func.func @transform_6(%arg0: i32) -> (i32, i32) {
    %c0_i32 = arith.constant 0 : i32
    %c0_i32_0 = arith.constant 0 : i32
    %c0_i32_1 = arith.constant 0 : i32
    return %c0_i32, %c0_i32_0 : i32, i32
  }
  func.func @transform_7(%arg0: i32) -> (i32, i32) {
    %c0_i32 = arith.constant 0 : i32
    %c0_i32_0 = arith.constant 0 : i32
    %c0_i32_1 = arith.constant 0 : i32
    return %c0_i32, %c0_i32_0 : i32, i32
  }
  func.func @transform_8(%arg0: i32) -> (i32, i32) {
    %c0_i32 = arith.constant 0 : i32
    %c0_i32_0 = arith.constant 0 : i32
    %c0_i32_1 = arith.constant 0 : i32
    return %c0_i32, %c0_i32_0 : i32, i32
  }
  func.func @transform_9(%arg0: i32) -> (i32, i32) {
    %c0_i32 = arith.constant 0 : i32
    %c0_i32_0 = arith.constant 0 : i32
    %c0_i32_1 = arith.constant 0 : i32
    return %c0_i32, %c0_i32_0 : i32, i32
  }
  func.func @transform_10(%arg0: i32) -> (i32, i32) {
    %c0_i32 = arith.constant 0 : i32
    %c0_i32_0 = arith.constant 0 : i32
    %c0_i32_1 = arith.constant 0 : i32
    return %c0_i32, %c0_i32_0 : i32, i32
  }
  func.func @transform_11(%arg0: i32) -> (i32, i32) {
    %c0_i32 = arith.constant 0 : i32
    %c0_i32_0 = arith.constant 0 : i32
    %c0_i32_1 = arith.constant 0 : i32
    return %c0_i32, %c0_i32_0 : i32, i32
  }
  func.func @transform_12(%arg0: i32) -> (i32, i32) {
    %c0_i32 = arith.constant 0 : i32
    %c0_i32_0 = arith.constant 0 : i32
    %c0_i32_1 = arith.constant 0 : i32
    return %c0_i32, %c0_i32_0 : i32, i32
  }
  func.func @transform_13(%arg0: i32) -> (i32, i32, i32) {
    %c0_i32 = arith.constant 0 : i32
    %c0_i32_0 = arith.constant 0 : i32
    %c0_i32_1 = arith.constant 0 : i32
    return %arg0, %c0_i32, %c0_i32_0 : i32, i32, i32
  }
  func.func @transform_14(%arg0: i32) -> (i32, i32, i32, i32) {
    %c0_i32 = arith.constant 0 : i32
    %c0_i32_0 = arith.constant 0 : i32
    %c0_i32_1 = arith.constant 0 : i32
    %c0_i32_2 = arith.constant 0 : i32
    return %arg0, %c0_i32, %c0_i32_0, %c0_i32_1 : i32, i32, i32, i32
  }
}

</mosaic_0001>

<bundles_post_ra>
// kernel: tpu_custom_call.1
= control target key start
LH: loop header
LB: loop body
LE: loop exit
PB: predicated region body
PF: predicated region fallthrough
CT: control target
= control target key end

     0   :  { %20 = vsyncpa [#allocation3], 0  ;;  %vm50_vm0 = vcmask 261120   ;;  %s1727_s0 = inlined_call_operand.vmem [shape: f32[2,8,32], index: 0, kind: input, shape index: {}]   ;;  %s1728_s1 = inlined_call_operand.vmem [shape: f32[1,32], index: 1, kind: input, shape index: {}]   ;;  %s1729_s2 = inlined_call_operand.vmem [shape: f32[1,32], index: 2, kind: input, shape index: {}]   ;;  %s1730_s3 = inlined_call_operand.vmem [shape: f32[32,96], index: 3, kind: input, shape index: {}]   ;;  %s1731_s4 = inlined_call_operand.vmem [shape: f32[1,96], index: 4, kind: input, shape index: {}]   ;;  %s1732_s5 = inlined_call_operand.vmem [shape: f32[32,32], index: 5, kind: input, shape index: {}]   ;;  %s1733_s6 = inlined_call_operand.vmem [shape: f32[1,32], index: 6, kind: input, shape index: {}]   ;;  %s1734_s7 = inlined_call_operand.vmem [shape: f32[1,32], index: 7, kind: input, shape index: {}]   ;;  %s1735_s8 = inlined_call_operand.vmem [shape: f32[1,32], index: 8, kind: input, shape index: {}]   ;;  %s1736_s9 = inlined_call_operand.vmem [shape: f32[32,128], index: 9, kind: input, shape index: {}]   ;;  %s1737_s10 = inlined_call_operand.vmem [shape: f32[1,128], index: 10, kind: input, shape index: {}]   ;;  %s1738_s11 = inlined_call_operand.vmem [shape: f32[128,32], index: 11, kind: input, shape index: {}]   ;;  %s1739_s12 = inlined_call_operand.vmem [shape: f32[1,32], index: 12, kind: input, shape index: {}]   ;;  %s1740_s13 = inlined_call_operand.hbm [shape: f32[2,8,32], index: 13, kind: output, shape index: {0}]   ;;  %s1741_s14 = inlined_call_operand.hbm [shape: f32[2,4,8,8], index: 14, kind: output, shape index: {1}]  }
   0x1   :  { %v1392_v0 = vld [vmem:[%s1727_s0] sm:$0xff] }
   0x2   :  { %v51_v1 = vsel %vm50_vm0, %v1392_v0, 0.0 }
   0x3   :  { %52 = vadd.xlane.f32.xlu0 %v51_v1 }
   0x4   :  { %21 = vsyncpa [#allocation5], 0  ;;  %v1399_v2 = vld [vmem:[%s1727_s0 + $0x8] sm:$0xff]  ;;  %v1295_v4 = vmov 32.0   ;;  %v117_v21 = vld [vmem:[%s1730_s3 + $0x18] sm:$0xff]  ;;  %s1297_s28 = smov 64  }
   0x5   :  { %v54_v3 = vsel %vm50_vm0, %v1399_v2, 0.0  ;;  %1193 = vrcp.f32 %v1295_v4  ;;  %140 = vmatpush.msra.mxu0 %v117_v21  ;;  %v116_v22 = vld [vmem:[%s1730_s3 + $0x10] sm:$0xff]  ;;  %v115_v23 = vld [vmem:[%s1730_s3 + $0x8] sm:$0xff]  ;;  %v114_v24 = vld [vmem:[%s1730_s3] sm:$0xff]  ;;  %s1298_s29 = smov 120   ;;  %vm154_vm8 = vcmask 64512  }
   0x6   :  { %v1185_v39 = vld [vmem:[%s1728_s1] ss:$0 sm:$0xff]  ;;  %s1300_s30 = smov 56   ;;  %s1301_s15 = smov 112  }
   0x7   :  { %141 = vmatpush.msra.mxu0 %v116_v22  ;;  %v1186_v43 = vld [vmem:[%s1729_s2] ss:$0 sm:$0xff]  ;;  %s1296_s2 = smov 96   ;;  %s1302_s16 = smov 104  }
   0x8   :  { %v1187_v53 = vld [vmem:[%s1731_s4] ss:$0 sm:$0xff]  ;;  %s1299_s4 = smov 88   ;;  %s1303_s0 = smov 80  }
   0x9   :  { %142 = vmatpush.msra.mxu0 %v115_v23  ;;  %s1304_s17 = smov 72   ;;  %s1305_s18 = smov 40  }
   0xa   :  { %s1306_s19 = smov 48   ;;  %s1307_s20 = smov 8  }
   0xb   :  { %55 = vadd.xlane.f32.xlu0 %v54_v3  ;;  %v1194_v5 = vpop.eup %1193  ;;  %143 = vmatpush.msra.mxu0 %v114_v24  ;;  %s1308_s21 = smov 16   ;;  %s1309_s22 = smov 24  }
   0xc   :  { %v58_v6 = vmul.f32 32.0, %v1194_v5  ;;  %vm62_vm1 = vweird.f32 %v1194_v5  ;;  %s1119_s27 = sshll.u32 %s1741_s14, 4  ;;  %s1120_s27 = int_to_ptr.hbm [resolvable:$true] %s1119_s27 }
   0xe   :  { %v59_v7 = vsub.f32 1.0, %v58_v6 }
  0x10   :  { %v60_v8 = vmul.f32 %v1194_v5, %v59_v7 }
  0x12   :  { %v61_v9 = vadd.f32 %v1194_v5, %v60_v8 }
  0x14   :  { %v1403_v10 = vsel %vm62_vm1, %v1194_v5, %v61_v9 }
  0x76   :  { %v53_v11 = vpop.xlane.xlu0 %52 }
  0x77   :  { %v64_v12 = vmul.f32 %v1403_v10, %v53_v11 }
  0x79   :  { %v66_v13 = vsub.f32 %v1392_v0, %v64_v12 }
  0x7b   :  { %v68_v14 = vmul.f32 %v66_v13, %v66_v13 }
  0x7d   :  { %v70_v15 = vsel %vm50_vm0, %v68_v14, 0.0 }
  0x7e   :  { %71 = vadd.xlane.f32.xlu1 %v70_v15  ;;  %v56_v16 = vpop.xlane.xlu0 %55 }
  0x7f   :  { %v65_v17 = vmul.f32 %v1403_v10, %v56_v16 }
  0x81   :  { %v67_v18 = vsub.f32 %v1399_v2, %v65_v17 }
  0x83   :  { %v69_v19 = vmul.f32 %v67_v18, %v67_v18 }
  0x85   :  { %v73_v20 = vsel %vm50_vm0, %v69_v19, 0.0 }
  0x86   :  { %74 = vadd.xlane.f32.xlu1 %v73_v20 }
  0xf1   :  { %v72_v25 = vpop.xlane.xlu1 %71 }
  0xf2   :  { %v76_v26 = vmul.f32 %v72_v25, %v1403_v10 }
  0xf4   :  { %v78_v27 = vadd.f32 1e-05, %v76_v26 }
  0xf6   :  { %1195 = vrsqrt.f32 %v78_v27  ;;  %vm86_vm3 = vweird.f32 %v78_v27 }
  0xf9   :  { %v75_v28 = vpop.xlane.xlu1 %74 }
  0xfa   :  { %v77_v29 = vmul.f32 %v75_v28, %v1403_v10 }
  0xfc   :  { %v1196_v30 = vpop.eup %1195  ;;  %v79_v31 = vadd.f32 1e-05, %v77_v29 }
  0xfd   :  { %v81_v32 = vmul.f32 %v1196_v30, %v78_v27  ;;  %vm87_vm2 = vweird.f32 %v1196_v30 }
  0xfe   :  { %1197 = vrsqrt.f32 %v79_v31  ;;  %vm88_vm4 = vmor %vm86_vm3, %vm87_vm2  ;;  %vm96_vm6 = vweird.f32 %v79_v31 }
  0xff   :  { %v82_v33 = vmul.f32 %v1196_v30, %v81_v32 }
 0x101   :  { %v83_v34 = vmul.f32 0.5, %v82_v33 }
 0x103   :  { %v84_v35 = vsub.f32 1.5, %v83_v34 }
 0x104   :  { %v1198_v36 = vpop.eup %1197 }
 0x105   :  { %v85_v37 = vmul.f32 %v1196_v30, %v84_v35  ;;  %v91_v38 = vmul.f32 %v1198_v36, %v79_v31  ;;  %vm97_vm5 = vweird.f32 %v1198_v36 }
 0x106   :  { %vm98_vm7 = vmor %vm96_vm6, %vm97_vm5 }
 0x107   :  { %v89_v40 = vsel %vm88_vm4, %v1196_v30, %v85_v37  ;;  %v92_v41 = vmul.f32 %v1198_v36, %v91_v38 }
 0x108   :  { %v100_v42 = vmul.f32 %v89_v40, %v66_v13 }
 0x109   :  { %v93_v44 = vmul.f32 0.5, %v92_v41 }
 0x10a   :  { %v106_v45 = vmul.f32 %v1185_v39, %v100_v42 }
 0x10b   :  { %v94_v46 = vsub.f32 1.5, %v93_v44 }
 0x10c   :  { %v112_v47 = vadd.f32 %v1186_v43, %v106_v45 }
 0x10d   :  { %v95_v48 = vmul.f32 %v1198_v36, %v94_v46 }
 0x10e   :  { %1136 = vmatmul.msk.f32.vlgmr.msra.gmra.mxu0 %vm50_vm0, %v112_v47 }
 0x10f   :  { %v99_v49 = vsel %vm98_vm7, %v1198_v36, %v95_v48 }
 0x110   :  { %v101_v50 = vmul.f32 %v99_v49, %v67_v18 }
 0x112   :  { %v107_v51 = vmul.f32 %v1185_v39, %v101_v50 }
 0x114   :  { %v113_v52 = vadd.f32 %v1186_v43, %v107_v51 }
 0x116   :  { %1137 = vmatmul.msk.f32.gmra.mxu0 %vm50_vm0, %v113_v52 }
 0x18b   :  { %v145_v54 = vpop.f32.mrf.mxu0 }
 0x18c   :  { %v1436_v55 = vadd.f32 %v1187_v53, %v145_v54 }
 0x18e   :  { %152 = vrot.lane.b32.xlu2 %v1436_v55, %s1296_s2 }
 0x193   :  { %v148_v56 = vpop.f32.mrf.mxu0 }
 0x194   :  { %v1439_v57 = vadd.f32 %v1187_v53, %v148_v56 }
 0x196   :  { %180 = vrot.lane.b32.xlu2 %v1439_v57, %s1296_s2  ;;  %s1311_s2 = smov [#allocation4]  }
 0x19e   :  { %258 = vrot.lane.b32.xlu2 %v1436_v55, %s1297_s28 }
 0x1a6   :  { %314 = vrot.lane.b32.xlu2 %v1436_v55, %s1298_s29 }
 0x1e8   :  { %v153_v58 = vpop.permute.xlu2 %152 }
 0x1e9   :  { %1138 = vmatpush.xpose.msk.msra.mxu1 %vm154_vm8, %v153_v58 }
 0x1ec   :  { %1139 = vmatmul.msk.f32.vlgmr.msra.gmra.mxu1 %vm154_vm8, %v1436_v55 }
 0x1f0   :  { %v181_v59 = vpop.permute.xlu2 %180 }
 0x1f1   :  { %1140 = vmatpush.xpose.msk.msra.mxu2 %vm154_vm8, %v181_v59 }
 0x1f4   :  { %1141 = vmatmul.msk.f32.vlgmr.msra.gmra.mxu2 %vm154_vm8, %v1439_v57 }
 0x1f8   :  { %v259_v60 = vpop.permute.xlu2 %258 }
 0x1f9   :  { %279 = vmatpush.msrb.mxu1 %v259_v60 }
 0x200   :  { %v315_v18 = vpop.permute.xlu2 %314 }
 0x269   :  { %v176_v61 = vpop.f32.mrf.mxu1 }
 0x26a   :  { %v206_v62 = vmul.f32 0.35355338, %v176_v61 }
 0x26c   :  { %v208_v63 = vsel %vm154_vm8, %v206_v62, -inf }
 0x26d   :  { %209 = vmax.xlane.f32.xlu0 %v208_v63 }
 0x277   :  { %v203_v1 = vpop.f32.mrf.mxu2 }
 0x278   :  { %v207_v3 = vmul.f32 0.35355338, %v203_v1 }
 0x27a   :  { %v211_v4 = vsel %vm154_vm8, %v207_v3, -inf }
 0x27b   :  { %212 = vmax.xlane.f32.xlu1 %v211_v4 }
 0x281   :  { %284 = vrot.lane.b32.xlu0 %v1439_v57, %s1297_s28 }
 0x289   :  { %344 = vrot.lane.b32.xlu0 %v1439_v57, %s1299_s4 }
 0x291   :  { %423 = vrot.lane.b32.xlu0 %v1436_v55, %s1300_s30 }
 0x294   :  { %316 = vrot.lane.b32.xlu1 %v1436_v55, %s1299_s4 }
 0x299   :  { %479 = vrot.lane.b32.xlu0 %v1436_v55, %s1301_s15 }
 0x29c   :  { %342 = vrot.lane.b32.xlu1 %v1439_v57, %s1298_s29  ;;  %s1313_s29 = smov [#allocation2]  }
 0x29d   :  { %s1104_s14 = sshll.u32 %s1313_s29, 4  ;;  %s1105_s14 = int_to_ptr.vmem [resolvable:$true] %s1104_s14 }
 0x2a1   :  { %644 = vrot.lane.b32.xlu0 %v1436_v55, %s1302_s16 }
 0x2a4   :  { %481 = vrot.lane.b32.xlu1 %v1436_v55, %s1303_s0 }
 0x2a9   :  { %674 = vrot.lane.b32.xlu0 %v1439_v57, %s1304_s17 }
 0x2ac   :  { %646 = vrot.lane.b32.xlu1 %v1436_v55, %s1304_s17 }
 0x2b4   :  { %509 = vrot.lane.b32.xlu1 %v1439_v57, %s1303_s0 }
 0x2bc   :  { %672 = vrot.lane.b32.xlu1 %v1439_v57, %s1302_s16 }
 0x2e0   :  { %v210_v5 = vpop.xlane.xlu0 %209 }
 0x2e1   :  { %v214_v6 = vsub.f32 %v206_v62, %v210_v5 }
 0x2e3   :  { %v216_v7 = vmul.f32 1.442695, %v214_v6 }
 0x2e5   :  { %1199 = vpow2.f32 %v216_v7 }
 0x2eb   :  { %v1466_v8 = vpop.eup %1199 }
 0x2ec   :  { %1142 = vmatmul.msk.f32.vlgmr.msrb.gmra.mxu1 %vm154_vm8, %v1466_v8 }
 0x2ee   :  { %v213_v9 = vpop.xlane.xlu1 %212 }
 0x2ef   :  { %v215_v11 = vsub.f32 %v207_v3, %v213_v9 }
 0x2f1   :  { %v218_v12 = vmul.f32 1.442695, %v215_v11 }
 0x2f3   :  { %1201 = vpow2.f32 %v218_v12  ;;  %v285_v13 = vpop.permute.xlu0 %284 }
 0x2f4   :  { %305 = vmatpush.msra.mxu1 %v285_v13 }
 0x2f9   :  { %v1470_v14 = vpop.eup %1201 }
 0x2fa   :  { %1143 = vmatmul.msk.f32.vlgmr.msra.gmra.mxu1 %vm154_vm8, %v1470_v14 }
 0x2fb   :  { %v345_v15 = vpop.permute.xlu0 %344 }
 0x2fc   :  { %1146 = vmatpush.xpose.msk.msrb.mxu2 %vm154_vm8, %v345_v15 }
 0x303   :  { %v424_v16 = vpop.permute.xlu0 %423 }
 0x304   :  { %444 = vmatpush.msra.mxu2 %v424_v16 }
 0x306   :  { %v317_v17 = vpop.permute.xlu1 %316 }
 0x307   :  { %1144 = vmatpush.xpose.msk.msrb.mxu1 %vm154_vm8, %v317_v17 }
 0x30a   :  { %1145 = vmatmul.msk.f32.vlgmr.msrb.gmra.mxu1 %vm154_vm8, %v315_v18 }
 0x30b   :  { %v480_v20 = vpop.permute.xlu0 %479 }
 0x30e   :  { %v343_v19 = vpop.permute.xlu1 %342 }
 0x30f   :  { %1147 = vmatmul.msk.f32.vlgmr.msrb.gmra.mxu2 %vm154_vm8, %v343_v19 }
 0x313   :  { %v645_v22 = vpop.permute.xlu0 %644 }
 0x316   :  { %v482_v21 = vpop.permute.xlu1 %481 }
 0x317   :  { %1150 = vmatpush.xpose.msk.msrb.mxu2 %vm154_vm8, %v482_v21  ;;  %v220_v21 = vsel %vm154_vm8, %v1466_v8, 0.0 }
 0x31b   :  { %v675_v25 = vpop.permute.xlu0 %674 }
 0x31e   :  { %v647_v23 = vpop.permute.xlu1 %646 }
 0x326   :  { %v510_v24 = vpop.permute.xlu1 %509 }
 0x327   :  { %1152 = vmatpush.xpose.msk.msrb.mxu0 %vm154_vm8, %v510_v24 }
 0x32b   :  { %1158 = vmatpush.xpose.msk.msra.mxu0 %vm154_vm8, %v675_v25 }
 0x32e   :  { %v673_v36 = vpop.permute.xlu1 %672 }
 0x369   :  { %v1481_v26 = vpop.f32.mrf.mxu1 }
 0x377   :  { %v1483_v27 = vpop.f32.mrf.mxu1 }
 0x387   :  { %v339_v28 = vpop.f32.mrf.mxu1 }
 0x388   :  { %v370_v29 = vmul.f32 0.35355338, %v339_v28 }
 0x38a   :  { %v372_v30 = vsel %vm154_vm8, %v370_v29, -inf }
 0x38b   :  { %373 = vmax.xlane.f32.xlu2 %v372_v30 }
 0x392   :  { %v367_v31 = vpop.f32.mrf.mxu2 }
 0x393   :  { %v371_v32 = vmul.f32 0.35355338, %v367_v31 }
 0x395   :  { %v375_v33 = vsel %vm154_vm8, %v371_v32, -inf }
 0x396   :  { %376 = vmax.xlane.f32.xlu1 %v375_v33 }
 0x3a3   :  { %507 = vrot.lane.b32.xlu2 %v1439_v57, %s1301_s15  ;;  %s1106_s15 = sshll.u32 %s1740_s13, 4  ;;  %s1107_s15 = int_to_ptr.hbm [resolvable:$true] %s1106_s15 }
 0x3ab   :  { %449 = vrot.lane.b32.xlu2 %v1439_v57, %s1300_s30 }
 0x3fe   :  { %v374_v34 = vpop.xlane.xlu2 %373 }
 0x3ff   :  { %v378_v35 = vsub.f32 %v370_v29, %v374_v34 }
 0x401   :  { %v380_v37 = vmul.f32 1.442695, %v378_v35 }
 0x403   :  { %1203 = vpow2.f32 %v380_v37 }
 0x406   :  { %v508_v38 = vpop.permute.xlu2 %507 }
 0x407   :  { %1153 = vmatmul.msk.f32.vlgmr.msrb.gmra.mxu0 %vm154_vm8, %v508_v38 }
 0x409   :  { %v1492_v39 = vpop.eup %1203  ;;  %v377_v40 = vpop.xlane.xlu1 %376 }
 0x40a   :  { %v379_v41 = vsub.f32 %v371_v32, %v377_v40  ;;  %1148 = vmatmul.msk.f32.vlgmr.msra.gmra.mxu2 %vm154_vm8, %v1492_v39  ;;  %v384_v61 = vsel %vm154_vm8, %v1492_v39, 0.0 }
 0x40b   :  { %1156 = vmatpush.xpose.msk.msra.mxu2 %vm154_vm8, %v647_v23 }
 0x40c   :  { %v382_v42 = vmul.f32 1.442695, %v379_v41 }
 0x40e   :  { %1205 = vpow2.f32 %v382_v42  ;;  %v450_v43 = vpop.permute.xlu2 %449 }
 0x40f   :  { %470 = vmatpush.msra.mxu1 %v450_v43  ;;  %1159 = vmatmul.msk.f32.vlgmr.msra.gmra.mxu0 %vm154_vm8, %v673_v36 }
 0x412   :  { %1151 = vmatmul.msk.f32.vlgmr.msrb.gmra.mxu2 %vm154_vm8, %v480_v20  ;;  %v223_v20 = vsel %vm154_vm8, %v1470_v14, 0.0 }
 0x414   :  { %v1499_v44 = vpop.eup %1205 }
 0x415   :  { %1149 = vmatmul.msk.f32.vlgmr.msra.gmra.mxu1 %vm154_vm8, %v1499_v44  ;;  %v387_v60 = vsel %vm154_vm8, %v1499_v44, 0.0 }
 0x41a   :  { %1157 = vmatmul.msk.f32.vlgmr.msra.gmra.mxu2 %vm154_vm8, %v645_v22 }
 0x484   :  { %v532_v45 = vpop.f32.mrf.mxu0 }
 0x485   :  { %v536_v46 = vmul.f32 0.35355338, %v532_v45 }
 0x487   :  { %v540_v47 = vsel %vm154_vm8, %v536_v46, -inf }
 0x488   :  { %541 = vmax.xlane.f32.xlu1 %v540_v47 }
 0x48c   :  { %v697_v56 = vpop.f32.mrf.mxu0 }
 0x48d   :  { %v1505_v48 = vpop.f32.mrf.mxu2  ;;  %v701_v58 = vmul.f32 0.35355338, %v697_v56 }
 0x48f   :  { %v705_v59 = vsel %vm154_vm8, %v701_v58, -inf }
 0x495   :  { %v504_v49 = vpop.f32.mrf.mxu2 }
 0x496   :  { %v535_v50 = vmul.f32 0.35355338, %v504_v49 }
 0x498   :  { %v537_v51 = vsel %vm154_vm8, %v535_v50, -inf }
 0x499   :  { %538 = vmax.xlane.f32.xlu0 %v537_v51 }
 0x49d   :  { %v669_v52 = vpop.f32.mrf.mxu2 }
 0x49e   :  { %v700_v53 = vmul.f32 0.35355338, %v669_v52 }
 0x4a0   :  { %v702_v54 = vsel %vm154_vm8, %v700_v53, -inf }
 0x4a1   :  { %753 = vrot.lane.b32.xlu1 %v1436_v55, %s1305_s18  ;;  %703 = vmax.xlane.f32.xlu2 %v702_v54 }
 0x4a9   :  { %779 = vrot.lane.b32.xlu1 %v1439_v57, %s1305_s18 }
 0x4ad   :  { %588 = vrot.lane.b32.xlu0 %v1436_v55, %s1306_s19 }
 0x4b9   :  { %614 = vrot.lane.b32.xlu2 %v1439_v57, %s1306_s19 }
 0x4d7   :  { %706 = vmax.xlane.f32.xlu0 %v705_v59 }
 0x4df   :  { %388 = vadd.xlane.f32.xlu0 %v387_v60 }
 0x4e2   :  { %385 = vadd.xlane.f32.xlu2 %v384_v61 }
 0x4fb   :  { %v542_v62 = vpop.xlane.xlu1 %541 }
 0x4fc   :  { %v544_v63 = vsub.f32 %v536_v46, %v542_v62 }
 0x4fe   :  { %v547_v1 = vmul.f32 1.442695, %v544_v63 }
 0x500   :  { %1207 = vpow2.f32 %v547_v1 }
 0x506   :  { %v1518_v55 = vpop.eup %1207 }
 0x507   :  { %v552_v57 = vsel %vm154_vm8, %v1518_v55, 0.0 }
 0x508   :  { %553 = vadd.xlane.f32.xlu0 %v552_v57 }
 0x50c   :  { %v539_v3 = vpop.xlane.xlu0 %538 }
 0x50d   :  { %v543_v4 = vsub.f32 %v535_v50, %v539_v3 }
 0x50f   :  { %v545_v5 = vmul.f32 1.442695, %v543_v4 }
 0x511   :  { %1209 = vpow2.f32 %v545_v5 }
 0x513   :  { %v754_v6 = vpop.permute.xlu1 %753 }
 0x514   :  { %v704_v7 = vpop.xlane.xlu2 %703 }
 0x515   :  { %v708_v9 = vsub.f32 %v700_v53, %v704_v7  ;;  %v1561_v7 = vpop.f32.mrf.mxu1 }
 0x517   :  { %v1522_v11 = vpop.eup %1209  ;;  %v710_v12 = vmul.f32 1.442695, %v708_v9 }
 0x518   :  { %v549_v13 = vsel %vm154_vm8, %v1522_v11, 0.0 }
 0x519   :  { %1211 = vpow2.f32 %v710_v12  ;;  %550 = vadd.xlane.f32.xlu1 %v549_v13 }
 0x51b   :  { %v780_v16 = vpop.permute.xlu1 %779 }
 0x51c   :  { %v615_v15 = vpop.permute.xlu2 %614 }
 0x51d   :  { %635 = vmatpush.msrb.mxu1 %v615_v15 }
 0x51e   :  { %1155 = vmatmul.msk.f32.vlgmr.msrb.gmra.mxu1 %vm154_vm8, %v1518_v55 }
 0x51f   :  { %v1528_v17 = vpop.eup %1211  ;;  %800 = vmatpush.msra.mxu1 %v780_v16  ;;  %v589_v18 = vpop.permute.xlu0 %588 }
 0x520   :  { %609 = vmatpush.msra.mxu3 %v589_v18  ;;  %v714_v19 = vsel %vm154_vm8, %v1528_v17, 0.0 }
 0x521   :  { %715 = vadd.xlane.f32.xlu0 %v714_v19  ;;  %224 = vadd.xlane.f32.xlu1 %v223_v20 }
 0x522   :  { %1154 = vmatmul.msk.f32.vlgmr.msra.gmra.mxu3 %vm154_vm8, %v1522_v11 }
 0x523   :  { %774 = vmatpush.msrb.mxu3 %v754_v6 }
 0x529   :  { %221 = vadd.xlane.f32.xlu0 %v220_v21 }
 0x52a   :  { %1160 = vmatmul.msk.f32.vlgmr.msrb.gmra.mxu3 %vm154_vm8, %v1528_v17 }
 0x54a   :  { %v707_v22 = vpop.xlane.xlu0 %706 }
 0x54b   :  { %v709_v23 = vsub.f32 %v701_v58, %v707_v22 }
 0x54d   :  { %v712_v24 = vmul.f32 1.442695, %v709_v23 }
 0x54f   :  { %1213 = vpow2.f32 %v712_v24 }
 0x552   :  { %v389_v25 = vpop.xlane.xlu0 %388 }
 0x553   :  { %1215 = vrcp.f32 %v389_v25  ;;  %v416_v35 = vand.u32 2147483648, %v389_v25  ;;  %v414_v38 = vand.u32 2147483647, %v389_v25  ;;  %vm410_vm10 = vweird.f32 %v389_v25 }
 0x555   :  { %v1540_v28 = vpop.eup %1213  ;;  %v386_v29 = vpop.xlane.xlu2 %385  ;;  %v417_v43 = vor.u32 1.1754944e-38, %v416_v35  ;;  %vm415_vm13 = vcmp.eq.f32.partialorder %v414_v38, 8.507059e+37 }
 0x556   :  { %1217 = vrcp.f32 %v386_v29  ;;  %1161 = vmatmul.msk.f32.vlgmr.msra.gmra.mxu1 %vm154_vm8, %v1540_v28  ;;  %v717_v30 = vsel %vm154_vm8, %v1540_v28, 0.0  ;;  %v401_v42 = vand.u32 2147483648, %v386_v29  ;;  %v399_v46 = vand.u32 2147483647, %v386_v29 }
 0x557   :  { %718 = vadd.xlane.f32.xlu2 %v717_v30  ;;  %vm395_vm14 = vweird.f32 %v386_v29 }
 0x558   :  { %v402_v52 = vor.u32 1.1754944e-38, %v401_v42  ;;  %vm400_vm1 = vcmp.eq.f32.partialorder %v399_v46, 8.507059e+37 }
 0x559   :  { %v1546_v31 = vpop.eup %1215 }
 0x55a   :  { %v406_v32 = vmul.f32 %v1546_v31, %v389_v25  ;;  %vm411_vm9 = vweird.f32 %v1546_v31 }
 0x55b   :  { %vm412_vm11 = vmor %vm410_vm10, %vm411_vm9 }
 0x55c   :  { %v1218_v33 = vpop.eup %1217  ;;  %v407_v34 = vsub.f32 1.0, %v406_v32 }
 0x55d   :  { %v391_v36 = vmul.f32 %v1218_v33, %v386_v29  ;;  %vm396_vm12 = vweird.f32 %v1218_v33  ;;  %v477_v58 = vmul.f32 %v1218_v33, %v1505_v48 }
 0x55e   :  { %v408_v37 = vmul.f32 %v1546_v31, %v407_v34  ;;  %vm397_vm15 = vmor %vm395_vm14, %vm396_vm12 }
 0x55f   :  { %v392_v40 = vsub.f32 1.0, %v391_v36 }
 0x560   :  { %v409_v41 = vadd.f32 %v1546_v31, %v408_v37 }
 0x561   :  { %v393_v45 = vmul.f32 %v1218_v33, %v392_v40 }
 0x562   :  { %v413_v47 = vsel %vm412_vm11, %v1546_v31, %v409_v41 }
 0x563   :  { %v418_v49 = vsel %vm415_vm13, %v417_v43, %v413_v47  ;;  %v394_v50 = vadd.f32 %v1218_v33, %v393_v45 }
 0x564   :  { %v419_v51 = vmul.f32 %v1499_v44, %v418_v49 }
 0x565   :  { %v398_v53 = vsel %vm397_vm15, %v1218_v33, %v394_v50 }
 0x566   :  { %422 = vst.msk [vmem:[#allocation4 + $0x28] sm:$0xff] %vm154_vm8, %v419_v51  ;;  %v403_v54 = vsel %vm400_vm1, %v402_v52, %v398_v53 }
 0x567   :  { %v404_v56 = vmul.f32 %v1492_v39, %v403_v54 }
 0x569   :  { %421 = vst.msk [vmem:[#allocation4 + $0x8] sm:$0xff] %vm154_vm8, %v404_v56 }
 0x56f   :  { %811 = vrot.lane.b32.xlu2 %v477_v58, %s1307_s20 }
 0x57b   :  { %v554_v59 = vpop.xlane.xlu0 %553 }
 0x57c   :  { %1219 = vrcp.f32 %v554_v59  ;;  %v581_v62 = vand.u32 2147483648, %v554_v59  ;;  %v579_v1 = vand.u32 2147483647, %v554_v59  ;;  %vm575_vm3 = vweird.f32 %v554_v59 }
 0x57e   :  { %v582_v39 = vor.u32 1.1754944e-38, %v581_v62  ;;  %vm580_vm5 = vcmp.eq.f32.partialorder %v579_v1, 8.507059e+37 }
 0x582   :  { %v1220_v60 = vpop.eup %1219 }
 0x583   :  { %v571_v44 = vmul.f32 %v1220_v60, %v554_v59  ;;  %vm576_vm2 = vweird.f32 %v1220_v60 }
 0x584   :  { %vm577_vm4 = vmor %vm575_vm3, %vm576_vm2 }
 0x585   :  { %v572_v61 = vsub.f32 1.0, %v571_v44 }
 0x587   :  { %v573_v63 = vmul.f32 %v1220_v60, %v572_v61 }
 0x589   :  { %v574_v57 = vadd.f32 %v1220_v60, %v573_v63 }
 0x58b   :  { %v578_v3 = vsel %vm577_vm4, %v1220_v60, %v574_v57 }
 0x58c   :  { %v583_v4 = vsel %vm580_vm5, %v582_v39, %v578_v3  ;;  %v551_v48 = vpop.xlane.xlu1 %550 }
 0x58d   :  { %v584_v5 = vmul.f32 %v1518_v55, %v583_v4  ;;  %1221 = vrcp.f32 %v551_v48  ;;  %v566_v16 = vand.u32 2147483648, %v551_v48  ;;  %v564_v19 = vand.u32 2147483647, %v551_v48 }
 0x58e   :  { %vm560_vm7 = vweird.f32 %v551_v48 }
 0x58f   :  { %587 = vst.msk [vmem:[#allocation4 + $0x30] sm:$0xff] %vm154_vm8, %v584_v5  ;;  %v567_v55 = vor.u32 1.1754944e-38, %v566_v16  ;;  %vm565_vm10 = vcmp.eq.f32.partialorder %v564_v19, 8.507059e+37 }
 0x593   :  { %v1222_v6 = vpop.eup %1221 }
 0x594   :  { %v556_v9 = vmul.f32 %v1222_v6, %v551_v48  ;;  %v225_v12 = vpop.xlane.xlu1 %224  ;;  %v716_v13 = vpop.xlane.xlu0 %715  ;;  %vm561_vm6 = vweird.f32 %v1222_v6  ;;  %v478_v48 = vmul.f32 %v1546_v31, %v1561_v7 }
 0x595   :  { %1223 = vrcp.f32 %v225_v12  ;;  %vm562_vm9 = vmor %vm560_vm7, %vm561_vm6  ;;  %v252_v36 = vand.u32 2147483648, %v225_v12  ;;  %v250_v40 = vand.u32 2147483647, %v225_v12  ;;  %v731_v41 = vand.u32 2147483648, %v716_v13 }
 0x596   :  { %v557_v15 = vsub.f32 1.0, %v556_v9  ;;  %1225 = vrcp.f32 %v716_v13  ;;  %v729_v43 = vand.u32 2147483647, %v716_v13  ;;  %vm246_vm13 = vweird.f32 %v225_v12 }
 0x597   :  { %v253_v46 = vor.u32 1.1754944e-38, %v252_v36  ;;  %vm725_vm15 = vweird.f32 %v716_v13  ;;  %vm251_vm1 = vcmp.eq.f32.partialorder %v250_v40, 8.507059e+37  ;;  %v732_v50 = vor.u32 1.1754944e-38, %v731_v41 }
 0x598   :  { %v558_v18 = vmul.f32 %v1222_v6, %v557_v15  ;;  %vm730_vm3 = vcmp.eq.f32.partialorder %v729_v43, 8.507059e+37  ;;  %v1188_v43 = vld [vmem:[%s1733_s6] ss:$0 sm:$0xff] }
 0x59a   :  { %v559_v20 = vadd.f32 %v1222_v6, %v558_v18 }
 0x59b   :  { %v1563_v21 = vpop.eup %1223  ;;  %v637_v22 = vpop.f32.mrf.mxu1 }
 0x59c   :  { %v1226_v23 = vpop.eup %1225  ;;  %v563_v24 = vsel %vm562_vm9, %v1222_v6, %v559_v20  ;;  %v242_v25 = vmul.f32 %v1563_v21, %v225_v12  ;;  %v643_v29 = vmul.f32 %v1220_v60, %v637_v22  ;;  %v222_v30 = vpop.xlane.xlu0 %221  ;;  %vm247_vm11 = vweird.f32 %v1563_v21  ;;  %v844_v22 = vld [vmem:[%s1732_s5 + $0x18] sm:$0xff] }
 0x59d   :  { %v568_v32 = vsel %vm565_vm10, %v567_v55, %v563_v24  ;;  %v721_v33 = vmul.f32 %v1226_v23, %v716_v13  ;;  %1227 = vrcp.f32 %v222_v30  ;;  %vm726_vm12 = vweird.f32 %v1226_v23  ;;  %vm248_vm14 = vmor %vm246_vm13, %vm247_vm11  ;;  %867 = vmatpush.msrb.mxu2 %v844_v22  ;;  %v842_v24 = vld [vmem:[%s1732_s5 + $0x8] sm:$0xff] }
 0x59e   :  { %v569_v34 = vmul.f32 %v1522_v11, %v568_v32  ;;  %v243_v35 = vsub.f32 1.0, %v242_v25  ;;  %821 = vrot.lane.b32.xlu2 %v643_v29, %s1308_s21  ;;  %vm727_vm2 = vmor %vm725_vm15, %vm726_vm12  ;;  %v237_v61 = vand.u32 2147483648, %v222_v30  ;;  %v235_v63 = vand.u32 2147483647, %v222_v30 }
 0x59f   :  { %v722_v37 = vsub.f32 1.0, %v721_v33  ;;  %vm231_vm5 = vweird.f32 %v222_v30  ;;  %vm835_vm13 = vcmask 130048  }
 0x5a0   :  { %586 = vst.msk [vmem:[#allocation4 + $0x10] sm:$0xff] %vm154_vm8, %v569_v34  ;;  %v244_v38 = vmul.f32 %v1563_v21, %v243_v35  ;;  %vm236_vm7 = vcmp.eq.f32.partialorder %v235_v63, 8.507059e+37  ;;  %v936_v63 = vld [vmem:[%s1736_s9] sm:$0xff] }
 0x5a1   :  { %v723_v42 = vmul.f32 %v1226_v23, %v722_v37  ;;  %v313_v37 = vmul.f32 %v1563_v21, %v1483_v27 }
 0x5a2   :  { %v245_v45 = vadd.f32 %v1563_v21, %v244_v38 }
 0x5a3   :  { %v1572_v11 = vpop.eup %1227  ;;  %v724_v47 = vadd.f32 %v1226_v23, %v723_v42 }
 0x5a4   :  { %v249_v49 = vsel %vm248_vm14, %v1563_v21, %v245_v45  ;;  %v227_v51 = vmul.f32 %v1572_v11, %v222_v30  ;;  %vm232_vm4 = vweird.f32 %v1572_v11  ;;  %v312_v29 = vmul.f32 %v1572_v11, %v1481_v26 }
 0x5a5   :  { %v254_v52 = vsel %vm251_vm1, %v253_v46, %v249_v49  ;;  %v728_v53 = vsel %vm727_vm2, %v1226_v23, %v724_v47  ;;  %v611_v54 = vpop.f32.mrf.mxu3  ;;  %vm233_vm6 = vmor %vm231_vm5, %vm232_vm4  ;;  %vm838_vm14 = vcmask 195584  }
 0x5a6   :  { %v255_v56 = vmul.f32 %v1470_v14, %v254_v52  ;;  %v733_v58 = vsel %vm730_vm3, %v732_v50, %v728_v53  ;;  %v228_v59 = vsub.f32 1.0, %v227_v51  ;;  %v642_v60 = vmul.f32 %v1222_v6, %v611_v54 }
 0x5a7   :  { %v734_v44 = vmul.f32 %v1528_v17, %v733_v58  ;;  %v238_v14 = vor.u32 1.1754944e-38, %v237_v61  ;;  %v938_v61 = vld [vmem:[%s1736_s9 + $0x10] sm:$0xff] }
 0x5a8   :  { %257 = vst.msk [vmem:[#allocation4 + $0x20] sm:$0xff] %vm154_vm8, %v255_v56  ;;  %v229_v62 = vmul.f32 %v1572_v11, %v228_v59  ;;  %819 = vrot.lane.b32.xlu0 %v642_v60, %s1308_s21 }
 0x5a9   :  { %751 = vst.msk [vmem:[#allocation4 + $0x18] sm:$0xff] %vm154_vm8, %v734_v44  ;;  %v939_v44 = vld [vmem:[%s1736_s9 + $0x18] sm:$0xff] }
 0x5aa   :  { %v230_v1 = vadd.f32 %v1572_v11, %v229_v62  ;;  %962 = vmatpush.msrb.mxu0 %v939_v44  ;;  %v937_v62 = vld [vmem:[%s1736_s9 + $0x8] sm:$0xff] }
 0x5ac   :  { %v234_v57 = vsel %vm233_vm6, %v1572_v11, %v230_v1  ;;  %963 = vmatpush.msrb.mxu0 %v938_v61 }
 0x5ad   :  { %v239_v17 = vsel %vm236_vm7, %v238_v14, %v234_v57  ;;  %v776_v39 = vpop.f32.mrf.mxu3 }
 0x5ae   :  { %v240_v3 = vmul.f32 %v1466_v8, %v239_v17  ;;  %v807_v4 = vmul.f32 %v1226_v23, %v776_v39  ;;  %v843_v23 = vld [vmem:[%s1732_s5 + $0x10] sm:$0xff]  ;;  %964 = vmatpush.msrb.mxu0 %v937_v62 }
 0x5af   :  { %868 = vmatpush.msrb.mxu2 %v843_v23 }
 0x5b0   :  { %256 = vst.msk [vmem:[#allocation4] sm:$0xff] %vm154_vm8, %v240_v3  ;;  %813 = vrot.lane.b32.xlu0 %v478_v48, %s1307_s20  ;;  %827 = vrot.lane.b32.xlu1 %v807_v4, %s1309_s22 }
 0x5b1   :  { %869 = vmatpush.msrb.mxu2 %v842_v24  ;;  %965 = vmatpush.msrb.mxu0 %v936_v63 }
 0x5ca   :  { %v719_v5 = vpop.xlane.xlu2 %718 }
 0x5cb   :  { %1229 = vrcp.f32 %v719_v5  ;;  %v746_v16 = vand.u32 2147483648, %v719_v5  ;;  %v744_v18 = vand.u32 2147483647, %v719_v5  ;;  %vm740_vm10 = vweird.f32 %v719_v5 }
 0x5cd   :  { %v747_v31 = vor.u32 1.1754944e-38, %v746_v16  ;;  %vm745_vm12 = vcmp.eq.f32.partialorder %v744_v18, 8.507059e+37 }
 0x5d1   :  { %v1230_v6 = vpop.eup %1229 }
 0x5d2   :  { %v736_v9 = vmul.f32 %v1230_v6, %v719_v5  ;;  %vm741_vm9 = vweird.f32 %v1230_v6  ;;  %v812_v25 = vpop.permute.xlu2 %811 }
 0x5d3   :  { %v802_v12 = vpop.f32.mrf.mxu1  ;;  %vm742_vm11 = vmor %vm740_vm10, %vm741_vm9  ;;  %v833_v32 = vsel %vm154_vm8, %v312_v29, %v812_v25 }
 0x5d4   :  { %v808_v13 = vmul.f32 %v1230_v6, %v802_v12  ;;  %v737_v15 = vsub.f32 1.0, %v736_v9 }
 0x5d6   :  { %829 = vrot.lane.b32.xlu1 %v808_v13, %s1309_s22  ;;  %v738_v8 = vmul.f32 %v1230_v6, %v737_v15  ;;  %v1190_v13 = vld [vmem:[%s1735_s8] ss:$0 sm:$0xff] }
 0x5d8   :  { %v739_v19 = vadd.f32 %v1230_v6, %v738_v8 }
 0x5da   :  { %v743_v7 = vsel %vm742_vm11, %v1230_v6, %v739_v19  ;;  %v1189_v6 = vld [vmem:[%s1734_s7] ss:$0 sm:$0xff] }
 0x5db   :  { %v748_v20 = vsel %vm745_vm12, %v747_v31, %v743_v7 }
 0x5dc   :  { %v749_v55 = vmul.f32 %v1540_v28, %v748_v20  ;;  %v841_v28 = vld [vmem:[%s1732_s5] sm:$0xff]  ;;  %s1117_s5 = sshll.u32 %s1311_s2, 4  ;;  %s1118_s5 = int_to_ptr.vmem [resolvable:$true] %s1117_s5 }
 0x5dd   :  { %870 = vmatpush.msrb.mxu2 %v841_v28 }
 0x5de   :  { %752 = vst.msk [vmem:[#allocation4 + $0x38] sm:$0xff] %vm154_vm8, %v749_v55 }
 0x5f8   :  { %v822_v40 = vpop.permute.xlu2 %821 }
 0x61a   :  { %v820_v30 = vpop.permute.xlu0 %819 }
 0x61b   :  { %v836_v33 = vsel %vm835_vm13, %v833_v32, %v820_v30  ;;  %v1067_v30 = vld [vmem:[%s1738_s11 + $0x70] sm:$0xff]  ;;  %v1191_v32 = vld [vmem:[%s1737_s10] ss:$0 sm:$0xff]  ;;  %s1312_s10 = smov 128  }
 0x61c   :  { %1125 = dma.vmem_to_hbm [thread:$0]  %s1118_s5, 1024, %s1120_s27, [#allocation5], %s1312_s10, %s1312_s10, %s1307_s20  }
 0x622   :  { %v828_v34 = vpop.permute.xlu1 %827  ;;  %v814_v36 = vpop.permute.xlu0 %813 }
 0x623   :  { %v839_v35 = vsel %vm838_vm14, %v836_v33, %v828_v34  ;;  %v834_v38 = vsel %vm154_vm8, %v313_v37, %v814_v36  ;;  %v1066_v33 = vld [vmem:[%s1738_s11 + $0x68] sm:$0xff]  ;;  %v1064_v37 = vld [vmem:[%s1738_s11 + $0x58] sm:$0xff] }
 0x624   :  { %1162 = vmatmul.msk.f32.vlgmr.msrb.gmra.mxu2 %vm50_vm0, %v839_v35  ;;  %v837_v42 = vsel %vm835_vm13, %v834_v38, %v822_v40  ;;  %v1065_v35 = vld [vmem:[%s1738_s11 + $0x60] sm:$0xff]  ;;  %v1063_v40 = vld [vmem:[%s1738_s11 + $0x50] sm:$0xff] }
 0x648   :  { %v830_v41 = vpop.permute.xlu1 %829 }
 0x649   :  { %v840_v26 = vsel %vm838_vm14, %v837_v42, %v830_v41  ;;  %v1062_v42 = vld [vmem:[%s1738_s11 + $0x48] sm:$0xff] }
 0x64a   :  { %1163 = vmatmul.msk.f32.gmra.mxu2 %vm50_vm0, %v840_v26 }
 0x6a7   :  { %v872_v45 = vpop.f32.mrf.mxu2 }
 0x6a8   :  { %v873_v11 = vadd.f32 %v1188_v43, %v872_v45 }
 0x6aa   :  { %v1616_v46 = vadd.f32 %v873_v11, %v1392_v0  ;;  %v1060_v11 = vld [vmem:[%s1738_s11 + $0x38] sm:$0xff] }
 0x6ac   :  { %v880_v27 = vsel %vm50_vm0, %v1616_v46, 0.0 }
 0x6ad   :  { %881 = vadd.xlane.f32.xlu0 %v880_v27  ;;  %v1059_v27 = vld [vmem:[%s1738_s11 + $0x30] sm:$0xff] }
 0x6cd   :  { %v875_v21 = vpop.f32.mrf.mxu2 }
 0x6ce   :  { %v876_v47 = vadd.f32 %v1188_v43, %v875_v21  ;;  %v1061_v43 = vld [vmem:[%s1738_s11 + $0x40] sm:$0xff]  ;;  %v1058_v21 = vld [vmem:[%s1738_s11 + $0x28] sm:$0xff] }
 0x6d0   :  { %v1621_v49 = vadd.f32 %v876_v47, %v1399_v2  ;;  %v1057_v47 = vld [vmem:[%s1738_s11 + $0x20] sm:$0xff] }
 0x6d2   :  { %v883_v50 = vsel %vm50_vm0, %v1621_v49, 0.0 }
 0x6d3   :  { %884 = vadd.xlane.f32.xlu2 %v883_v50 }
 0x720   :  { %v882_v51 = vpop.xlane.xlu0 %881 }
 0x721   :  { %v886_v52 = vmul.f32 %v882_v51, %v1403_v10 }
 0x723   :  { %v888_v53 = vsub.f32 %v1616_v46, %v886_v52  ;;  %v1056_v52 = vld [vmem:[%s1738_s11 + $0x18] sm:$0xff] }
 0x725   :  { %v890_v0 = vmul.f32 %v888_v53, %v888_v53 }
 0x727   :  { %v892_v54 = vsel %vm50_vm0, %v890_v0, 0.0  ;;  %v1055_v0 = vld [vmem:[%s1738_s11 + $0x10] sm:$0xff] }
 0x728   :  { %893 = vadd.xlane.f32.xlu1 %v892_v54 }
 0x746   :  { %v885_v56 = vpop.xlane.xlu2 %884 }
 0x747   :  { %v887_v58 = vmul.f32 %v885_v56, %v1403_v10 }
 0x749   :  { %v889_v59 = vsub.f32 %v1621_v49, %v887_v58 }
 0x74b   :  { %v891_v2 = vmul.f32 %v889_v59, %v889_v59 }
 0x74d   :  { %v895_v60 = vsel %vm50_vm0, %v891_v2, 0.0 }
 0x74e   :  { %896 = vadd.xlane.f32.xlu0 %v895_v60  ;;  %v1053_v60 = vld [vmem:[%s1738_s11] sm:$0xff] }
 0x79b   :  { %v894_v1 = vpop.xlane.xlu1 %893 }
 0x79c   :  { %v898_v14 = vmul.f32 %v894_v1, %v1403_v10 }
 0x79e   :  { %v900_v57 = vadd.f32 1e-05, %v898_v14 }
 0x7a0   :  { %1231 = vrsqrt.f32 %v900_v57  ;;  %vm908_vm15 = vweird.f32 %v900_v57 }
 0x7a6   :  { %v1232_v17 = vpop.eup %1231 }
 0x7a7   :  { %v903_v39 = vmul.f32 %v1232_v17, %v900_v57  ;;  %vm909_vm8 = vweird.f32 %v1232_v17 }
 0x7a8   :  { %vm910_vm1 = vmor %vm908_vm15, %vm909_vm8 }
 0x7a9   :  { %v904_v3 = vmul.f32 %v1232_v17, %v903_v39 }
 0x7ab   :  { %v905_v4 = vmul.f32 0.5, %v904_v3 }
 0x7ad   :  { %v906_v48 = vsub.f32 1.5, %v905_v4 }
 0x7af   :  { %v907_v5 = vmul.f32 %v1232_v17, %v906_v48 }
 0x7b1   :  { %v911_v9 = vsel %vm910_vm1, %v1232_v17, %v907_v5 }
 0x7b2   :  { %v922_v12 = vmul.f32 %v911_v9, %v888_v53 }
 0x7b4   :  { %v928_v15 = vmul.f32 %v1189_v6, %v922_v12 }
 0x7b6   :  { %v934_v16 = vadd.f32 %v1190_v13, %v928_v15 }
 0x7b8   :  { %1164 = vmatmul.msk.f32.vlgmr.msrb.gmra.mxu0 %vm50_vm0, %v934_v16 }
 0x7c1   :  { %v897_v8 = vpop.xlane.xlu0 %896 }
 0x7c2   :  { %v899_v18 = vmul.f32 %v897_v8, %v1403_v10  ;;  %v1068_v10 = vld [vmem:[%s1738_s11 + $0x78] sm:$0xff] }
 0x7c3   :  { %1073 = vmatpush.msra.mxu3 %v1068_v10 }
 0x7c4   :  { %v901_v19 = vadd.f32 1e-05, %v899_v18 }
 0x7c5   :  { %1074 = vmatpush.msra.mxu3 %v1067_v30 }
 0x7c6   :  { %1233 = vrsqrt.f32 %v901_v19  ;;  %vm918_vm3 = vweird.f32 %v901_v19 }
 0x7c7   :  { %1075 = vmatpush.msra.mxu3 %v1066_v33 }
 0x7c9   :  { %1076 = vmatpush.msra.mxu3 %v1065_v35 }
 0x7cb   :  { %1077 = vmatpush.msra.mxu3 %v1064_v37 }
 0x7cc   :  { %v1234_v31 = vpop.eup %1233 }
 0x7cd   :  { %v913_v7 = vmul.f32 %v1234_v31, %v901_v19  ;;  %vm919_vm2 = vweird.f32 %v1234_v31  ;;  %1078 = vmatpush.msra.mxu3 %v1063_v40 }
 0x7ce   :  { %vm920_vm4 = vmor %vm918_vm3, %vm919_vm2 }
 0x7cf   :  { %v914_v20 = vmul.f32 %v1234_v31, %v913_v7  ;;  %1079 = vmatpush.msra.mxu3 %v1062_v42 }
 0x7d1   :  { %v915_v55 = vmul.f32 0.5, %v914_v20  ;;  %1080 = vmatpush.msra.mxu3 %v1061_v43  ;;  %v1310_v20 = vmov -1.0  }
 0x7d3   :  { %v916_v22 = vsub.f32 1.5, %v915_v55  ;;  %1081 = vmatpush.msra.mxu3 %v1060_v11 }
 0x7d5   :  { %v917_v23 = vmul.f32 %v1234_v31, %v916_v22  ;;  %1082 = vmatpush.msra.mxu3 %v1059_v27 }
 0x7d7   :  { %v921_v24 = vsel %vm920_vm4, %v1234_v31, %v917_v23  ;;  %1083 = vmatpush.msra.mxu3 %v1058_v21 }
 0x7d8   :  { %v923_v28 = vmul.f32 %v921_v24, %v889_v59  ;;  %v1054_v59 = vld [vmem:[%s1738_s11 + $0x8] sm:$0xff] }
 0x7d9   :  { %1084 = vmatpush.msra.mxu3 %v1057_v47 }
 0x7da   :  { %v929_v25 = vmul.f32 %v1189_v6, %v923_v28 }
 0x7db   :  { %1085 = vmatpush.msra.mxu3 %v1056_v52 }
 0x7dc   :  { %v935_v29 = vadd.f32 %v1190_v13, %v929_v25 }
 0x7dd   :  { %1086 = vmatpush.msra.mxu3 %v1055_v0 }
 0x7de   :  { %1165 = vmatmul.msk.f32.gmra.mxu0 %vm50_vm0, %v935_v29 }
 0x7df   :  { %1087 = vmatpush.msra.mxu3 %v1054_v59 }
 0x7e1   :  { %1088 = vmatpush.msra.mxu3 %v1053_v60 }
 0x835   :  { %v967_v34 = vpop.f32.mrf.mxu0 }
 0x836   :  { %v1668_v36 = vadd.f32 %v1191_v32, %v967_v34 }
 0x838   :  { %v1674_v38 = vmul.f32 0.70710677, %v1668_v36  ;;  %v973_v23 = vmul.f32 0.5, %v1668_v36 }
 0x83a   :  { %v981_v41 = vand.u32 2147483647, %v1674_v38  ;;  %vm977_vm10 = vcmp.ge.f32.partialorder %v1674_v38, 0.0 }
 0x83b   :  { %v979_v55 = vsel %vm977_vm10, 1.0, %v1310_v20 }
 0x83c   :  { %v983_v26 = vmul.f32 0.3275911, %v981_v41  ;;  %v1035_v63 = vsub.f32 0.0, %v981_v41 }
 0x83e   :  { %v985_v45 = vadd.f32 1.0, %v983_v26  ;;  %v1037_v57 = vmul.f32 %v1035_v63, %v981_v41 }
 0x840   :  { %1235 = vrcp.f32 %v985_v45  ;;  %v998_v54 = vand.u32 2147483648, %v985_v45  ;;  %v996_v58 = vand.u32 2147483647, %v985_v45  ;;  %vm992_vm6 = vweird.f32 %v985_v45 }
 0x841   :  { %v1039_v3 = vmul.f32 1.442695, %v1037_v57 }
 0x842   :  { %v999_v44 = vor.u32 1.1754944e-38, %v998_v54  ;;  %vm997_vm9 = vcmp.eq.f32.partialorder %v996_v58, 8.507059e+37 }
 0x843   :  { %1237 = vpow2.f32 %v1039_v3 }
 0x846   :  { %v1236_v50 = vpop.eup %1235 }
 0x847   :  { %v988_v51 = vmul.f32 %v1236_v50, %v985_v45  ;;  %vm993_vm5 = vweird.f32 %v1236_v50 }
 0x848   :  { %vm994_vm7 = vmor %vm992_vm6, %vm993_vm5 }
 0x849   :  { %v989_v53 = vsub.f32 1.0, %v988_v51  ;;  %v1238_v8 = vpop.eup %1237 }
 0x84b   :  { %v990_v56 = vmul.f32 %v1236_v50, %v989_v53 }
 0x84d   :  { %v991_v2 = vadd.f32 %v1236_v50, %v990_v56 }
 0x84f   :  { %v995_v61 = vsel %vm994_vm7, %v1236_v50, %v991_v2  ;;  %v1192_v2 = vld [vmem:[%s1739_s12] ss:$0 sm:$0xff] }
 0x850   :  { %v1000_v62 = vsel %vm997_vm9, %v999_v44, %v995_v61 }
 0x851   :  { %v1017_v1 = vmul.f32 1.0614054, %v1000_v62 }
 0x853   :  { %v1019_v14 = vadd.f32 -1.4531521, %v1017_v1 }
 0x855   :  { %v1021_v17 = vmul.f32 %v1019_v14, %v1000_v62 }
 0x857   :  { %v1023_v39 = vadd.f32 1.4214138, %v1021_v17 }
 0x859   :  { %v1025_v4 = vmul.f32 %v1023_v39, %v1000_v62 }
 0x85b   :  { %v1027_v48 = vadd.f32 -0.28449672, %v1025_v4  ;;  %v970_v5 = vpop.f32.mrf.mxu0 }
 0x85c   :  { %v971_v6 = vadd.f32 %v1191_v32, %v970_v5 }
 0x85d   :  { %v1029_v9 = vmul.f32 %v1027_v48, %v1000_v62 }
 0x85e   :  { %v976_v12 = vmul.f32 0.70710677, %v971_v6  ;;  %v974_v56 = vmul.f32 0.5, %v971_v6 }
 0x85f   :  { %v1031_v13 = vadd.f32 0.2548296, %v1029_v9 }
 0x860   :  { %v982_v15 = vand.u32 2147483647, %v976_v12  ;;  %vm978_vm8 = vcmp.ge.f32.partialorder %v976_v12, 0.0 }
 0x861   :  { %v1033_v16 = vmul.f32 %v1031_v13, %v1000_v62  ;;  %v980_v0 = vsel %vm978_vm8, 1.0, %v1310_v20 }
 0x862   :  { %v984_v18 = vmul.f32 0.3275911, %v982_v15  ;;  %v1036_v38 = vsub.f32 0.0, %v982_v15 }
 0x863   :  { %v1043_v19 = vmul.f32 %v1238_v8, %v1033_v16 }
 0x864   :  { %v986_v31 = vadd.f32 1.0, %v984_v18  ;;  %v1038_v42 = vmul.f32 %v1036_v38, %v982_v15 }
 0x865   :  { %v1045_v7 = vsub.f32 1.0, %v1043_v19 }
 0x866   :  { %1239 = vrcp.f32 %v986_v31  ;;  %v1013_v30 = vand.u32 2147483648, %v986_v31  ;;  %v1011_v33 = vand.u32 2147483647, %v986_v31  ;;  %vm1007_vm12 = vweird.f32 %v986_v31 }
 0x867   :  { %v1047_v22 = vmul.f32 %v1045_v7, %v979_v55  ;;  %v1041_v45 = vmul.f32 1.442695, %v1038_v42 }
 0x868   :  { %v1014_v35 = vor.u32 1.1754944e-38, %v1013_v30  ;;  %vm1012_vm14 = vcmp.eq.f32.partialorder %v1011_v33, 8.507059e+37 }
 0x869   :  { %v1049_v24 = vadd.f32 1.0, %v1047_v22  ;;  %1241 = vpow2.f32 %v1041_v45 }
 0x86b   :  { %v1051_v28 = vmul.f32 %v1049_v24, %v973_v23 }
 0x86c   :  { %v1240_v25 = vpop.eup %1239 }
 0x86d   :  { %v1003_v29 = vmul.f32 %v1240_v25, %v986_v31  ;;  %1089 = vmatmul.f32.vlgmr.msra.gmra.mxu3 %v1051_v28  ;;  %vm1008_vm11 = vweird.f32 %v1240_v25 }
 0x86e   :  { %vm1009_vm13 = vmor %vm1007_vm12, %vm1008_vm11 }
 0x86f   :  { %v1004_v10 = vsub.f32 1.0, %v1003_v29  ;;  %v1242_v51 = vpop.eup %1241 }
 0x871   :  { %v1005_v32 = vmul.f32 %v1240_v25, %v1004_v10 }
 0x873   :  { %v1006_v34 = vadd.f32 %v1240_v25, %v1005_v32 }
 0x875   :  { %v1010_v37 = vsel %vm1009_vm13, %v1240_v25, %v1006_v34 }
 0x876   :  { %v1015_v40 = vsel %vm1012_vm14, %v1014_v35, %v1010_v37 }
 0x877   :  { %v1018_v41 = vmul.f32 1.0614054, %v1015_v40 }
 0x879   :  { %v1020_v36 = vadd.f32 -1.4531521, %v1018_v41 }
 0x87b   :  { %v1022_v26 = vmul.f32 %v1020_v36, %v1015_v40 }
 0x87d   :  { %v1024_v43 = vadd.f32 1.4214138, %v1022_v26 }
 0x87f   :  { %v1026_v11 = vmul.f32 %v1024_v43, %v1015_v40 }
 0x881   :  { %v1028_v27 = vadd.f32 -0.28449672, %v1026_v11 }
 0x883   :  { %v1030_v21 = vmul.f32 %v1028_v27, %v1015_v40 }
 0x885   :  { %v1032_v47 = vadd.f32 0.2548296, %v1030_v21 }
 0x887   :  { %v1034_v50 = vmul.f32 %v1032_v47, %v1015_v40 }
 0x889   :  { %v1044_v52 = vmul.f32 %v1242_v51, %v1034_v50 }
 0x88b   :  { %v1046_v53 = vsub.f32 1.0, %v1044_v52 }
 0x88d   :  { %v1048_v54 = vmul.f32 %v1046_v53, %v980_v0 }
 0x88f   :  { %v1050_v58 = vadd.f32 1.0, %v1048_v54 }
 0x891   :  { %v1052_v59 = vmul.f32 %v1050_v58, %v974_v56 }
 0x893   :  { %1092 = vmatmul.f32.gmra.mxu3 %v1052_v59 }
 0x8f0   :  { %v1090_v60 = vpop.f32.mrf.mxu3 }
 0x8f1   :  { %v1091_v44 = vadd.f32 %v1192_v2, %v1090_v60 }
 0x8f3   :  { %v1096_v61 = vadd.f32 %v1091_v44, %v1616_v46 }
 0x8f5   :  { %1098 = vst.msk [vmem:[#allocation2] sm:$0xff] %vm50_vm0, %v1096_v61 }
 0x916   :  { %v1093_v62 = vpop.f32.mrf.mxu3 }
 0x917   :  { %v1094_v63 = vadd.f32 %v1192_v2, %v1093_v62 }
 0x919   :  { %v1097_v1 = vadd.f32 %v1094_v63, %v1621_v49 }
 0x91b   :  { %1099 = vst.msk [vmem:[#allocation2 + $0x8] sm:$0xff] %vm50_vm0, %v1097_v1 }
 0x91c   :  { %1112 = dma.vmem_to_hbm [thread:$0]  %s1105_s14, 256, %s1107_s15, [#allocation3], %s1312_s10, %s1312_s10, %s1307_s20  }
 0x91d   :  { %1291 = dma.done.wait [#allocation3], 256  }
 0x91e   :  { %1292 = vsyncadd [#allocation3], 4294967040 }
 0x91f   :  { %1293 = dma.done.wait [#allocation5], 1024  }
 0x920   :  { %1294 = vsyncadd [#allocation5], 4294966272 }
 0x921   :  { %1134 = vsyncpa [#allocation3], 1 }
 0x922   :  { %1135 = vsyncpa [#allocation5], 1 }

// kernel: tpu_custom_call.1
= control target key start
LH: loop header
LB: loop body
LE: loop exit
PB: predicated region body
PF: predicated region fallthrough
CT: control target
= control target key end

     0   :  { %20 = vsyncpa [#allocation3], 0  ;;  %vm50_vm0 = vcmask 261120   ;;  %s1727_s0 = inlined_call_operand.vmem [shape: f32[2,8,32], index: 0, kind: input, shape index: {}]   ;;  %s1728_s1 = inlined_call_operand.vmem [shape: f32[1,32], index: 1, kind: input, shape index: {}]   ;;  %s1729_s2 = inlined_call_operand.vmem [shape: f32[1,32], index: 2, kind: input, shape index: {}]   ;;  %s1730_s3 = inlined_call_operand.vmem [shape: f32[32,96], index: 3, kind: input, shape index: {}]   ;;  %s1731_s4 = inlined_call_operand.vmem [shape: f32[1,96], index: 4, kind: input, shape index: {}]   ;;  %s1732_s5 = inlined_call_operand.vmem [shape: f32[32,32], index: 5, kind: input, shape index: {}]   ;;  %s1733_s6 = inlined_call_operand.vmem [shape: f32[1,32], index: 6, kind: input, shape index: {}]   ;;  %s1734_s7 = inlined_call_operand.vmem [shape: f32[1,32], index: 7, kind: input, shape index: {}]   ;;  %s1735_s8 = inlined_call_operand.vmem [shape: f32[1,32], index: 8, kind: input, shape index: {}]   ;;  %s1736_s9 = inlined_call_operand.vmem [shape: f32[32,128], index: 9, kind: input, shape index: {}]   ;;  %s1737_s10 = inlined_call_operand.vmem [shape: f32[1,128], index: 10, kind: input, shape index: {}]   ;;  %s1738_s11 = inlined_call_operand.vmem [shape: f32[128,32], index: 11, kind: input, shape index: {}]   ;;  %s1739_s12 = inlined_call_operand.vmem [shape: f32[1,32], index: 12, kind: input, shape index: {}]   ;;  %s1740_s13 = inlined_call_operand.hbm [shape: f32[2,8,32], index: 13, kind: output, shape index: {0}]   ;;  %s1741_s14 = inlined_call_operand.hbm [shape: f32[2,4,8,8], index: 14, kind: output, shape index: {1}]  }
   0x1   :  { %v1392_v0 = vld [vmem:[%s1727_s0] sm:$0xff] }
   0x2   :  { %v51_v1 = vsel %vm50_vm0, %v1392_v0, 0.0 }
   0x3   :  { %52 = vadd.xlane.f32.xlu0 %v51_v1 }
   0x4   :  { %21 = vsyncpa [#allocation5], 0  ;;  %v1399_v2 = vld [vmem:[%s1727_s0 + $0x8] sm:$0xff]  ;;  %v1295_v4 = vmov 32.0   ;;  %v117_v21 = vld [vmem:[%s1730_s3 + $0x18] sm:$0xff]  ;;  %s1297_s28 = smov 64  }
   0x5   :  { %v54_v3 = vsel %vm50_vm0, %v1399_v2, 0.0  ;;  %1193 = vrcp.f32 %v1295_v4  ;;  %140 = vmatpush.msra.mxu0 %v117_v21  ;;  %v116_v22 = vld [vmem:[%s1730_s3 + $0x10] sm:$0xff]  ;;  %v115_v23 = vld [vmem:[%s1730_s3 + $0x8] sm:$0xff]  ;;  %v114_v24 = vld [vmem:[%s1730_s3] sm:$0xff]  ;;  %s1298_s29 = smov 120   ;;  %vm154_vm8 = vcmask 64512  }
   0x6   :  { %v1185_v39 = vld [vmem:[%s1728_s1] ss:$0 sm:$0xff]  ;;  %s1300_s30 = smov 56   ;;  %s1301_s15 = smov 112  }
   0x7   :  { %141 = vmatpush.msra.mxu0 %v116_v22  ;;  %v1186_v43 = vld [vmem:[%s1729_s2] ss:$0 sm:$0xff]  ;;  %s1296_s2 = smov 96   ;;  %s1302_s16 = smov 104  }
   0x8   :  { %v1187_v53 = vld [vmem:[%s1731_s4] ss:$0 sm:$0xff]  ;;  %s1299_s4 = smov 88   ;;  %s1303_s0 = smov 80  }
   0x9   :  { %142 = vmatpush.msra.mxu0 %v115_v23  ;;  %s1304_s17 = smov 72   ;;  %s1305_s18 = smov 40  }
   0xa   :  { %s1306_s19 = smov 48   ;;  %s1307_s20 = smov 8  }
   0xb   :  { %55 = vadd.xlane.f32.xlu0 %v54_v3  ;;  %v1194_v5 = vpop.eup %1193  ;;  %143 = vmatpush.msra.mxu0 %v114_v24  ;;  %s1308_s21 = smov 16   ;;  %s1309_s22 = smov 24  }
   0xc   :  { %v58_v6 = vmul.f32 32.0, %v1194_v5  ;;  %vm62_vm1 = vweird.f32 %v1194_v5  ;;  %s1119_s27 = sshll.u32 %s1741_s14, 4  ;;  %s1120_s27 = int_to_ptr.hbm [resolvable:$true] %s1119_s27 }
   0xe   :  { %v59_v7 = vsub.f32 1.0, %v58_v6 }
  0x10   :  { %v60_v8 = vmul.f32 %v1194_v5, %v59_v7 }
  0x12   :  { %v61_v9 = vadd.f32 %v1194_v5, %v60_v8 }
  0x14   :  { %v1403_v10 = vsel %vm62_vm1, %v1194_v5, %v61_v9 }
  0x76   :  { %v53_v11 = vpop.xlane.xlu0 %52 }
  0x77   :  { %v64_v12 = vmul.f32 %v1403_v10, %v53_v11 }
  0x79   :  { %v66_v13 = vsub.f32 %v1392_v0, %v64_v12 }
  0x7b   :  { %v68_v14 = vmul.f32 %v66_v13, %v66_v13 }
  0x7d   :  { %v70_v15 = vsel %vm50_vm0, %v68_v14, 0.0 }
  0x7e   :  { %71 = vadd.xlane.f32.xlu1 %v70_v15  ;;  %v56_v16 = vpop.xlane.xlu0 %55 }
  0x7f   :  { %v65_v17 = vmul.f32 %v1403_v10, %v56_v16 }
  0x81   :  { %v67_v18 = vsub.f32 %v1399_v2, %v65_v17 }
  0x83   :  { %v69_v19 = vmul.f32 %v67_v18, %v67_v18 }
  0x85   :  { %v73_v20 = vsel %vm50_vm0, %v69_v19, 0.0 }
  0x86   :  { %74 = vadd.xlane.f32.xlu1 %v73_v20 }
  0xf1   :  { %v72_v25 = vpop.xlane.xlu1 %71 }
  0xf2   :  { %v76_v26 = vmul.f32 %v72_v25, %v1403_v10 }
  0xf4   :  { %v78_v27 = vadd.f32 1e-05, %v76_v26 }
  0xf6   :  { %1195 = vrsqrt.f32 %v78_v27  ;;  %vm86_vm3 = vweird.f32 %v78_v27 }
  0xf9   :  { %v75_v28 = vpop.xlane.xlu1 %74 }
  0xfa   :  { %v77_v29 = vmul.f32 %v75_v28, %v1403_v10 }
  0xfc   :  { %v1196_v30 = vpop.eup %1195  ;;  %v79_v31 = vadd.f32 1e-05, %v77_v29 }
  0xfd   :  { %v81_v32 = vmul.f32 %v1196_v30, %v78_v27  ;;  %vm87_vm2 = vweird.f32 %v1196_v30 }
  0xfe   :  { %1197 = vrsqrt.f32 %v79_v31  ;;  %vm88_vm4 = vmor %vm86_vm3, %vm87_vm2  ;;  %vm96_vm6 = vweird.f32 %v79_v31 }
  0xff   :  { %v82_v33 = vmul.f32 %v1196_v30, %v81_v32 }
 0x101   :  { %v83_v34 = vmul.f32 0.5, %v82_v33 }
 0x103   :  { %v84_v35 = vsub.f32 1.5, %v83_v34 }
 0x104   :  { %v1198_v36 = vpop.eup %1197 }
 0x105   :  { %v85_v37 = vmul.f32 %v1196_v30, %v84_v35  ;;  %v91_v38 = vmul.f32 %v1198_v36, %v79_v31  ;;  %vm97_vm5 = vweird.f32 %v1198_v36 }
 0x106   :  { %vm98_vm7 = vmor %vm96_vm6, %vm97_vm5 }
 0x107   :  { %v89_v40 = vsel %vm88_vm4, %v1196_v30, %v85_v37  ;;  %v92_v41 = vmul.f32 %v1198_v36, %v91_v38 }
 0x108   :  { %v100_v42 = vmul.f32 %v89_v40, %v66_v13 }
 0x109   :  { %v93_v44 = vmul.f32 0.5, %v92_v41 }
 0x10a   :  { %v106_v45 = vmul.f32 %v1185_v39, %v100_v42 }
 0x10b   :  { %v94_v46 = vsub.f32 1.5, %v93_v44 }
 0x10c   :  { %v112_v47 = vadd.f32 %v1186_v43, %v106_v45 }
 0x10d   :  { %v95_v48 = vmul.f32 %v1198_v36, %v94_v46 }
 0x10e   :  { %1136 = vmatmul.msk.f32.vlgmr.msra.gmra.mxu0 %vm50_vm0, %v112_v47 }
 0x10f   :  { %v99_v49 = vsel %vm98_vm7, %v1198_v36, %v95_v48 }
 0x110   :  { %v101_v50 = vmul.f32 %v99_v49, %v67_v18 }
 0x112   :  { %v107_v51 = vmul.f32 %v1185_v39, %v101_v50 }
 0x114   :  { %v113_v52 = vadd.f32 %v1186_v43, %v107_v51 }
 0x116   :  { %1137 = vmatmul.msk.f32.gmra.mxu0 %vm50_vm0, %v113_v52 }
 0x18b   :  { %v145_v54 = vpop.f32.mrf.mxu0 }
 0x18c   :  { %v1436_v55 = vadd.f32 %v1187_v53, %v145_v54 }
 0x18e   :  { %152 = vrot.lane.b32.xlu2 %v1436_v55, %s1296_s2 }
 0x193   :  { %v148_v56 = vpop.f32.mrf.mxu0 }
 0x194   :  { %v1439_v57 = vadd.f32 %v1187_v53, %v148_v56 }
 0x196   :  { %180 = vrot.lane.b32.xlu2 %v1439_v57, %s1296_s2  ;;  %s1311_s2 = smov [#allocation4]  }
 0x19e   :  { %258 = vrot.lane.b32.xlu2 %v1436_v55, %s1297_s28 }
 0x1a6   :  { %314 = vrot.lane.b32.xlu2 %v1436_v55, %s1298_s29 }
 0x1e8   :  { %v153_v58 = vpop.permute.xlu2 %152 }
 0x1e9   :  { %1138 = vmatpush.xpose.msk.msra.mxu1 %vm154_vm8, %v153_v58 }
 0x1ec   :  { %1139 = vmatmul.msk.f32.vlgmr.msra.gmra.mxu1 %vm154_vm8, %v1436_v55 }
 0x1f0   :  { %v181_v59 = vpop.permute.xlu2 %180 }
 0x1f1   :  { %1140 = vmatpush.xpose.msk.msra.mxu2 %vm154_vm8, %v181_v59 }
 0x1f4   :  { %1141 = vmatmul.msk.f32.vlgmr.msra.gmra.mxu2 %vm154_vm8, %v1439_v57 }
 0x1f8   :  { %v259_v60 = vpop.permute.xlu2 %258 }
 0x1f9   :  { %279 = vmatpush.msrb.mxu1 %v259_v60 }
 0x200   :  { %v315_v18 = vpop.permute.xlu2 %314 }
 0x269   :  { %v176_v61 = vpop.f32.mrf.mxu1 }
 0x26a   :  { %v206_v62 = vmul.f32 0.35355338, %v176_v61 }
 0x26c   :  { %v208_v63 = vsel %vm154_vm8, %v206_v62, -inf }
 0x26d   :  { %209 = vmax.xlane.f32.xlu0 %v208_v63 }
 0x277   :  { %v203_v1 = vpop.f32.mrf.mxu2 }
 0x278   :  { %v207_v3 = vmul.f32 0.35355338, %v203_v1 }
 0x27a   :  { %v211_v4 = vsel %vm154_vm8, %v207_v3, -inf }
 0x27b   :  { %212 = vmax.xlane.f32.xlu1 %v211_v4 }
 0x281   :  { %284 = vrot.lane.b32.xlu0 %v1439_v57, %s1297_s28 }
 0x289   :  { %344 = vrot.lane.b32.xlu0 %v1439_v57, %s1299_s4 }
 0x291   :  { %423 = vrot.lane.b32.xlu0 %v1436_v55, %s1300_s30 }
 0x294   :  { %316 = vrot.lane.b32.xlu1 %v1436_v55, %s1299_s4 }
 0x299   :  { %479 = vrot.lane.b32.xlu0 %v1436_v55, %s1301_s15 }
 0x29c   :  { %342 = vrot.lane.b32.xlu1 %v1439_v57, %s1298_s29  ;;  %s1313_s29 = smov [#allocation2]  }
 0x29d   :  { %s1104_s14 = sshll.u32 %s1313_s29, 4  ;;  %s1105_s14 = int_to_ptr.vmem [resolvable:$true] %s1104_s14 }
 0x2a1   :  { %644 = vrot.lane.b32.xlu0 %v1436_v55, %s1302_s16 }
 0x2a4   :  { %481 = vrot.lane.b32.xlu1 %v1436_v55, %s1303_s0 }
 0x2a9   :  { %674 = vrot.lane.b32.xlu0 %v1439_v57, %s1304_s17 }
 0x2ac   :  { %646 = vrot.lane.b32.xlu1 %v1436_v55, %s1304_s17 }
 0x2b4   :  { %509 = vrot.lane.b32.xlu1 %v1439_v57, %s1303_s0 }
 0x2bc   :  { %672 = vrot.lane.b32.xlu1 %v1439_v57, %s1302_s16 }
 0x2e0   :  { %v210_v5 = vpop.xlane.xlu0 %209 }
 0x2e1   :  { %v214_v6 = vsub.f32 %v206_v62, %v210_v5 }
 0x2e3   :  { %v216_v7 = vmul.f32 1.442695, %v214_v6 }
 0x2e5   :  { %1199 = vpow2.f32 %v216_v7 }
 0x2eb   :  { %v1466_v8 = vpop.eup %1199 }
 0x2ec   :  { %1142 = vmatmul.msk.f32.vlgmr.msrb.gmra.mxu1 %vm154_vm8, %v1466_v8 }
 0x2ee   :  { %v213_v9 = vpop.xlane.xlu1 %212 }
 0x2ef   :  { %v215_v11 = vsub.f32 %v207_v3, %v213_v9 }
 0x2f1   :  { %v218_v12 = vmul.f32 1.442695, %v215_v11 }
 0x2f3   :  { %1201 = vpow2.f32 %v218_v12  ;;  %v285_v13 = vpop.permute.xlu0 %284 }
 0x2f4   :  { %305 = vmatpush.msra.mxu1 %v285_v13 }
 0x2f9   :  { %v1470_v14 = vpop.eup %1201 }
 0x2fa   :  { %1143 = vmatmul.msk.f32.vlgmr.msra.gmra.mxu1 %vm154_vm8, %v1470_v14 }
 0x2fb   :  { %v345_v15 = vpop.permute.xlu0 %344 }
 0x2fc   :  { %1146 = vmatpush.xpose.msk.msrb.mxu2 %vm154_vm8, %v345_v15 }
 0x303   :  { %v424_v16 = vpop.permute.xlu0 %423 }
 0x304   :  { %444 = vmatpush.msra.mxu2 %v424_v16 }
 0x306   :  { %v317_v17 = vpop.permute.xlu1 %316 }
 0x307   :  { %1144 = vmatpush.xpose.msk.msrb.mxu1 %vm154_vm8, %v317_v17 }
 0x30a   :  { %1145 = vmatmul.msk.f32.vlgmr.msrb.gmra.mxu1 %vm154_vm8, %v315_v18 }
 0x30b   :  { %v480_v20 = vpop.permute.xlu0 %479 }
 0x30e   :  { %v343_v19 = vpop.permute.xlu1 %342 }
 0x30f   :  { %1147 = vmatmul.msk.f32.vlgmr.msrb.gmra.mxu2 %vm154_vm8, %v343_v19 }
 0x313   :  { %v645_v22 = vpop.permute.xlu0 %644 }
 0x316   :  { %v482_v21 = vpop.permute.xlu1 %481 }
 0x317   :  { %1150 = vmatpush.xpose.msk.msrb.mxu2 %vm154_vm8, %v482_v21  ;;  %v220_v21 = vsel %vm154_vm8, %v1466_v8, 0.0 }
 0x31b   :  { %v675_v25 = vpop.permute.xlu0 %674 }
 0x31e   :  { %v647_v23 = vpop.permute.xlu1 %646 }
 0x326   :  { %v510_v24 = vpop.permute.xlu1 %509 }
 0x327   :  { %1152 = vmatpush.xpose.msk.msrb.mxu0 %vm154_vm8, %v510_v24 }
 0x32b   :  { %1158 = vmatpush.xpose.msk.msra.mxu0 %vm154_vm8, %v675_v25 }
 0x32e   :  { %v673_v36 = vpop.permute.xlu1 %672 }
 0x369   :  { %v1481_v26 = vpop.f32.mrf.mxu1 }
 0x377   :  { %v1483_v27 = vpop.f32.mrf.mxu1 }
 0x387   :  { %v339_v28 = vpop.f32.mrf.mxu1 }
 0x388   :  { %v370_v29 = vmul.f32 0.35355338, %v339_v28 }
 0x38a   :  { %v372_v30 = vsel %vm154_vm8, %v370_v29, -inf }
 0x38b   :  { %373 = vmax.xlane.f32.xlu2 %v372_v30 }
 0x392   :  { %v367_v31 = vpop.f32.mrf.mxu2 }
 0x393   :  { %v371_v32 = vmul.f32 0.35355338, %v367_v31 }
 0x395   :  { %v375_v33 = vsel %vm154_vm8, %v371_v32, -inf }
 0x396   :  { %376 = vmax.xlane.f32.xlu1 %v375_v33 }
 0x3a3   :  { %507 = vrot.lane.b32.xlu2 %v1439_v57, %s1301_s15  ;;  %s1106_s15 = sshll.u32 %s1740_s13, 4  ;;  %s1107_s15 = int_to_ptr.hbm [resolvable:$true] %s1106_s15 }
 0x3ab   :  { %449 = vrot.lane.b32.xlu2 %v1439_v57, %s1300_s30 }
 0x3fe   :  { %v374_v34 = vpop.xlane.xlu2 %373 }
 0x3ff   :  { %v378_v35 = vsub.f32 %v370_v29, %v374_v34 }
 0x401   :  { %v380_v37 = vmul.f32 1.442695, %v378_v35 }
 0x403   :  { %1203 = vpow2.f32 %v380_v37 }
 0x406   :  { %v508_v38 = vpop.permute.xlu2 %507 }
 0x407   :  { %1153 = vmatmul.msk.f32.vlgmr.msrb.gmra.mxu0 %vm154_vm8, %v508_v38 }
 0x409   :  { %v1492_v39 = vpop.eup %1203  ;;  %v377_v40 = vpop.xlane.xlu1 %376 }
 0x40a   :  { %v379_v41 = vsub.f32 %v371_v32, %v377_v40  ;;  %1148 = vmatmul.msk.f32.vlgmr.msra.gmra.mxu2 %vm154_vm8, %v1492_v39  ;;  %v384_v61 = vsel %vm154_vm8, %v1492_v39, 0.0 }
 0x40b   :  { %1156 = vmatpush.xpose.msk.msra.mxu2 %vm154_vm8, %v647_v23 }
 0x40c   :  { %v382_v42 = vmul.f32 1.442695, %v379_v41 }
 0x40e   :  { %1205 = vpow2.f32 %v382_v42  ;;  %v450_v43 = vpop.permute.xlu2 %449 }
 0x40f   :  { %470 = vmatpush.msra.mxu1 %v450_v43  ;;  %1159 = vmatmul.msk.f32.vlgmr.msra.gmra.mxu0 %vm154_vm8, %v673_v36 }
 0x412   :  { %1151 = vmatmul.msk.f32.vlgmr.msrb.gmra.mxu2 %vm154_vm8, %v480_v20  ;;  %v223_v20 = vsel %vm154_vm8, %v1470_v14, 0.0 }
 0x414   :  { %v1499_v44 = vpop.eup %1205 }
 0x415   :  { %1149 = vmatmul.msk.f32.vlgmr.msra.gmra.mxu1 %vm154_vm8, %v1499_v44  ;;  %v387_v60 = vsel %vm154_vm8, %v1499_v44, 0.0 }
 0x41a   :  { %1157 = vmatmul.msk.f32.vlgmr.msra.gmra.mxu2 %vm154_vm8, %v645_v22 }
 0x484   :  { %v532_v45 = vpop.f32.mrf.mxu0 }
 0x485   :  { %v536_v46 = vmul.f32 0.35355338, %v532_v45 }
 0x487   :  { %v540_v47 = vsel %vm154_vm8, %v536_v46, -inf }
 0x488   :  { %541 = vmax.xlane.f32.xlu1 %v540_v47 }
 0x48c   :  { %v697_v56 = vpop.f32.mrf.mxu0 }
 0x48d   :  { %v1505_v48 = vpop.f32.mrf.mxu2  ;;  %v701_v58 = vmul.f32 0.35355338, %v697_v56 }
 0x48f   :  { %v705_v59 = vsel %vm154_vm8, %v701_v58, -inf }
 0x495   :  { %v504_v49 = vpop.f32.mrf.mxu2 }
 0x496   :  { %v535_v50 = vmul.f32 0.35355338, %v504_v49 }
 0x498   :  { %v537_v51 = vsel %vm154_vm8, %v535_v50, -inf }
 0x499   :  { %538 = vmax.xlane.f32.xlu0 %v537_v51 }
 0x49d   :  { %v669_v52 = vpop.f32.mrf.mxu2 }
 0x49e   :  { %v700_v53 = vmul.f32 0.35355338, %v669_v52 }
 0x4a0   :  { %v702_v54 = vsel %vm154_vm8, %v700_v53, -inf }
 0x4a1   :  { %753 = vrot.lane.b32.xlu1 %v1436_v55, %s1305_s18  ;;  %703 = vmax.xlane.f32.xlu2 %v702_v54 }
 0x4a9   :  { %779 = vrot.lane.b32.xlu1 %v1439_v57, %s1305_s18 }
 0x4ad   :  { %588 = vrot.lane.b32.xlu0 %v1436_v55, %s1306_s19 }
 0x4b9   :  { %614 = vrot.lane.b32.xlu2 %v1439_v57, %s1306_s19 }
 0x4d7   :  { %706 = vmax.xlane.f32.xlu0 %v705_v59 }
 0x4df   :  { %388 = vadd.xlane.f32.xlu0 %v387_v60 }
 0x4e2   :  { %385 = vadd.xlane.f32.xlu2 %v384_v61 }
 0x4fb   :  { %v542_v62 = vpop.xlane.xlu1 %541 }
 0x4fc   :  { %v544_v63 = vsub.f32 %v536_v46, %v542_v62 }
 0x4fe   :  { %v547_v1 = vmul.f32 1.442695, %v544_v63 }
 0x500   :  { %1207 = vpow2.f32 %v547_v1 }
 0x506   :  { %v1518_v55 = vpop.eup %1207 }
 0x507   :  { %v552_v57 = vsel %vm154_vm8, %v1518_v55, 0.0 }
 0x508   :  { %553 = vadd.xlane.f32.xlu0 %v552_v57 }
 0x50c   :  { %v539_v3 = vpop.xlane.xlu0 %538 }
 0x50d   :  { %v543_v4 = vsub.f32 %v535_v50, %v539_v3 }
 0x50f   :  { %v545_v5 = vmul.f32 1.442695, %v543_v4 }
 0x511   :  { %1209 = vpow2.f32 %v545_v5 }
 0x513   :  { %v754_v6 = vpop.permute.xlu1 %753 }
 0x514   :  { %v704_v7 = vpop.xlane.xlu2 %703 }
 0x515   :  { %v708_v9 = vsub.f32 %v700_v53, %v704_v7  ;;  %v1561_v7 = vpop.f32.mrf.mxu1 }
 0x517   :  { %v1522_v11 = vpop.eup %1209  ;;  %v710_v12 = vmul.f32 1.442695, %v708_v9 }
 0x518   :  { %v549_v13 = vsel %vm154_vm8, %v1522_v11, 0.0 }
 0x519   :  { %1211 = vpow2.f32 %v710_v12  ;;  %550 = vadd.xlane.f32.xlu1 %v549_v13 }
 0x51b   :  { %v780_v16 = vpop.permute.xlu1 %779 }
 0x51c   :  { %v615_v15 = vpop.permute.xlu2 %614 }
 0x51d   :  { %635 = vmatpush.msrb.mxu1 %v615_v15 }
 0x51e   :  { %1155 = vmatmul.msk.f32.vlgmr.msrb.gmra.mxu1 %vm154_vm8, %v1518_v55 }
 0x51f   :  { %v1528_v17 = vpop.eup %1211  ;;  %800 = vmatpush.msra.mxu1 %v780_v16  ;;  %v589_v18 = vpop.permute.xlu0 %588 }
 0x520   :  { %609 = vmatpush.msra.mxu3 %v589_v18  ;;  %v714_v19 = vsel %vm154_vm8, %v1528_v17, 0.0 }
 0x521   :  { %715 = vadd.xlane.f32.xlu0 %v714_v19  ;;  %224 = vadd.xlane.f32.xlu1 %v223_v20 }
 0x522   :  { %1154 = vmatmul.msk.f32.vlgmr.msra.gmra.mxu3 %vm154_vm8, %v1522_v11 }
 0x523   :  { %774 = vmatpush.msrb.mxu3 %v754_v6 }
 0x529   :  { %221 = vadd.xlane.f32.xlu0 %v220_v21 }
 0x52a   :  { %1160 = vmatmul.msk.f32.vlgmr.msrb.gmra.mxu3 %vm154_vm8, %v1528_v17 }
 0x54a   :  { %v707_v22 = vpop.xlane.xlu0 %706 }
 0x54b   :  { %v709_v23 = vsub.f32 %v701_v58, %v707_v22 }
 0x54d   :  { %v712_v24 = vmul.f32 1.442695, %v709_v23 }
 0x54f   :  { %1213 = vpow2.f32 %v712_v24 }
 0x552   :  { %v389_v25 = vpop.xlane.xlu0 %388 }
 0x553   :  { %1215 = vrcp.f32 %v389_v25  ;;  %v416_v35 = vand.u32 2147483648, %v389_v25  ;;  %v414_v38 = vand.u32 2147483647, %v389_v25  ;;  %vm410_vm10 = vweird.f32 %v389_v25 }
 0x555   :  { %v1540_v28 = vpop.eup %1213  ;;  %v386_v29 = vpop.xlane.xlu2 %385  ;;  %v417_v43 = vor.u32 1.1754944e-38, %v416_v35  ;;  %vm415_vm13 = vcmp.eq.f32.partialorder %v414_v38, 8.507059e+37 }
 0x556   :  { %1217 = vrcp.f32 %v386_v29  ;;  %1161 = vmatmul.msk.f32.vlgmr.msra.gmra.mxu1 %vm154_vm8, %v1540_v28  ;;  %v717_v30 = vsel %vm154_vm8, %v1540_v28, 0.0  ;;  %v401_v42 = vand.u32 2147483648, %v386_v29  ;;  %v399_v46 = vand.u32 2147483647, %v386_v29 }
 0x557   :  { %718 = vadd.xlane.f32.xlu2 %v717_v30  ;;  %vm395_vm14 = vweird.f32 %v386_v29 }
 0x558   :  { %v402_v52 = vor.u32 1.1754944e-38, %v401_v42  ;;  %vm400_vm1 = vcmp.eq.f32.partialorder %v399_v46, 8.507059e+37 }
 0x559   :  { %v1546_v31 = vpop.eup %1215 }
 0x55a   :  { %v406_v32 = vmul.f32 %v1546_v31, %v389_v25  ;;  %vm411_vm9 = vweird.f32 %v1546_v31 }
 0x55b   :  { %vm412_vm11 = vmor %vm410_vm10, %vm411_vm9 }
 0x55c   :  { %v1218_v33 = vpop.eup %1217  ;;  %v407_v34 = vsub.f32 1.0, %v406_v32 }
 0x55d   :  { %v391_v36 = vmul.f32 %v1218_v33, %v386_v29  ;;  %vm396_vm12 = vweird.f32 %v1218_v33  ;;  %v477_v58 = vmul.f32 %v1218_v33, %v1505_v48 }
 0x55e   :  { %v408_v37 = vmul.f32 %v1546_v31, %v407_v34  ;;  %vm397_vm15 = vmor %vm395_vm14, %vm396_vm12 }
 0x55f   :  { %v392_v40 = vsub.f32 1.0, %v391_v36 }
 0x560   :  { %v409_v41 = vadd.f32 %v1546_v31, %v408_v37 }
 0x561   :  { %v393_v45 = vmul.f32 %v1218_v33, %v392_v40 }
 0x562   :  { %v413_v47 = vsel %vm412_vm11, %v1546_v31, %v409_v41 }
 0x563   :  { %v418_v49 = vsel %vm415_vm13, %v417_v43, %v413_v47  ;;  %v394_v50 = vadd.f32 %v1218_v33, %v393_v45 }
 0x564   :  { %v419_v51 = vmul.f32 %v1499_v44, %v418_v49 }
 0x565   :  { %v398_v53 = vsel %vm397_vm15, %v1218_v33, %v394_v50 }
 0x566   :  { %422 = vst.msk [vmem:[#allocation4 + $0x28] sm:$0xff] %vm154_vm8, %v419_v51  ;;  %v403_v54 = vsel %vm400_vm1, %v402_v52, %v398_v53 }
 0x567   :  { %v404_v56 = vmul.f32 %v1492_v39, %v403_v54 }
 0x569   :  { %421 = vst.msk [vmem:[#allocation4 + $0x8] sm:$0xff] %vm154_vm8, %v404_v56 }
 0x56f   :  { %811 = vrot.lane.b32.xlu2 %v477_v58, %s1307_s20 }
 0x57b   :  { %v554_v59 = vpop.xlane.xlu0 %553 }
 0x57c   :  { %1219 = vrcp.f32 %v554_v59  ;;  %v581_v62 = vand.u32 2147483648, %v554_v59  ;;  %v579_v1 = vand.u32 2147483647, %v554_v59  ;;  %vm575_vm3 = vweird.f32 %v554_v59 }
 0x57e   :  { %v582_v39 = vor.u32 1.1754944e-38, %v581_v62  ;;  %vm580_vm5 = vcmp.eq.f32.partialorder %v579_v1, 8.507059e+37 }
 0x582   :  { %v1220_v60 = vpop.eup %1219 }
 0x583   :  { %v571_v44 = vmul.f32 %v1220_v60, %v554_v59  ;;  %vm576_vm2 = vweird.f32 %v1220_v60 }
 0x584   :  { %vm577_vm4 = vmor %vm575_vm3, %vm576_vm2 }
 0x585   :  { %v572_v61 = vsub.f32 1.0, %v571_v44 }
 0x587   :  { %v573_v63 = vmul.f32 %v1220_v60, %v572_v61 }
 0x589   :  { %v574_v57 = vadd.f32 %v1220_v60, %v573_v63 }
 0x58b   :  { %v578_v3 = vsel %vm577_vm4, %v1220_v60, %v574_v57 }
 0x58c   :  { %v583_v4 = vsel %vm580_vm5, %v582_v39, %v578_v3  ;;  %v551_v48 = vpop.xlane.xlu1 %550 }
 0x58d   :  { %v584_v5 = vmul.f32 %v1518_v55, %v583_v4  ;;  %1221 = vrcp.f32 %v551_v48  ;;  %v566_v16 = vand.u32 2147483648, %v551_v48  ;;  %v564_v19 = vand.u32 2147483647, %v551_v48 }
 0x58e   :  { %vm560_vm7 = vweird.f32 %v551_v48 }
 0x58f   :  { %587 = vst.msk [vmem:[#allocation4 + $0x30] sm:$0xff] %vm154_vm8, %v584_v5  ;;  %v567_v55 = vor.u32 1.1754944e-38, %v566_v16  ;;  %vm565_vm10 = vcmp.eq.f32.partialorder %v564_v19, 8.507059e+37 }
 0x593   :  { %v1222_v6 = vpop.eup %1221 }
 0x594   :  { %v556_v9 = vmul.f32 %v1222_v6, %v551_v48  ;;  %v225_v12 = vpop.xlane.xlu1 %224  ;;  %v716_v13 = vpop.xlane.xlu0 %715  ;;  %vm561_vm6 = vweird.f32 %v1222_v6  ;;  %v478_v48 = vmul.f32 %v1546_v31, %v1561_v7 }
 0x595   :  { %1223 = vrcp.f32 %v225_v12  ;;  %vm562_vm9 = vmor %vm560_vm7, %vm561_vm6  ;;  %v252_v36 = vand.u32 2147483648, %v225_v12  ;;  %v250_v40 = vand.u32 2147483647, %v225_v12  ;;  %v731_v41 = vand.u32 2147483648, %v716_v13 }
 0x596   :  { %v557_v15 = vsub.f32 1.0, %v556_v9  ;;  %1225 = vrcp.f32 %v716_v13  ;;  %v729_v43 = vand.u32 2147483647, %v716_v13  ;;  %vm246_vm13 = vweird.f32 %v225_v12 }
 0x597   :  { %v253_v46 = vor.u32 1.1754944e-38, %v252_v36  ;;  %vm725_vm15 = vweird.f32 %v716_v13  ;;  %vm251_vm1 = vcmp.eq.f32.partialorder %v250_v40, 8.507059e+37  ;;  %v732_v50 = vor.u32 1.1754944e-38, %v731_v41 }
 0x598   :  { %v558_v18 = vmul.f32 %v1222_v6, %v557_v15  ;;  %vm730_vm3 = vcmp.eq.f32.partialorder %v729_v43, 8.507059e+37  ;;  %v1188_v43 = vld [vmem:[%s1733_s6] ss:$0 sm:$0xff] }
 0x59a   :  { %v559_v20 = vadd.f32 %v1222_v6, %v558_v18 }
 0x59b   :  { %v1563_v21 = vpop.eup %1223  ;;  %v637_v22 = vpop.f32.mrf.mxu1 }
 0x59c   :  { %v1226_v23 = vpop.eup %1225  ;;  %v563_v24 = vsel %vm562_vm9, %v1222_v6, %v559_v20  ;;  %v242_v25 = vmul.f32 %v1563_v21, %v225_v12  ;;  %v643_v29 = vmul.f32 %v1220_v60, %v637_v22  ;;  %v222_v30 = vpop.xlane.xlu0 %221  ;;  %vm247_vm11 = vweird.f32 %v1563_v21  ;;  %v844_v22 = vld [vmem:[%s1732_s5 + $0x18] sm:$0xff] }
 0x59d   :  { %v568_v32 = vsel %vm565_vm10, %v567_v55, %v563_v24  ;;  %v721_v33 = vmul.f32 %v1226_v23, %v716_v13  ;;  %1227 = vrcp.f32 %v222_v30  ;;  %vm726_vm12 = vweird.f32 %v1226_v23  ;;  %vm248_vm14 = vmor %vm246_vm13, %vm247_vm11  ;;  %867 = vmatpush.msrb.mxu2 %v844_v22  ;;  %v842_v24 = vld [vmem:[%s1732_s5 + $0x8] sm:$0xff] }
 0x59e   :  { %v569_v34 = vmul.f32 %v1522_v11, %v568_v32  ;;  %v243_v35 = vsub.f32 1.0, %v242_v25  ;;  %821 = vrot.lane.b32.xlu2 %v643_v29, %s1308_s21  ;;  %vm727_vm2 = vmor %vm725_vm15, %vm726_vm12  ;;  %v237_v61 = vand.u32 2147483648, %v222_v30  ;;  %v235_v63 = vand.u32 2147483647, %v222_v30 }
 0x59f   :  { %v722_v37 = vsub.f32 1.0, %v721_v33  ;;  %vm231_vm5 = vweird.f32 %v222_v30  ;;  %vm835_vm13 = vcmask 130048  }
 0x5a0   :  { %586 = vst.msk [vmem:[#allocation4 + $0x10] sm:$0xff] %vm154_vm8, %v569_v34  ;;  %v244_v38 = vmul.f32 %v1563_v21, %v243_v35  ;;  %vm236_vm7 = vcmp.eq.f32.partialorder %v235_v63, 8.507059e+37  ;;  %v936_v63 = vld [vmem:[%s1736_s9] sm:$0xff] }
 0x5a1   :  { %v723_v42 = vmul.f32 %v1226_v23, %v722_v37  ;;  %v313_v37 = vmul.f32 %v1563_v21, %v1483_v27 }
 0x5a2   :  { %v245_v45 = vadd.f32 %v1563_v21, %v244_v38 }
 0x5a3   :  { %v1572_v11 = vpop.eup %1227  ;;  %v724_v47 = vadd.f32 %v1226_v23, %v723_v42 }
 0x5a4   :  { %v249_v49 = vsel %vm248_vm14, %v1563_v21, %v245_v45  ;;  %v227_v51 = vmul.f32 %v1572_v11, %v222_v30  ;;  %vm232_vm4 = vweird.f32 %v1572_v11  ;;  %v312_v29 = vmul.f32 %v1572_v11, %v1481_v26 }
 0x5a5   :  { %v254_v52 = vsel %vm251_vm1, %v253_v46, %v249_v49  ;;  %v728_v53 = vsel %vm727_vm2, %v1226_v23, %v724_v47  ;;  %v611_v54 = vpop.f32.mrf.mxu3  ;;  %vm233_vm6 = vmor %vm231_vm5, %vm232_vm4  ;;  %vm838_vm14 = vcmask 195584  }
 0x5a6   :  { %v255_v56 = vmul.f32 %v1470_v14, %v254_v52  ;;  %v733_v58 = vsel %vm730_vm3, %v732_v50, %v728_v53  ;;  %v228_v59 = vsub.f32 1.0, %v227_v51  ;;  %v642_v60 = vmul.f32 %v1222_v6, %v611_v54 }
 0x5a7   :  { %v734_v44 = vmul.f32 %v1528_v17, %v733_v58  ;;  %v238_v14 = vor.u32 1.1754944e-38, %v237_v61  ;;  %v938_v61 = vld [vmem:[%s1736_s9 + $0x10] sm:$0xff] }
 0x5a8   :  { %257 = vst.msk [vmem:[#allocation4 + $0x20] sm:$0xff] %vm154_vm8, %v255_v56  ;;  %v229_v62 = vmul.f32 %v1572_v11, %v228_v59  ;;  %819 = vrot.lane.b32.xlu0 %v642_v60, %s1308_s21 }
 0x5a9   :  { %751 = vst.msk [vmem:[#allocation4 + $0x18] sm:$0xff] %vm154_vm8, %v734_v44  ;;  %v939_v44 = vld [vmem:[%s1736_s9 + $0x18] sm:$0xff] }
 0x5aa   :  { %v230_v1 = vadd.f32 %v1572_v11, %v229_v62  ;;  %962 = vmatpush.msrb.mxu0 %v939_v44  ;;  %v937_v62 = vld [vmem:[%s1736_s9 + $0x8] sm:$0xff] }
 0x5ac   :  { %v234_v57 = vsel %vm233_vm6, %v1572_v11, %v230_v1  ;;  %963 = vmatpush.msrb.mxu0 %v938_v61 }
 0x5ad   :  { %v239_v17 = vsel %vm236_vm7, %v238_v14, %v234_v57  ;;  %v776_v39 = vpop.f32.mrf.mxu3 }
 0x5ae   :  { %v240_v3 = vmul.f32 %v1466_v8, %v239_v17  ;;  %v807_v4 = vmul.f32 %v1226_v23, %v776_v39  ;;  %v843_v23 = vld [vmem:[%s1732_s5 + $0x10] sm:$0xff]  ;;  %964 = vmatpush.msrb.mxu0 %v937_v62 }
 0x5af   :  { %868 = vmatpush.msrb.mxu2 %v843_v23 }
 0x5b0   :  { %256 = vst.msk [vmem:[#allocation4] sm:$0xff] %vm154_vm8, %v240_v3  ;;  %813 = vrot.lane.b32.xlu0 %v478_v48, %s1307_s20  ;;  %827 = vrot.lane.b32.xlu1 %v807_v4, %s1309_s22 }
 0x5b1   :  { %869 = vmatpush.msrb.mxu2 %v842_v24  ;;  %965 = vmatpush.msrb.mxu0 %v936_v63 }
 0x5ca   :  { %v719_v5 = vpop.xlane.xlu2 %718 }
 0x5cb   :  { %1229 = vrcp.f32 %v719_v5  ;;  %v746_v16 = vand.u32 2147483648, %v719_v5  ;;  %v744_v18 = vand.u32 2147483647, %v719_v5  ;;  %vm740_vm10 = vweird.f32 %v719_v5 }
 0x5cd   :  { %v747_v31 = vor.u32 1.1754944e-38, %v746_v16  ;;  %vm745_vm12 = vcmp.eq.f32.partialorder %v744_v18, 8.507059e+37 }
 0x5d1   :  { %v1230_v6 = vpop.eup %1229 }
 0x5d2   :  { %v736_v9 = vmul.f32 %v1230_v6, %v719_v5  ;;  %vm741_vm9 = vweird.f32 %v1230_v6  ;;  %v812_v25 = vpop.permute.xlu2 %811 }
 0x5d3   :  { %v802_v12 = vpop.f32.mrf.mxu1  ;;  %vm742_vm11 = vmor %vm740_vm10, %vm741_vm9  ;;  %v833_v32 = vsel %vm154_vm8, %v312_v29, %v812_v25 }
 0x5d4   :  { %v808_v13 = vmul.f32 %v1230_v6, %v802_v12  ;;  %v737_v15 = vsub.f32 1.0, %v736_v9 }
 0x5d6   :  { %829 = vrot.lane.b32.xlu1 %v808_v13, %s1309_s22  ;;  %v738_v8 = vmul.f32 %v1230_v6, %v737_v15  ;;  %v1190_v13 = vld [vmem:[%s1735_s8] ss:$0 sm:$0xff] }
 0x5d8   :  { %v739_v19 = vadd.f32 %v1230_v6, %v738_v8 }
 0x5da   :  { %v743_v7 = vsel %vm742_vm11, %v1230_v6, %v739_v19  ;;  %v1189_v6 = vld [vmem:[%s1734_s7] ss:$0 sm:$0xff] }
 0x5db   :  { %v748_v20 = vsel %vm745_vm12, %v747_v31, %v743_v7 }
 0x5dc   :  { %v749_v55 = vmul.f32 %v1540_v28, %v748_v20  ;;  %v841_v28 = vld [vmem:[%s1732_s5] sm:$0xff]  ;;  %s1117_s5 = sshll.u32 %s1311_s2, 4  ;;  %s1118_s5 = int_to_ptr.vmem [resolvable:$true] %s1117_s5 }
 0x5dd   :  { %870 = vmatpush.msrb.mxu2 %v841_v28 }
 0x5de   :  { %752 = vst.msk [vmem:[#allocation4 + $0x38] sm:$0xff] %vm154_vm8, %v749_v55 }
 0x5f8   :  { %v822_v40 = vpop.permute.xlu2 %821 }
 0x61a   :  { %v820_v30 = vpop.permute.xlu0 %819 }
 0x61b   :  { %v836_v33 = vsel %vm835_vm13, %v833_v32, %v820_v30  ;;  %v1067_v30 = vld [vmem:[%s1738_s11 + $0x70] sm:$0xff]  ;;  %v1191_v32 = vld [vmem:[%s1737_s10] ss:$0 sm:$0xff]  ;;  %s1312_s10 = smov 128  }
 0x61c   :  { %1125 = dma.vmem_to_hbm [thread:$0]  %s1118_s5, 1024, %s1120_s27, [#allocation5], %s1312_s10, %s1312_s10, %s1307_s20  }
 0x622   :  { %v828_v34 = vpop.permute.xlu1 %827  ;;  %v814_v36 = vpop.permute.xlu0 %813 }
 0x623   :  { %v839_v35 = vsel %vm838_vm14, %v836_v33, %v828_v34  ;;  %v834_v38 = vsel %vm154_vm8, %v313_v37, %v814_v36  ;;  %v1066_v33 = vld [vmem:[%s1738_s11 + $0x68] sm:$0xff]  ;;  %v1064_v37 = vld [vmem:[%s1738_s11 + $0x58] sm:$0xff] }
 0x624   :  { %1162 = vmatmul.msk.f32.vlgmr.msrb.gmra.mxu2 %vm50_vm0, %v839_v35  ;;  %v837_v42 = vsel %vm835_vm13, %v834_v38, %v822_v40  ;;  %v1065_v35 = vld [vmem:[%s1738_s11 + $0x60] sm:$0xff]  ;;  %v1063_v40 = vld [vmem:[%s1738_s11 + $0x50] sm:$0xff] }
 0x648   :  { %v830_v41 = vpop.permute.xlu1 %829 }
 0x649   :  { %v840_v26 = vsel %vm838_vm14, %v837_v42, %v830_v41  ;;  %v1062_v42 = vld [vmem:[%s1738_s11 + $0x48] sm:$0xff] }
 0x64a   :  { %1163 = vmatmul.msk.f32.gmra.mxu2 %vm50_vm0, %v840_v26 }
 0x6a7   :  { %v872_v45 = vpop.f32.mrf.mxu2 }
 0x6a8   :  { %v873_v11 = vadd.f32 %v1188_v43, %v872_v45 }
 0x6aa   :  { %v1616_v46 = vadd.f32 %v873_v11, %v1392_v0  ;;  %v1060_v11 = vld [vmem:[%s1738_s11 + $0x38] sm:$0xff] }
 0x6ac   :  { %v880_v27 = vsel %vm50_vm0, %v1616_v46, 0.0 }
 0x6ad   :  { %881 = vadd.xlane.f32.xlu0 %v880_v27  ;;  %v1059_v27 = vld [vmem:[%s1738_s11 + $0x30] sm:$0xff] }
 0x6cd   :  { %v875_v21 = vpop.f32.mrf.mxu2 }
 0x6ce   :  { %v876_v47 = vadd.f32 %v1188_v43, %v875_v21  ;;  %v1061_v43 = vld [vmem:[%s1738_s11 + $0x40] sm:$0xff]  ;;  %v1058_v21 = vld [vmem:[%s1738_s11 + $0x28] sm:$0xff] }
 0x6d0   :  { %v1621_v49 = vadd.f32 %v876_v47, %v1399_v2  ;;  %v1057_v47 = vld [vmem:[%s1738_s11 + $0x20] sm:$0xff] }
 0x6d2   :  { %v883_v50 = vsel %vm50_vm0, %v1621_v49, 0.0 }
 0x6d3   :  { %884 = vadd.xlane.f32.xlu2 %v883_v50 }
 0x720   :  { %v882_v51 = vpop.xlane.xlu0 %881 }
 0x721   :  { %v886_v52 = vmul.f32 %v882_v51, %v1403_v10 }
 0x723   :  { %v888_v53 = vsub.f32 %v1616_v46, %v886_v52  ;;  %v1056_v52 = vld [vmem:[%s1738_s11 + $0x18] sm:$0xff] }
 0x725   :  { %v890_v0 = vmul.f32 %v888_v53, %v888_v53 }
 0x727   :  { %v892_v54 = vsel %vm50_vm0, %v890_v0, 0.0  ;;  %v1055_v0 = vld [vmem:[%s1738_s11 + $0x10] sm:$0xff] }
 0x728   :  { %893 = vadd.xlane.f32.xlu1 %v892_v54 }
 0x746   :  { %v885_v56 = vpop.xlane.xlu2 %884 }
 0x747   :  { %v887_v58 = vmul.f32 %v885_v56, %v1403_v10 }
 0x749   :  { %v889_v59 = vsub.f32 %v1621_v49, %v887_v58 }
 0x74b   :  { %v891_v2 = vmul.f32 %v889_v59, %v889_v59 }
 0x74d   :  { %v895_v60 = vsel %vm50_vm0, %v891_v2, 0.0 }
 0x74e   :  { %896 = vadd.xlane.f32.xlu0 %v895_v60  ;;  %v1053_v60 = vld [vmem:[%s1738_s11] sm:$0xff] }
 0x79b   :  { %v894_v1 = vpop.xlane.xlu1 %893 }
 0x79c   :  { %v898_v14 = vmul.f32 %v894_v1, %v1403_v10 }
 0x79e   :  { %v900_v57 = vadd.f32 1e-05, %v898_v14 }
 0x7a0   :  { %1231 = vrsqrt.f32 %v900_v57  ;;  %vm908_vm15 = vweird.f32 %v900_v57 }
 0x7a6   :  { %v1232_v17 = vpop.eup %1231 }
 0x7a7   :  { %v903_v39 = vmul.f32 %v1232_v17, %v900_v57  ;;  %vm909_vm8 = vweird.f32 %v1232_v17 }
 0x7a8   :  { %vm910_vm1 = vmor %vm908_vm15, %vm909_vm8 }
 0x7a9   :  { %v904_v3 = vmul.f32 %v1232_v17, %v903_v39 }
 0x7ab   :  { %v905_v4 = vmul.f32 0.5, %v904_v3 }
 0x7ad   :  { %v906_v48 = vsub.f32 1.5, %v905_v4 }
 0x7af   :  { %v907_v5 = vmul.f32 %v1232_v17, %v906_v48 }
 0x7b1   :  { %v911_v9 = vsel %vm910_vm1, %v1232_v17, %v907_v5 }
 0x7b2   :  { %v922_v12 = vmul.f32 %v911_v9, %v888_v53 }
 0x7b4   :  { %v928_v15 = vmul.f32 %v1189_v6, %v922_v12 }
 0x7b6   :  { %v934_v16 = vadd.f32 %v1190_v13, %v928_v15 }
 0x7b8   :  { %1164 = vmatmul.msk.f32.vlgmr.msrb.gmra.mxu0 %vm50_vm0, %v934_v16 }
 0x7c1   :  { %v897_v8 = vpop.xlane.xlu0 %896 }
 0x7c2   :  { %v899_v18 = vmul.f32 %v897_v8, %v1403_v10  ;;  %v1068_v10 = vld [vmem:[%s1738_s11 + $0x78] sm:$0xff] }
 0x7c3   :  { %1073 = vmatpush.msra.mxu3 %v1068_v10 }
 0x7c4   :  { %v901_v19 = vadd.f32 1e-05, %v899_v18 }
 0x7c5   :  { %1074 = vmatpush.msra.mxu3 %v1067_v30 }
 0x7c6   :  { %1233 = vrsqrt.f32 %v901_v19  ;;  %vm918_vm3 = vweird.f32 %v901_v19 }
 0x7c7   :  { %1075 = vmatpush.msra.mxu3 %v1066_v33 }
 0x7c9   :  { %1076 = vmatpush.msra.mxu3 %v1065_v35 }
 0x7cb   :  { %1077 = vmatpush.msra.mxu3 %v1064_v37 }
 0x7cc   :  { %v1234_v31 = vpop.eup %1233 }
 0x7cd   :  { %v913_v7 = vmul.f32 %v1234_v31, %v901_v19  ;;  %vm919_vm2 = vweird.f32 %v1234_v31  ;;  %1078 = vmatpush.msra.mxu3 %v1063_v40 }
 0x7ce   :  { %vm920_vm4 = vmor %vm918_vm3, %vm919_vm2 }
 0x7cf   :  { %v914_v20 = vmul.f32 %v1234_v31, %v913_v7  ;;  %1079 = vmatpush.msra.mxu3 %v1062_v42 }
 0x7d1   :  { %v915_v55 = vmul.f32 0.5, %v914_v20  ;;  %1080 = vmatpush.msra.mxu3 %v1061_v43  ;;  %v1310_v20 = vmov -1.0  }
 0x7d3   :  { %v916_v22 = vsub.f32 1.5, %v915_v55  ;;  %1081 = vmatpush.msra.mxu3 %v1060_v11 }
 0x7d5   :  { %v917_v23 = vmul.f32 %v1234_v31, %v916_v22  ;;  %1082 = vmatpush.msra.mxu3 %v1059_v27 }
 0x7d7   :  { %v921_v24 = vsel %vm920_vm4, %v1234_v31, %v917_v23  ;;  %1083 = vmatpush.msra.mxu3 %v1058_v21 }
 0x7d8   :  { %v923_v28 = vmul.f32 %v921_v24, %v889_v59  ;;  %v1054_v59 = vld [vmem:[%s1738_s11 + $0x8] sm:$0xff] }
 0x7d9   :  { %1084 = vmatpush.msra.mxu3 %v1057_v47 }
 0x7da   :  { %v929_v25 = vmul.f32 %v1189_v6, %v923_v28 }
 0x7db   :  { %1085 = vmatpush.msra.mxu3 %v1056_v52 }
 0x7dc   :  { %v935_v29 = vadd.f32 %v1190_v13, %v929_v25 }
 0x7dd   :  { %1086 = vmatpush.msra.mxu3 %v1055_v0 }
 0x7de   :  { %1165 = vmatmul.msk.f32.gmra.mxu0 %vm50_vm0, %v935_v29 }
 0x7df   :  { %1087 = vmatpush.msra.mxu3 %v1054_v59 }
 0x7e1   :  { %1088 = vmatpush.msra.mxu3 %v1053_v60 }
 0x835   :  { %v967_v34 = vpop.f32.mrf.mxu0 }
 0x836   :  { %v1668_v36 = vadd.f32 %v1191_v32, %v967_v34 }
 0x838   :  { %v1674_v38 = vmul.f32 0.70710677, %v1668_v36  ;;  %v973_v23 = vmul.f32 0.5, %v1668_v36 }
 0x83a   :  { %v981_v41 = vand.u32 2147483647, %v1674_v38  ;;  %vm977_vm10 = vcmp.ge.f32.partialorder %v1674_v38, 0.0 }
 0x83b   :  { %v979_v55 = vsel %vm977_vm10, 1.0, %v1310_v20 }
 0x83c   :  { %v983_v26 = vmul.f32 0.3275911, %v981_v41  ;;  %v1035_v63 = vsub.f32 0.0, %v981_v41 }
 0x83e   :  { %v985_v45 = vadd.f32 1.0, %v983_v26  ;;  %v1037_v57 = vmul.f32 %v1035_v63, %v981_v41 }
 0x840   :  { %1235 = vrcp.f32 %v985_v45  ;;  %v998_v54 = vand.u32 2147483648, %v985_v45  ;;  %v996_v58 = vand.u32 2147483647, %v985_v45  ;;  %vm992_vm6 = vweird.f32 %v985_v45 }
 0x841   :  { %v1039_v3 = vmul.f32 1.442695, %v1037_v57 }
 0x842   :  { %v999_v44 = vor.u32 1.1754944e-38, %v998_v54  ;;  %vm997_vm9 = vcmp.eq.f32.partialorder %v996_v58, 8.507059e+37 }
 0x843   :  { %1237 = vpow2.f32 %v1039_v3 }
 0x846   :  { %v1236_v50 = vpop.eup %1235 }
 0x847   :  { %v988_v51 = vmul.f32 %v1236_v50, %v985_v45  ;;  %vm993_vm5 = vweird.f32 %v1236_v50 }
 0x848   :  { %vm994_vm7 = vmor %vm992_vm6, %vm993_vm5 }
 0x849   :  { %v989_v53 = vsub.f32 1.0, %v988_v51  ;;  %v1238_v8 = vpop.eup %1237 }
 0x84b   :  { %v990_v56 = vmul.f32 %v1236_v50, %v989_v53 }
 0x84d   :  { %v991_v2 = vadd.f32 %v1236_v50, %v990_v56 }
 0x84f   :  { %v995_v61 = vsel %vm994_vm7, %v1236_v50, %v991_v2  ;;  %v1192_v2 = vld [vmem:[%s1739_s12] ss:$0 sm:$0xff] }
 0x850   :  { %v1000_v62 = vsel %vm997_vm9, %v999_v44, %v995_v61 }
 0x851   :  { %v1017_v1 = vmul.f32 1.0614054, %v1000_v62 }
 0x853   :  { %v1019_v14 = vadd.f32 -1.4531521, %v1017_v1 }
 0x855   :  { %v1021_v17 = vmul.f32 %v1019_v14, %v1000_v62 }
 0x857   :  { %v1023_v39 = vadd.f32 1.4214138, %v1021_v17 }
 0x859   :  { %v1025_v4 = vmul.f32 %v1023_v39, %v1000_v62 }
 0x85b   :  { %v1027_v48 = vadd.f32 -0.28449672, %v1025_v4  ;;  %v970_v5 = vpop.f32.mrf.mxu0 }
 0x85c   :  { %v971_v6 = vadd.f32 %v1191_v32, %v970_v5 }
 0x85d   :  { %v1029_v9 = vmul.f32 %v1027_v48, %v1000_v62 }
 0x85e   :  { %v976_v12 = vmul.f32 0.70710677, %v971_v6  ;;  %v974_v56 = vmul.f32 0.5, %v971_v6 }
 0x85f   :  { %v1031_v13 = vadd.f32 0.2548296, %v1029_v9 }
 0x860   :  { %v982_v15 = vand.u32 2147483647, %v976_v12  ;;  %vm978_vm8 = vcmp.ge.f32.partialorder %v976_v12, 0.0 }
 0x861   :  { %v1033_v16 = vmul.f32 %v1031_v13, %v1000_v62  ;;  %v980_v0 = vsel %vm978_vm8, 1.0, %v1310_v20 }
 0x862   :  { %v984_v18 = vmul.f32 0.3275911, %v982_v15  ;;  %v1036_v38 = vsub.f32 0.0, %v982_v15 }
 0x863   :  { %v1043_v19 = vmul.f32 %v1238_v8, %v1033_v16 }
 0x864   :  { %v986_v31 = vadd.f32 1.0, %v984_v18  ;;  %v1038_v42 = vmul.f32 %v1036_v38, %v982_v15 }
 0x865   :  { %v1045_v7 = vsub.f32 1.0, %v1043_v19 }
 0x866   :  { %1239 = vrcp.f32 %v986_v31  ;;  %v1013_v30 = vand.u32 2147483648, %v986_v31  ;;  %v1011_v33 = vand.u32 2147483647, %v986_v31  ;;  %vm1007_vm12 = vweird.f32 %v986_v31 }
 0x867   :  { %v1047_v22 = vmul.f32 %v1045_v7, %v979_v55  ;;  %v1041_v45 = vmul.f32 1.442695, %v1038_v42 }
 0x868   :  { %v1014_v35 = vor.u32 1.1754944e-38, %v1013_v30  ;;  %vm1012_vm14 = vcmp.eq.f32.partialorder %v1011_v33, 8.507059e+37 }
 0x869   :  { %v1049_v24 = vadd.f32 1.0, %v1047_v22  ;;  %1241 = vpow2.f32 %v1041_v45 }
 0x86b   :  { %v1051_v28 = vmul.f32 %v1049_v24, %v973_v23 }
 0x86c   :  { %v1240_v25 = vpop.eup %1239 }
 0x86d   :  { %v1003_v29 = vmul.f32 %v1240_v25, %v986_v31  ;;  %1089 = vmatmul.f32.vlgmr.msra.gmra.mxu3 %v1051_v28  ;;  %vm1008_vm11 = vweird.f32 %v1240_v25 }
 0x86e   :  { %vm1009_vm13 = vmor %vm1007_vm12, %vm1008_vm11 }
 0x86f   :  { %v1004_v10 = vsub.f32 1.0, %v1003_v29  ;;  %v1242_v51 = vpop.eup %1241 }
 0x871   :  { %v1005_v32 = vmul.f32 %v1240_v25, %v1004_v10 }
 0x873   :  { %v1006_v34 = vadd.f32 %v1240_v25, %v1005_v32 }
 0x875   :  { %v1010_v37 = vsel %vm1009_vm13, %v1240_v25, %v1006_v34 }
 0x876   :  { %v1015_v40 = vsel %vm1012_vm14, %v1014_v35, %v1010_v37 }
 0x877   :  { %v1018_v41 = vmul.f32 1.0614054, %v1015_v40 }
 0x879   :  { %v1020_v36 = vadd.f32 -1.4531521, %v1018_v41 }
 0x87b   :  { %v1022_v26 = vmul.f32 %v1020_v36, %v1015_v40 }
 0x87d   :  { %v1024_v43 = vadd.f32 1.4214138, %v1022_v26 }
 0x87f   :  { %v1026_v11 = vmul.f32 %v1024_v43, %v1015_v40 }
 0x881   :  { %v1028_v27 = vadd.f32 -0.28449672, %v1026_v11 }
 0x883   :  { %v1030_v21 = vmul.f32 %v1028_v27, %v1015_v40 }
 0x885   :  { %v1032_v47 = vadd.f32 0.2548296, %v1030_v21 }
 0x887   :  { %v1034_v50 = vmul.f32 %v1032_v47, %v1015_v40 }
 0x889   :  { %v1044_v52 = vmul.f32 %v1242_v51, %v1034_v50 }
 0x88b   :  { %v1046_v53 = vsub.f32 1.0, %v1044_v52 }
 0x88d   :  { %v1048_v54 = vmul.f32 %v1046_v53, %v980_v0 }
 0x88f   :  { %v1050_v58 = vadd.f32 1.0, %v1048_v54 }
 0x891   :  { %v1052_v59 = vmul.f32 %v1050_v58, %v974_v56 }
 0x893   :  { %1092 = vmatmul.f32.gmra.mxu3 %v1052_v59 }
 0x8f0   :  { %v1090_v60 = vpop.f32.mrf.mxu3 }
 0x8f1   :  { %v1091_v44 = vadd.f32 %v1192_v2, %v1090_v60 }
 0x8f3   :  { %v1096_v61 = vadd.f32 %v1091_v44, %v1616_v46 }
 0x8f5   :  { %1098 = vst.msk [vmem:[#allocation2] sm:$0xff] %vm50_vm0, %v1096_v61 }
 0x916   :  { %v1093_v62 = vpop.f32.mrf.mxu3 }
 0x917   :  { %v1094_v63 = vadd.f32 %v1192_v2, %v1093_v62 }
 0x919   :  { %v1097_v1 = vadd.f32 %v1094_v63, %v1621_v49 }
 0x91b   :  { %1099 = vst.msk [vmem:[#allocation2 + $0x8] sm:$0xff] %vm50_vm0, %v1097_v1 }
 0x91c   :  { %1112 = dma.vmem_to_hbm [thread:$0]  %s1105_s14, 256, %s1107_s15, [#allocation3], %s1312_s10, %s1312_s10, %s1307_s20  }
 0x91d   :  { %1291 = dma.done.wait [#allocation3], 256  }
 0x91e   :  { %1292 = vsyncadd [#allocation3], 4294967040 }
 0x91f   :  { %1293 = dma.done.wait [#allocation5], 1024  }
 0x920   :  { %1294 = vsyncadd [#allocation5], 4294966272 }
 0x921   :  { %1134 = vsyncpa [#allocation3], 1 }
 0x922   :  { %1135 = vsyncpa [#allocation5], 1 }

</bundles_post_ra>
